<compile_context>
chip_gen: v5e
topology: v5e:2x2
jax: 0.10.0
libtpu: 0.0.40
codegen_flags: <defaults>
</compile_context>

<pallas_src>
import functools

import jax
import jax.numpy as jnp
from jax.experimental import pallas as pl
from jax.experimental.pallas import tpu as pltpu


def _round_up(n, m):
    return ((n + m - 1) // m) * m


def _pad2d(a, rows, cols):
    return jnp.pad(a, ((0, rows - a.shape[0]), (0, cols - a.shape[1])))


def _sigmoid(x):
    # exp lands on the EUP slot; exact divide keeps parity with torch.sigmoid.
    return 1.0 / (1.0 + jnp.exp(-x))


def _vmem_limit_bytes():
    """Generation-aware VMEM limit: ~3/4 of physical, clamped to [32, 96] MiB."""
    cap = 128 << 20
    try:
        info = pltpu.get_tpu_info()
        cap = int(getattr(info, "vmem_capacity_bytes", cap))
    except Exception:
        pass
    return max(32 << 20, min((cap * 3) // 4, 96 << 20))


def _num_tensorcores():
    """Best-effort TensorCore count per chip (v7x: 2, v5e/v6e: 1)."""
    try:
        dev = jax.devices()[0]
        for attr in ("num_cores", "core_count"):
            v = getattr(dev, attr, None)
            if v:
                return int(v)
    except Exception:
        pass
    return 1


def _pick_block(n, per_row_bytes, fixed_bytes, vmem_limit, cores):
    """Largest row block (multiple of 8, or the full extent) fitting the VMEM
    budget; on multi-core chips prefer >= 2 grid steps per TensorCore."""
    budget = (vmem_limit * 3) // 4 - fixed_bytes
    cands = [d for d in range(1, n + 1) if n % d == 0 and (d % 8 == 0 or d == n)]
    fits = [d for d in cands if d * per_row_bytes <= budget] or [min(cands)]
    if cores >= 2:
        multi = [d for d in fits if n // d >= 2 * cores]
        if multi:
            return max(multi)
    return max(fits)


# -----------------------------------------------------------------------------
# Encoder kernel: fused im2col + conv3x3(pad=1) + ReLU + global average pool.
# One image per grid step; im2col never touches HBM.
# -----------------------------------------------------------------------------
def _encoder_kernel(x_ref, w_ref, o_ref, *, H, W, Wp, R):
    """x_ref: (1, Hp*Wp, C) zero-padded NHWC image, flattened over space.
       w_ref: (9, C, Fp) bf16 per-tap weights, tap index t = ky*3 + kx.
       o_ref: (1, 1, Fp) pooled features.

    For a flattened padded image, the conv output at padded position p reads
    input rows p + (ky-1)*Wp + (kx-1); restricting p to the contiguous range
    [Wp+1, Wp+1+R) (covering every original pixel) makes each tap a static
    row-window matmul built entirely in VMEM."""
    fp = w_ref.shape[-1]
    acc = jnp.zeros((R, fp), jnp.float32)
    for ky in range(3):
        for kx in range(3):
            s = ky * Wp + kx                              # window start for this tap
            lhs = x_ref[0, s:s + R, :].astype(jnp.bfloat16)
            acc = acc + jnp.dot(lhs, w_ref[ky * 3 + kx],
                                preferred_element_type=jnp.float32)
    feat = jnp.maximum(acc, 0.0)                          # ReLU
    # Exclude rows whose padded column is a zero-pad column from the pool.
    col = (jax.lax.broadcasted_iota(jnp.int32, (R, fp), 0) + (Wp + 1)) % Wp
    valid = jnp.logical_and(col >= 1, col <= W)
    pooled = jnp.sum(jnp.where(valid, feat, 0.0), axis=0, keepdims=True)
    o_ref[0] = pooled * (1.0 / float(H * W))              # global average pool


def _encode(xflat, w_taps, *, H, W, vmem_limit):
    n, L, C = xflat.shape
    Wp = W + 2
    assert L == (H + 2) * Wp
    R = (H - 1) * Wp + W
    fp = w_taps.shape[-1]
    kernel = functools.partial(_encoder_kernel, H=H, W=W, Wp=Wp, R=R)
    out = pl.pallas_call(
        kernel,
        out_shape=jax.ShapeDtypeStruct((n, 1, fp), jnp.float32),
        grid=(n,),
        in_specs=[
            pl.BlockSpec((1, L, C), lambda i: (i, 0, 0)),       # raw image rows
            pl.BlockSpec(w_taps.shape, lambda i: (0, 0, 0)),    # per-tap weights
        ],
        out_specs=pl.BlockSpec((1, 1, fp), lambda i: (i, 0, 0)),
        compiler_params=pltpu.CompilerParams(
            dimension_semantics=("parallel",),
            vmem_limit_bytes=vmem_limit),
    )(xflat, w_taps)
    return out.reshape(n, fp)


# -----------------------------------------------------------------------------
# Projector-only head (attn=False): stacked (2B, Fp) rows, row-tiled.
# -----------------------------------------------------------------------------
def _proj_kernel(h_ref, wp1_ref, wp2_ref, z_ref):
    hb = h_ref[...].astype(jnp.bfloat16)
    p = jnp.maximum(
        jnp.dot(hb, wp1_ref[...], preferred_element_type=jnp.float32), 0.0)
    z_ref[...] = jnp.dot(p.astype(jnp.bfloat16), wp2_ref[...],
                         preferred_element_type=jnp.float32)


def _project(h, wp1, wp2, *, vmem_limit, cores):
    n, fp = h.shape
    pp = wp2.shape[1]
    per_row = 2 * (fp * 4 + pp * 4)                        # dbl-buffered h + z rows
    fixed = 2 * sum(int(w.size) * w.dtype.itemsize for w in (wp1, wp2))
    rt = _pick_block(n, per_row, fixed, vmem_limit, cores)
    return pl.pallas_call(
        _proj_kernel,
        out_shape=jax.ShapeDtypeStruct((n, pp), jnp.float32),
        grid=(n // rt,),
        in_specs=[
            pl.BlockSpec((rt, fp), lambda i: (i, 0)),
            pl.BlockSpec(wp1.shape, lambda i: (0, 0)),
            pl.BlockSpec(wp2.shape, lambda i: (0, 0)),
        ],
        out_specs=pl.BlockSpec((rt, pp), lambda i: (i, 0)),
        compiler_params=pltpu.CompilerParams(
            dimension_semantics=("parallel",),
            vmem_limit_bytes=vmem_limit),
    )(h, wp1, wp2)


# -----------------------------------------------------------------------------
# Attention head: attn-MLP on slab 0 (h_i), mask broadcast onto both slabs,
# projector fused in the same kernel.  Tiled over the batch.
# -----------------------------------------------------------------------------
def _attn_head_kernel(h_ref, wp1_ref, wp2_ref, wa1_ref, wa2_ref, wa3_ref,
                      hm_o, z_o, mask_o, *, f_real, mask_type):
    h = h_ref[...]                                          # (2, Bt, Fp) f32
    hi = h[0].astype(jnp.bfloat16)                          # mask comes from h_i only

    a = jnp.dot(hi, wa1_ref[...], preferred_element_type=jnp.float32)
    a = a * _sigmoid(a)                                     # SiLU
    a = jnp.dot(a.astype(jnp.bfloat16), wa2_ref[...],
                preferred_element_type=jnp.float32)
    a = a * _sigmoid(a)                                     # SiLU
    a = jnp.dot(a.astype(jnp.bfloat16), wa3_ref[...],
                preferred_element_type=jnp.float32)
    mask = _sigmoid(a)                                      # Sequential's Sigmoid

    lane = jax.lax.broadcasted_iota(jnp.int32, mask.shape, 1)
    if mask_type == 'hard':
        mask = jnp.round(mask)
    elif mask_type == 'softmax':
        # Exclude zero-padded lanes from the normalization; exact divide for
        # parity with torch.softmax.
        m = jnp.where(lane < f_real, mask, -jnp.inf)
        e = jnp.exp(m - jnp.max(m, axis=1, keepdims=True))
        mask = e / jnp.sum(e, axis=1, keepdims=True)
    elif mask_type == 'sigmoid':
        mask = _sigmoid(mask)                               # double sigmoid, as in torch
    mask = jnp.where(lane < f_real, mask, 0.0)              # zero the padded lanes
    mask_o[...] = mask

    hm = h * mask[None, :, :]                               # broadcast over both slabs
    hm_o[...] = hm

    # projector on each slab (no sublane-merging reshape needed)
    for s in range(2):
        p = jnp.maximum(
            jnp.dot(hm[s].astype(jnp.bfloat16), wp1_ref[...],
                    preferred_element_type=jnp.float32), 0.0)
        z_o[s] = jnp.dot(p.astype(jnp.bfloat16), wp2_ref[...],
                         preferred_element_type=jnp.float32)


def _attn_head(h3, wp1, wp2, wa1, wa2, wa3, *, f_real, mask_type,
               vmem_limit, cores):
    _, b, fp = h3.shape
    pp = wp2.shape[1]
    per_row = 2 * (2 * fp * 4 + 2 * fp * 4 + 2 * pp * 4 + fp * 4)
    fixed = 2 * sum(int(w.size) * w.dtype.itemsize
                    for w in (wp1, wp2, wa1, wa2, wa3))
    bt = _pick_block(b, per_row, fixed, vmem_limit, cores)
    kernel = functools.partial(_attn_head_kernel, f_real=f_real,
                               mask_type=mask_type)
    hm, z, mask = pl.pallas_call(
        kernel,
        out_shape=(
            jax.ShapeDtypeStruct((2, b, fp), jnp.float32),   # masked h (both views)
            jax.ShapeDtypeStruct((2, b, pp), jnp.float32),   # z (both views)
            jax.ShapeDtypeStruct((b, fp), jnp.float32),      # mask
        ),
        grid=(b // bt,),
        in_specs=[
            pl.BlockSpec((2, bt, fp), lambda i: (0, i, 0)),
            pl.BlockSpec(wp1.shape, lambda i: (0, 0)),
            pl.BlockSpec(wp2.shape, lambda i: (0, 0)),
            pl.BlockSpec(wa1.shape, lambda i: (0, 0)),
            pl.BlockSpec(wa2.shape, lambda i: (0, 0)),
            pl.BlockSpec(wa3.shape, lambda i: (0, 0)),
        ],
        out_specs=(
            pl.BlockSpec((2, bt, fp), lambda i: (0, i, 0)),
            pl.BlockSpec((2, bt, pp), lambda i: (0, i, 0)),
            pl.BlockSpec((bt, fp), lambda i: (i, 0)),
        ),
        compiler_params=pltpu.CompilerParams(
            dimension_semantics=("parallel",),
            vmem_limit_bytes=vmem_limit),
    )(h3, wp1, wp2, wa1, wa2, wa3)
    return hm, z, mask


# -----------------------------------------------------------------------------
# SimCLR module (JAX glue + Pallas hot path)
# -----------------------------------------------------------------------------
class SimCLRPallas:
    def __init__(self, key, in_channels, projection_dim, n_features):
        self.n_features = n_features
        self.projection_dim = projection_dim
        F, C, P = n_features, in_channels, projection_dim
        self.f_pad = _round_up(F, 128)
        self.p_pad = _round_up(P, 128)
        self._vmem_limit = _vmem_limit_bytes()
        self._cores = _num_tensorcores()

        k = jax.random.split(key, 6)
        # encoder conv weight (out=F, in=C, 3, 3) -> per-tap (9, C, Fp), bf16
        w_conv = jax.random.normal(k[0], (F, C, 3, 3), jnp.float32) * (C * 9) ** -0.5
        w_taps = jnp.transpose(w_conv, (2, 3, 1, 0)).reshape(9, C, F)
        self.w_taps = jnp.pad(
            w_taps, ((0, 0), (0, 0), (0, self.f_pad - F))).astype(jnp.bfloat16)
        # projector / attn weights, stored (in, out), lane-padded to 128, bf16
        scale = F ** -0.5
        self.wp1 = _pad2d(jax.random.normal(k[1], (F, F), jnp.float32) * scale,
                          self.f_pad, self.f_pad).astype(jnp.bfloat16)
        self.wp2 = _pad2d(jax.random.normal(k[2], (F, P), jnp.float32) * scale,
                          self.f_pad, self.p_pad).astype(jnp.bfloat16)
        self.wa1 = _pad2d(jax.random.normal(k[3], (F, F), jnp.float32) * scale,
                          self.f_pad, self.f_pad).astype(jnp.bfloat16)
        self.wa2 = _pad2d(jax.random.normal(k[4], (F, F), jnp.float32) * scale,
                          self.f_pad, self.f_pad).astype(jnp.bfloat16)
        self.wa3 = _pad2d(jax.random.normal(k[5], (F, F), jnp.float32) * scale,
                          self.f_pad, self.f_pad).astype(jnp.bfloat16)

    def _encode_images(self, x):
        # x: (n, C, H, W) NCHW -> zero-pad spatially, NHWC, flatten space.
        # Only raw-image bytes hit HBM; im2col happens inside the kernel.
        n, C, H, W = x.shape
        xp = jnp.pad(x, ((0, 0), (0, 0), (1, 1), (1, 1)))
        xflat = xp.transpose(0, 2, 3, 1).reshape(n, (H + 2) * (W + 2), C)
        return _encode(xflat, self.w_taps, H=H, W=W,
                       vmem_limit=self._vmem_limit)

    def forward(self, x_i, x_j, attn=False, mask_type='sigmoid'):
        F, P = self.n_features, self.projection_dim
        if x_j is None:
            h = self._encode_images(x_i)
            return h[:, :F]

        B = x_i.shape[0]
        # Fuse both views into a single encoder pass (2B images, one weight DMA).
        x = jnp.concatenate([x_i, x_j], axis=0)
        h = self._encode_images(x)                           # (2B, Fp)

        if attn:
            h3 = h.reshape(2, B, self.f_pad)                 # view-major layout
            hm, z, mask = _attn_head(
                h3, self.wp1, self.wp2, self.wa1, self.wa2, self.wa3,
                f_real=F, mask_type=mask_type,
                vmem_limit=self._vmem_limit, cores=self._cores)
            return (hm[0, :, :F], hm[1, :, :F],
                    z[0, :, :P], z[1, :, :P], mask[:, :F])

        z = _project(h, self.wp1, self.wp2,
                     vmem_limit=self._vmem_limit, cores=self._cores)
        return (h[:B, :F], h[B:, :F], z[:B, :P], z[B:, :P], None)


if __name__ == "__main__":
    B, C, H, W = 2, 4, 16, 16
    n_features, projection_dim = 32, 16

    key = jax.random.PRNGKey(0)
    k_model, k_i, k_j = jax.random.split(key, 3)
    model = SimCLRPallas(k_model, C, projection_dim, n_features)

    x_i = jax.random.normal(k_i, (B, C, H, W), jnp.float32)
    x_j = jax.random.normal(k_j, (B, C, H, W), jnp.float32)

    # encoder-only path (x_j == None)
    h_only = model.forward(x_i, None)
    jax.block_until_ready(h_only)
    assert h_only.shape == (B, n_features)

    # full path without attention (no mask computed / written)
    h_i, h_j, z_i, z_j, mask = model.forward(x_i, x_j, attn=False)
    jax.block_until_ready((h_i, h_j, z_i, z_j))
    assert mask is None

    # full path with attention mask, all mask types
    for mt in ("sigmoid", "hard", "softmax"):
        h_i, h_j, z_i, z_j, mask = model.forward(x_i, x_j, attn=True, mask_type=mt)
        jax.block_until_ready((h_i, h_j, z_i, z_j, mask))
        assert mask.shape == (B, n_features)

    assert h_i.shape == (B, n_features) and z_i.shape == (B, projection_dim)
    print("KERNEL_OK")
</pallas_src>

<mosaic_0001>
module attributes {stable_mosaic.version = 11 : i64} {
  func.func @_encoder_kernel(%arg0: i32, %arg1: memref<1x324x4xf32, #tpu.memory_space<vmem>>, %arg2: memref<9x4x128xbf16, #tpu.memory_space<vmem>>, %arg3: memref<1x1x128xf32, #tpu.memory_space<vmem>>) attributes {dimension_semantics = [#tpu.dimension_semantics<parallel>], iteration_bounds = array<i64: 2>, scalar_prefetch = 0 : i64, scratch_operands = 0 : i64, tpu.core_type = #tpu.core_type<tc>, window_params = [{transform_indices = @transform_0, window_bounds = array<i64: 1, 324, 4>}, {pipeline_mode = #tpu.pipeline_mode<synchronous>, transform_indices = @transform_1, window_bounds = array<i64: 9, 4, 128>}, {transform_indices = @transform_2, window_bounds = array<i64: 1, 1, 128>}]} {
    %cst = arith.constant 0.000000e+00 : f32
    %0 = vector.broadcast %cst : f32 to vector<286x128xf32>
    %c0 = arith.constant 0 : index
    %c0_0 = arith.constant 0 : index
    %c0_1 = arith.constant 0 : index
    %1 = vector.load %arg1[%c0, %c0_0, %c0_1] : memref<1x324x4xf32, #tpu.memory_space<vmem>>, vector<1x286x4xf32>
    %2 = vector.shape_cast %1 : vector<1x286x4xf32> to vector<286x4xf32>
    %3 = arith.truncf %2 : vector<286x4xf32> to vector<286x4xbf16>
    %c0_2 = arith.constant 0 : index
    %c0_3 = arith.constant 0 : index
    %c0_4 = arith.constant 0 : index
    %4 = vector.load %arg2[%c0_2, %c0_3, %c0_4] : memref<9x4x128xbf16, #tpu.memory_space<vmem>>, vector<1x4x128xbf16>
    %5 = vector.shape_cast %4 : vector<1x4x128xbf16> to vector<4x128xbf16>
    %cst_5 = arith.constant dense<0.000000e+00> : vector<286x128xf32>
    %6 = tpu.matmul %3, %5, %cst_5 {dimension_numbers = #tpu.dot_dimension_numbers<[1], [0], [0], [1], [0, 0, 1, 1], [], []>} : vector<286x4xbf16>, vector<4x128xbf16>, vector<286x128xf32> -> vector<286x128xf32>
    %7 = arith.addf %0, %6 : vector<286x128xf32>
    %c0_6 = arith.constant 0 : index
    %c1 = arith.constant 1 : index
    %c0_7 = arith.constant 0 : index
    %8 = vector.load %arg1[%c0_6, %c1, %c0_7] : memref<1x324x4xf32, #tpu.memory_space<vmem>>, vector<1x286x4xf32>
    %9 = vector.shape_cast %8 : vector<1x286x4xf32> to vector<286x4xf32>
    %10 = arith.truncf %9 : vector<286x4xf32> to vector<286x4xbf16>
    %c1_8 = arith.constant 1 : index
    %c0_9 = arith.constant 0 : index
    %c0_10 = arith.constant 0 : index
    %11 = vector.load %arg2[%c1_8, %c0_9, %c0_10] : memref<9x4x128xbf16, #tpu.memory_space<vmem>>, vector<1x4x128xbf16>
    %12 = vector.shape_cast %11 : vector<1x4x128xbf16> to vector<4x128xbf16>
    %cst_11 = arith.constant dense<0.000000e+00> : vector<286x128xf32>
    %13 = tpu.matmul %10, %12, %cst_11 {dimension_numbers = #tpu.dot_dimension_numbers<[1], [0], [0], [1], [0, 0, 1, 1], [], []>} : vector<286x4xbf16>, vector<4x128xbf16>, vector<286x128xf32> -> vector<286x128xf32>
    %14 = arith.addf %7, %13 : vector<286x128xf32>
    %c0_12 = arith.constant 0 : index
    %c2 = arith.constant 2 : index
    %c0_13 = arith.constant 0 : index
    %15 = vector.load %arg1[%c0_12, %c2, %c0_13] : memref<1x324x4xf32, #tpu.memory_space<vmem>>, vector<1x286x4xf32>
    %16 = vector.shape_cast %15 : vector<1x286x4xf32> to vector<286x4xf32>
    %17 = arith.truncf %16 : vector<286x4xf32> to vector<286x4xbf16>
    %c2_14 = arith.constant 2 : index
    %c0_15 = arith.constant 0 : index
    %c0_16 = arith.constant 0 : index
    %18 = vector.load %arg2[%c2_14, %c0_15, %c0_16] : memref<9x4x128xbf16, #tpu.memory_space<vmem>>, vector<1x4x128xbf16>
    %19 = vector.shape_cast %18 : vector<1x4x128xbf16> to vector<4x128xbf16>
    %cst_17 = arith.constant dense<0.000000e+00> : vector<286x128xf32>
    %20 = tpu.matmul %17, %19, %cst_17 {dimension_numbers = #tpu.dot_dimension_numbers<[1], [0], [0], [1], [0, 0, 1, 1], [], []>} : vector<286x4xbf16>, vector<4x128xbf16>, vector<286x128xf32> -> vector<286x128xf32>
    %21 = arith.addf %14, %20 : vector<286x128xf32>
    %c0_18 = arith.constant 0 : index
    %c18 = arith.constant 18 : index
    %c0_19 = arith.constant 0 : index
    %22 = vector.load %arg1[%c0_18, %c18, %c0_19] : memref<1x324x4xf32, #tpu.memory_space<vmem>>, vector<1x286x4xf32>
    %23 = vector.shape_cast %22 : vector<1x286x4xf32> to vector<286x4xf32>
    %24 = arith.truncf %23 : vector<286x4xf32> to vector<286x4xbf16>
    %c3 = arith.constant 3 : index
    %c0_20 = arith.constant 0 : index
    %c0_21 = arith.constant 0 : index
    %25 = vector.load %arg2[%c3, %c0_20, %c0_21] : memref<9x4x128xbf16, #tpu.memory_space<vmem>>, vector<1x4x128xbf16>
    %26 = vector.shape_cast %25 : vector<1x4x128xbf16> to vector<4x128xbf16>
    %cst_22 = arith.constant dense<0.000000e+00> : vector<286x128xf32>
    %27 = tpu.matmul %24, %26, %cst_22 {dimension_numbers = #tpu.dot_dimension_numbers<[1], [0], [0], [1], [0, 0, 1, 1], [], []>} : vector<286x4xbf16>, vector<4x128xbf16>, vector<286x128xf32> -> vector<286x128xf32>
    %28 = arith.addf %21, %27 : vector<286x128xf32>
    %c0_23 = arith.constant 0 : index
    %c19 = arith.constant 19 : index
    %c0_24 = arith.constant 0 : index
    %29 = vector.load %arg1[%c0_23, %c19, %c0_24] : memref<1x324x4xf32, #tpu.memory_space<vmem>>, vector<1x286x4xf32>
    %30 = vector.shape_cast %29 : vector<1x286x4xf32> to vector<286x4xf32>
    %31 = arith.truncf %30 : vector<286x4xf32> to vector<286x4xbf16>
    %c4 = arith.constant 4 : index
    %c0_25 = arith.constant 0 : index
    %c0_26 = arith.constant 0 : index
    %32 = vector.load %arg2[%c4, %c0_25, %c0_26] : memref<9x4x128xbf16, #tpu.memory_space<vmem>>, vector<1x4x128xbf16>
    %33 = vector.shape_cast %32 : vector<1x4x128xbf16> to vector<4x128xbf16>
    %cst_27 = arith.constant dense<0.000000e+00> : vector<286x128xf32>
    %34 = tpu.matmul %31, %33, %cst_27 {dimension_numbers = #tpu.dot_dimension_numbers<[1], [0], [0], [1], [0, 0, 1, 1], [], []>} : vector<286x4xbf16>, vector<4x128xbf16>, vector<286x128xf32> -> vector<286x128xf32>
    %35 = arith.addf %28, %34 : vector<286x128xf32>
    %c0_28 = arith.constant 0 : index
    %c20 = arith.constant 20 : index
    %c0_29 = arith.constant 0 : index
    %36 = vector.load %arg1[%c0_28, %c20, %c0_29] : memref<1x324x4xf32, #tpu.memory_space<vmem>>, vector<1x286x4xf32>
    %37 = vector.shape_cast %36 : vector<1x286x4xf32> to vector<286x4xf32>
    %38 = arith.truncf %37 : vector<286x4xf32> to vector<286x4xbf16>
    %c5 = arith.constant 5 : index
    %c0_30 = arith.constant 0 : index
    %c0_31 = arith.constant 0 : index
    %39 = vector.load %arg2[%c5, %c0_30, %c0_31] : memref<9x4x128xbf16, #tpu.memory_space<vmem>>, vector<1x4x128xbf16>
    %40 = vector.shape_cast %39 : vector<1x4x128xbf16> to vector<4x128xbf16>
    %cst_32 = arith.constant dense<0.000000e+00> : vector<286x128xf32>
    %41 = tpu.matmul %38, %40, %cst_32 {dimension_numbers = #tpu.dot_dimension_numbers<[1], [0], [0], [1], [0, 0, 1, 1], [], []>} : vector<286x4xbf16>, vector<4x128xbf16>, vector<286x128xf32> -> vector<286x128xf32>
    %42 = arith.addf %35, %41 : vector<286x128xf32>
    %c0_33 = arith.constant 0 : index
    %c36 = arith.constant 36 : index
    %c0_34 = arith.constant 0 : index
    %43 = vector.load %arg1[%c0_33, %c36, %c0_34] : memref<1x324x4xf32, #tpu.memory_space<vmem>>, vector<1x286x4xf32>
    %44 = vector.shape_cast %43 : vector<1x286x4xf32> to vector<286x4xf32>
    %45 = arith.truncf %44 : vector<286x4xf32> to vector<286x4xbf16>
    %c6 = arith.constant 6 : index
    %c0_35 = arith.constant 0 : index
    %c0_36 = arith.constant 0 : index
    %46 = vector.load %arg2[%c6, %c0_35, %c0_36] : memref<9x4x128xbf16, #tpu.memory_space<vmem>>, vector<1x4x128xbf16>
    %47 = vector.shape_cast %46 : vector<1x4x128xbf16> to vector<4x128xbf16>
    %cst_37 = arith.constant dense<0.000000e+00> : vector<286x128xf32>
    %48 = tpu.matmul %45, %47, %cst_37 {dimension_numbers = #tpu.dot_dimension_numbers<[1], [0], [0], [1], [0, 0, 1, 1], [], []>} : vector<286x4xbf16>, vector<4x128xbf16>, vector<286x128xf32> -> vector<286x128xf32>
    %49 = arith.addf %42, %48 : vector<286x128xf32>
    %c0_38 = arith.constant 0 : index
    %c37 = arith.constant 37 : index
    %c0_39 = arith.constant 0 : index
    %50 = vector.load %arg1[%c0_38, %c37, %c0_39] : memref<1x324x4xf32, #tpu.memory_space<vmem>>, vector<1x286x4xf32>
    %51 = vector.shape_cast %50 : vector<1x286x4xf32> to vector<286x4xf32>
    %52 = arith.truncf %51 : vector<286x4xf32> to vector<286x4xbf16>
    %c7 = arith.constant 7 : index
    %c0_40 = arith.constant 0 : index
    %c0_41 = arith.constant 0 : index
    %53 = vector.load %arg2[%c7, %c0_40, %c0_41] : memref<9x4x128xbf16, #tpu.memory_space<vmem>>, vector<1x4x128xbf16>
    %54 = vector.shape_cast %53 : vector<1x4x128xbf16> to vector<4x128xbf16>
    %cst_42 = arith.constant dense<0.000000e+00> : vector<286x128xf32>
    %55 = tpu.matmul %52, %54, %cst_42 {dimension_numbers = #tpu.dot_dimension_numbers<[1], [0], [0], [1], [0, 0, 1, 1], [], []>} : vector<286x4xbf16>, vector<4x128xbf16>, vector<286x128xf32> -> vector<286x128xf32>
    %56 = arith.addf %49, %55 : vector<286x128xf32>
    %c0_43 = arith.constant 0 : index
    %c38 = arith.constant 38 : index
    %c0_44 = arith.constant 0 : index
    %57 = vector.load %arg1[%c0_43, %c38, %c0_44] : memref<1x324x4xf32, #tpu.memory_space<vmem>>, vector<1x286x4xf32>
    %58 = vector.shape_cast %57 : vector<1x286x4xf32> to vector<286x4xf32>
    %59 = arith.truncf %58 : vector<286x4xf32> to vector<286x4xbf16>
    %c8 = arith.constant 8 : index
    %c0_45 = arith.constant 0 : index
    %c0_46 = arith.constant 0 : index
    %60 = vector.load %arg2[%c8, %c0_45, %c0_46] : memref<9x4x128xbf16, #tpu.memory_space<vmem>>, vector<1x4x128xbf16>
    %61 = vector.shape_cast %60 : vector<1x4x128xbf16> to vector<4x128xbf16>
    %cst_47 = arith.constant dense<0.000000e+00> : vector<286x128xf32>
    %62 = tpu.matmul %59, %61, %cst_47 {dimension_numbers = #tpu.dot_dimension_numbers<[1], [0], [0], [1], [0, 0, 1, 1], [], []>} : vector<286x4xbf16>, vector<4x128xbf16>, vector<286x128xf32> -> vector<286x128xf32>
    %63 = arith.addf %56, %62 : vector<286x128xf32>
    %cst_48 = arith.constant 0.000000e+00 : f32
    %64 = vector.broadcast %cst_48 : f32 to vector<286x128xf32>
    %65 = arith.maximumf %63, %64 : vector<286x128xf32>
    %66 = tpu.iota {dimensions = array<i32: 0>} : vector<286x128xi32>
    %c19_i32 = arith.constant 19 : i32
    %67 = vector.broadcast %c19_i32 : i32 to vector<286x128xi32>
    %68 = arith.addi %66, %67 : vector<286x128xi32>
    %c18_i32 = arith.constant 18 : i32
    %c0_i32 = arith.constant 0 : i32
    %69 = arith.cmpi eq, %c18_i32, %c0_i32 : i32
    %c1_i32 = arith.constant 1 : i32
    %70 = arith.select %69, %c1_i32, %c18_i32 : i32
    %71 = vector.broadcast %70 : i32 to vector<286x128xi32>
    %72 = arith.remsi %68, %71 : vector<286x128xi32>
    %c0_i32_49 = arith.constant 0 : i32
    %73 = vector.broadcast %c0_i32_49 : i32 to vector<286x128xi32>
    %74 = arith.cmpi ne, %72, %73 : vector<286x128xi32>
    %c0_i32_50 = arith.constant 0 : i32
    %75 = vector.broadcast %c0_i32_50 : i32 to vector<286x128xi32>
    %76 = arith.cmpi slt, %72, %75 : vector<286x128xi32>
    %c0_i32_51 = arith.constant 0 : i32
    %77 = arith.cmpi slt, %70, %c0_i32_51 : i32
    %78 = vector.broadcast %77 : i1 to vector<286x128xi1>
    %79 = vector.broadcast %78 : vector<286x128xi1> to vector<286x128xi1>
    %80 = arith.xori %76, %79 : vector<286x128xi1>
    %81 = arith.andi %80, %74 : vector<286x128xi1>
    %82 = vector.broadcast %70 : i32 to vector<286x128xi32>
    %83 = arith.addi %72, %82 : vector<286x128xi32>
    %84 = arith.select %81, %83, %72 : vector<286x128xi1>, vector<286x128xi32>
    %c1_i32_52 = arith.constant 1 : i32
    %85 = vector.broadcast %c1_i32_52 : i32 to vector<286x128xi32>
    %86 = arith.cmpi sge, %84, %85 : vector<286x128xi32>
    %c16_i32 = arith.constant 16 : i32
    %87 = vector.broadcast %c16_i32 : i32 to vector<286x128xi32>
    %88 = arith.cmpi sle, %84, %87 : vector<286x128xi32>
    %89 = arith.andi %86, %88 : vector<286x128xi1>
    %cst_53 = arith.constant 0.000000e+00 : f32
    %90 = vector.broadcast %cst_53 : f32 to vector<286x128xf32>
    %91 = arith.select %89, %65, %90 : vector<286x128xi1>, vector<286x128xf32>
    %cst_54 = arith.constant dense<0.000000e+00> : vector<128xf32>
    %92 = vector.multi_reduction <add>, %91, %cst_54 [0] : vector<286x128xf32> to vector<128xf32>
    %93 = vector.shape_cast %92 : vector<128xf32> to vector<1x128xf32>
    %cst_55 = arith.constant 3.906250e-03 : f32
    %94 = vector.broadcast %cst_55 : f32 to vector<1x128xf32>
    %95 = arith.mulf %93, %94 : vector<1x128xf32>
    %c0_56 = arith.constant 0 : index
    %c0_57 = arith.constant 0 : index
    %c0_58 = arith.constant 0 : index
    %96 = vector.load %arg3[%c0_56, %c0_57, %c0_58] : memref<1x1x128xf32, #tpu.memory_space<vmem>>, vector<1x1x128xf32>
    %97 = vector.shape_cast %96 : vector<1x1x128xf32> to vector<1x128xf32>
    %98 = vector.shape_cast %95 : vector<1x128xf32> to vector<1x1x128xf32>
    tpu.vector_store %arg3[%c0_56, %c0_57, %c0_58], %98 {strides = array<i32>} : memref<1x1x128xf32, #tpu.memory_space<vmem>>, vector<1x1x128xf32>,
    return
  }
  func.func @transform_0(%arg0: i32) -> (i32, i32, i32) {
    %c0_i32 = arith.constant 0 : i32
    %c0_i32_0 = arith.constant 0 : i32
    %c0_i32_1 = arith.constant 0 : i32
    return %arg0, %c0_i32, %c0_i32_0 : i32, i32, i32
  }
  func.func @transform_1(%arg0: i32) -> (i32, i32, i32) {
    %c0_i32 = arith.constant 0 : i32
    %c0_i32_0 = arith.constant 0 : i32
    %c0_i32_1 = arith.constant 0 : i32
    %c0_i32_2 = arith.constant 0 : i32
    return %c0_i32, %c0_i32_0, %c0_i32_1 : i32, i32, i32
  }
  func.func @transform_2(%arg0: i32) -> (i32, i32, i32) {
    %c0_i32 = arith.constant 0 : i32
    %c0_i32_0 = arith.constant 0 : i32
    %c0_i32_1 = arith.constant 0 : i32
    return %arg0, %c0_i32, %c0_i32_0 : i32, i32, i32
  }
}

</mosaic_0001>

<bundles_post_ra>
// kernel: tpu_custom_call.1
= control target key start
LH: loop header
LB: loop body
LE: loop exit
PB: predicated region body
PF: predicated region fallthrough
CT: control target
= control target key end

     0   :  { %7 = vsyncpa [#allocation3], 0  ;;  %s5860_s0 = inlined_call_operand.vmem [shape: f32[2,324,4], index: 0, kind: input, shape index: {}]   ;;  %s5861_s1 = inlined_call_operand.vmem [shape: bf16[9,4,128], index: 1, kind: input, shape index: {}]   ;;  %s5862_s2 = inlined_call_operand.hbm [shape: f32[2,1,128], index: 2, kind: output, shape index: {}]  }
   0x1   :  { %9 = vsyncpa [#allocation3 + $0x1], 0  ;;  %s4194_s9 = smov 0   ;;  %s4196_s10 = smov 0  }
   0x2   :  { %s4198_s11 = smov 0   ;;  %s4200_s12 = smov 0  }
   0x3 LB: > { %s4215_s13 = sadd.s32 4294967295, %s4176_s12   ;;  %s3893_s14 = sadd.s32 4294967294, %s4176_s12   ;;  %s4176_s12 = sphi %s4200_s12, %s5927_s12   ;;  %s4172_s11 = sphi %s4198_s11, %s5926_s11   ;;  %s4168_s10 = sphi %s4196_s10, %s5925_s10   ;;  %s4164_s9 = sphi %s4194_s9, %s5924_s9  }
   0x4   : > { %s4219_s15 = sadd.s32 1, %s4176_s12   ;;  %s69_s16 = sadd.s32 1, %s4172_s11 }
   0x5   : > { %s66_s17 = ssub.s32 %s4176_s12, %s4219_s15  ;;  %p79_p0 = scmp.ne.s32.totalorder %s4172_s11, %s4168_s10 }
   0x6   : > { %p67_p1 = scmp.eq.s32.totalorder %s66_s17, 0  ;;  %p80_p2 = scmp.eq.s32.totalorder %s4215_s13, 1 }
   0x7   : > { %p85_p3 = scmp.ne.s32.totalorder %s4168_s10, %s4164_s9  ;;  %p86_p4 = scmp.eq.s32.totalorder %s3893_s14, 1 }
   0x8   : > { %s4230_s18 = scalar_select %p67_p1, %s4172_s11, %s69_s16  }
   0x9   : > { %p4232_p5 = por %p80_p2, %p79_p0  ;;  %p4236_p6 = por %p86_p4, %p85_p3 }
   0xa   : > { %p3896_p7 = scmp.ge.s32.totalorder %s4176_s12, 1  ;;  %p115_p8 = scmp.lt.s32.totalorder %s4176_s12, 3 }
   0xc   : > { %p116_p9 = pnand %p3896_p7, %p115_p8 }
   0xe   : > { %119 = sbr.rel (%p116_p9) target bundleno = 863 (0x35f), region = 28 }
  0x13   : > { %v3898_v0 = vld [vmem:[%s5861_s1 + $0x2] sm:$0x3]  ;;  %vm308_vm0 = vcmask 1041408   ;;  %p136_p10 = scmp.lt.s32.totalorder %s4215_s13, 1  ;;  %v3935_v2 = vld [vmem:[%s5861_s1 + $0x4] sm:$0x3]  ;;  %s3834_s28 = scalar_lea.hbm %s5862_s2, %s4215_s13 }
  0x14   : > { %v310_v1 = vsel %vm308_vm0, %v3898_v0, 0  ;;  %v196_v3 = vld [vmem:[%s5861_s1] sm:$0x3]  ;;  %v678_v4 = vsel %vm308_vm0, %v3935_v2, 0  ;;  %v3973_v6 = vld [vmem:[%s5861_s1 + $0x8] sm:$0x3] }
  0x15   : > { %4070 = vmatpush.bf16.msra.mxu1 %v310_v1  ;;  %4071 = vmatpush.bf16.msra.mxu2 %v310_v1  ;;  %s137_s27 = scalar_select %p136_p10, %s4215_s13, 1  ;;  %v466_v5 = vsel %vm308_vm0, %v196_v3, 0  ;;  %v1174_v7 = vsel %vm308_vm0, %v3973_v6, 0  ;;  %vm253_vm1 = vcmask 31744   ;;  %v3954_v20 = vld [vmem:[%s5861_s1 + $0x6] sm:$0x3] }
  0x16   : > { %319 = vmatpush.bf16.msra.mxu0 %v310_v1  ;;  %4072 = vmatpush.bf16.msra.mxu3 %v310_v1  ;;  %v926_v21 = vsel %vm308_vm0, %v3954_v20, 0  ;;  %v4011_v58 = vld [vmem:[%s5861_s1 + $0xc] sm:$0x3]  ;;  %v4030_v59 = vld [vmem:[%s5861_s1 + $0xe] sm:$0x3]  ;;  %s134_s25 = sand.u32 1, %s4168_s10  }
  0x17   : > { %s4073_s30 = smul.u32 328, %s137_s27  ;;  %v3992_v60 = vld [vmem:[%s5861_s1 + $0xa] sm:$0x3]  ;;  %v1670_v61 = vsel %vm308_vm0, %v4011_v58, 0  ;;  %v1918_v62 = vsel %vm308_vm0, %v4030_v59, 0  ;;  %s135_s29 = scalar_lea.vmem [#allocation2], %s134_s25 }
  0x18   : > { %v1422_v63 = vsel %vm308_vm0, %v3992_v60, 0  ;;  %v4049_v0 = vld [vmem:[%s5861_s1 + $0x10] sm:$0x3]  ;;  %s3838_s3 = sshll.u32 %s3834_s28, 4  ;;  %s3826_s4 = scalar_lea.sflag [#allocation3], %s134_s25  ;;  %s3839_s3 = int_to_ptr.hbm [resolvable:$true] %s3838_s3 }
  0x19   : > { %687 = vmatpush.bf16.msrb.mxu2 %v678_v4  ;;  %475 = vmatpush.bf16.msrb.mxu1 %v466_v5  ;;  %s4263_s5 = scalar_lea.vmem %s5860_s0, %s4073_s30  ;;  %v2166_v1 = vsel %vm308_vm0, %v4049_v0, 0  ;;  %s3836_s30 = sshll.u32 %s135_s29, 4  ;;  %s3837_s30 = int_to_ptr.vmem [resolvable:$true] %s3836_s30 }
  0x1a   : > { %1183 = vmatpush.bf16.msrb.mxu0 %v1174_v7  ;;  %v207_v8 = vld [vmem:[%s4263_s5 + $0x51] sm:$0xff]  ;;  %v208_v9 = vld [vmem:[%s4263_s5 + $0x59] sm:$0xff]  ;;  %v217_v10 = vld [vmem:[%s4263_s5 + $0xa1] sm:$0xff]  ;;  %935 = vmatpush.bf16.msrb.mxu3 %v926_v21  ;;  %s4134_s13 = scalar_lea.hbm %s5862_s2, 2 }
  0x1b   : > { %v238_v11 = vpack.c.bf16 %v208_v9, %v207_v8  ;;  %v218_v12 = vld [vmem:[%s4263_s5 + $0xa9] sm:$0xff]  ;;  %v197_v13 = vld [vmem:[%s4263_s5 + $0x1] sm:$0xff]  ;;  %v227_v17 = vld [vmem:[%s4263_s5 + $0xf1] sm:$0xff] }
  0x1c   : > { %v198_v14 = vld [vmem:[%s4263_s5 + $0x9] sm:$0xff]  ;;  %v243_v15 = vpack.c.bf16 %v218_v12, %v217_v10  ;;  %v228_v18 = vld [vmem:[%s4263_s5 + $0xf9] sm:$0xff]  ;;  %v209_v22 = vld [vmem:[%s4263_s5 + $0x61] sm:$0xff] }
  0x1d   : > { %v233_v16 = vpack.c.bf16 %v198_v14, %v197_v13  ;;  %3904 = vmatmul.msk.bf16.vlgmr.msra.gmra.mxu1 %vm253_vm1, %v238_v11  ;;  %v248_v19 = vpack.c.bf16 %v228_v18, %v227_v17  ;;  %v210_v23 = vld [vmem:[%s4263_s5 + $0x69] sm:$0xff]  ;;  %v219_v24 = vld [vmem:[%s4263_s5 + $0xb1] sm:$0xff]  ;;  %v220_v25 = vld [vmem:[%s4263_s5 + $0xb9] sm:$0xff] }
  0x1e   : > { %3909 = vmatmul.msk.bf16.vlgmr.msra.gmra.mxu2 %vm253_vm1, %v243_v15  ;;  %v199_v26 = vld [vmem:[%s4263_s5 + $0x11] sm:$0xff]  ;;  %v200_v27 = vld [vmem:[%s4263_s5 + $0x19] sm:$0xff]  ;;  %v239_v28 = vpack.c.bf16 %v210_v23, %v209_v22  ;;  %v244_v29 = vpack.c.bf16 %v220_v25, %v219_v24  ;;  %v229_v31 = vld [vmem:[%s4263_s5 + $0x101] sm:$0xff]  ;;  %1431 = vmatpush.bf16.msra.mxu1 %v1422_v63 }
  0x1f   : > { %3899 = vmatmul.msk.bf16.vlgmr.msra.gmra.mxu0 %vm253_vm1, %v233_v16  ;;  %3914 = vmatmul.msk.bf16.vlgmr.msra.gmra.mxu3 %vm253_vm1, %v248_v19  ;;  %v234_v30 = vpack.c.bf16 %v200_v27, %v199_v26  ;;  %v230_v32 = vld [vmem:[%s4263_s5 + $0x109] sm:$0xff]  ;;  %v211_v34 = vld [vmem:[%s4263_s5 + $0x71] sm:$0xff]  ;;  %v212_v35 = vld [vmem:[%s4263_s5 + $0x79] sm:$0xff] }
  0x20   : > { %v249_v33 = vpack.c.bf16 %v230_v32, %v229_v31  ;;  %v221_v36 = vld [vmem:[%s4263_s5 + $0xc1] sm:$0xff]  ;;  %v222_v37 = vld [vmem:[%s4263_s5 + $0xc9] sm:$0xff]  ;;  %v240_v40 = vpack.c.bf16 %v212_v35, %v211_v34  ;;  %v231_v43 = vld [vmem:[%s4263_s5 + $0x111] sm:$0xff]  ;;  %1679 = vmatpush.bf16.msra.mxu2 %v1670_v61  ;;  %1927 = vmatpush.bf16.msra.mxu3 %v1918_v62 }
  0x21   : > { %v201_v38 = vld [vmem:[%s4263_s5 + $0x21] sm:$0xff]  ;;  %v202_v39 = vld [vmem:[%s4263_s5 + $0x29] sm:$0xff]  ;;  %v245_v41 = vpack.c.bf16 %v222_v37, %v221_v36  ;;  %v232_v44 = vld [vmem:[%s4263_s5 + $0x119] sm:$0x3f]  ;;  %2175 = vmatpush.bf16.msra.mxu0 %v2166_v1 }
  0x22   : > { %v235_v42 = vpack.c.bf16 %v202_v39, %v201_v38  ;;  %v250_v45 = vpack.c.bf16 %v232_v44, %v231_v43  ;;  %v213_v46 = vld [vmem:[%s4263_s5 + $0x81] sm:$0xff]  ;;  %v214_v47 = vld [vmem:[%s4263_s5 + $0x89] sm:$0xff]  ;;  %v223_v48 = vld [vmem:[%s4263_s5 + $0xd1] sm:$0xff] }
  0x23   : > { %v224_v49 = vld [vmem:[%s4263_s5 + $0xd9] sm:$0xff]  ;;  %v203_v50 = vld [vmem:[%s4263_s5 + $0x31] sm:$0xff]  ;;  %v241_v52 = vpack.c.bf16 %v214_v47, %v213_v46  ;;  %v225_v4 = vld [vmem:[%s4263_s5 + $0xe1] sm:$0xff] }
  0x24   : > { %v204_v51 = vld [vmem:[%s4263_s5 + $0x39] sm:$0xff]  ;;  %v246_v53 = vpack.c.bf16 %v224_v49, %v223_v48  ;;  %v215_v2 = vld [vmem:[%s4263_s5 + $0x91] sm:$0xff]  ;;  %v226_v5 = vld [vmem:[%s4263_s5 + $0xe9] sm:$0xff] }
  0x25   : > { %v236_v54 = vpack.c.bf16 %v204_v51, %v203_v50  ;;  %v815_v55 = vld [vmem:[%s4263_s5 + $0x12] sm:$0xff]  ;;  %v816_v56 = vld [vmem:[%s4263_s5 + $0x1a] sm:$0xff]  ;;  %v206_v7 = vld [vmem:[%s4263_s5 + $0x49] sm:$0xff]  ;;  %v247_v9 = vpack.c.bf16 %v226_v5, %v225_v4 }
  0x26   : > { %v851_v57 = vpack.c.bf16 %v816_v56, %v815_v55  ;;  %v216_v3 = vld [vmem:[%s4263_s5 + $0x99] sm:$0xff]  ;;  %v205_v6 = vld [vmem:[%s4263_s5 + $0x41] sm:$0xff]  ;;  %v818_v12 = vld [vmem:[%s4263_s5 + $0x2a] sm:$0xff] }
  0x27   : > { %v242_v8 = vpack.c.bf16 %v216_v3, %v215_v2  ;;  %v237_v10 = vpack.c.bf16 %v206_v7, %v205_v6  ;;  %v817_v11 = vld [vmem:[%s4263_s5 + $0x22] sm:$0xff]  ;;  %v568_v17 = vld [vmem:[%s4263_s5 + $0xa] sm:$0xff]  ;;  %v1063_v18 = vld [vmem:[%s4263_s5 + $0x13] sm:$0xff] }
  0x28   : > { %v852_v13 = vpack.c.bf16 %v818_v12, %v817_v11  ;;  %v142_v14 = vld [vmem:[%s4263_s5] sm:$0xff]  ;;  %v143_v15 = vld [vmem:[%s4263_s5 + $0x8] sm:$0xff]  ;;  %v819_v23 = vld [vmem:[%s4263_s5 + $0x32] sm:$0xff] }
  0x29   : > { %v567_v16 = vld [vmem:[%s4263_s5 + $0x2] sm:$0xff]  ;;  %v178_v20 = vpack.c.bf16 %v143_v15, %v142_v14  ;;  %v820_v24 = vld [vmem:[%s4263_s5 + $0x3a] sm:$0xff]  ;;  %v144_v26 = vld [vmem:[%s4263_s5 + $0x10] sm:$0xff] }
  0x2a   : > { %v1064_v19 = vld [vmem:[%s4263_s5 + $0x1b] sm:$0xff]  ;;  %v603_v21 = vpack.c.bf16 %v568_v17, %v567_v16  ;;  %v853_v25 = vpack.c.bf16 %v820_v24, %v819_v23  ;;  %v147_v36 = vld [vmem:[%s4263_s5 + $0x28] sm:$0xff]  ;;  %v1067_v37 = vld [vmem:[%s4263_s5 + $0x33] sm:$0xff] }
  0x2b   : > { %v1099_v22 = vpack.c.bf16 %v1064_v19, %v1063_v18  ;;  %v145_v27 = vld [vmem:[%s4263_s5 + $0x18] sm:$0xff]  ;;  %v821_v32 = vld [vmem:[%s4263_s5 + $0x42] sm:$0xff]  ;;  %v148_v44 = vld [vmem:[%s4263_s5 + $0x30] sm:$0xff] }
  0x2c   : > { %v146_v35 = vld [vmem:[%s4263_s5 + $0x20] sm:$0xff]  ;;  %v1070_v47 = vld [vmem:[%s4263_s5 + $0x4b] sm:$0xff]  ;;  %v1071_v61 = vld [vmem:[%s4263_s5 + $0x53] sm:$0xff] }
  0x2d   : > { %3905 = vmatmul.msk.bf16.gmra.mxu1 %vm253_vm1, %v239_v28  ;;  %v1065_v28 = vld [vmem:[%s4263_s5 + $0x23] sm:$0xff]  ;;  %v1068_v38 = vld [vmem:[%s4263_s5 + $0x3b] sm:$0xff]  ;;  %v180_v39 = vpack.c.bf16 %v147_v36, %v146_v35  ;;  %v827_v3 = vld [vmem:[%s4263_s5 + $0x72] sm:$0xff] }
  0x2e   : > { %3910 = vmatmul.msk.bf16.gmra.mxu2 %vm253_vm1, %v244_v29  ;;  %v1066_v29 = vld [vmem:[%s4263_s5 + $0x2b] sm:$0xff]  ;;  %v1069_v46 = vld [vmem:[%s4263_s5 + $0x43] sm:$0xff]  ;;  %v1072_v62 = vld [vmem:[%s4263_s5 + $0x5b] sm:$0xff] }
  0x2f   : > { %3900 = vmatmul.msk.bf16.gmra.mxu0 %vm253_vm1, %v234_v30  ;;  %3915 = vmatmul.msk.bf16.gmra.mxu3 %vm253_vm1, %v249_v33  ;;  %v179_v30 = vpack.c.bf16 %v145_v27, %v144_v26  ;;  %v1100_v31 = vpack.c.bf16 %v1066_v29, %v1065_v28  ;;  %v822_v33 = vld [vmem:[%s4263_s5 + $0x4a] sm:$0xff]  ;;  %v1102_v50 = vpack.c.bf16 %v1070_v47, %v1069_v46  ;;  %v825_v51 = vld [vmem:[%s4263_s5 + $0x62] sm:$0xff]  ;;  %v828_v4 = vld [vmem:[%s4263_s5 + $0x7a] sm:$0xff] }
  0x30   : > { %v854_v34 = vpack.c.bf16 %v822_v33, %v821_v32  ;;  %v150_v59 = vld [vmem:[%s4263_s5 + $0x40] sm:$0xff]  ;;  %v151_v60 = vld [vmem:[%s4263_s5 + $0x48] sm:$0xff]  ;;  %v1103_v2 = vpack.c.bf16 %v1072_v62, %v1071_v61  ;;  %v4417_v7 = vpack.c.bf16 %v828_v4, %v827_v3  ;;  %v152_v12 = vld [vmem:[%s4263_s5 + $0x50] sm:$0xff] }
  0x31   : > { %v182_v0 = vpack.c.bf16 %v151_v60, %v150_v59  ;;  %v1073_v14 = vld [vmem:[%s4263_s5 + $0x63] sm:$0xff]  ;;  %v1074_v15 = vld [vmem:[%s4263_s5 + $0x6b] sm:$0xff]  ;;  %v1076_v32 = vld [vmem:[%s4263_s5 + $0x7b] sm:$0xff] }
  0x32   : > { %v1104_v19 = vpack.c.bf16 %v1074_v15, %v1073_v14  ;;  %v154_v29 = vld [vmem:[%s4263_s5 + $0x60] sm:$0xff]  ;;  %v156_v46 = vld [vmem:[%s4263_s5 + $0x70] sm:$0xff]  ;;  %v157_v47 = vld [vmem:[%s4263_s5 + $0x78] sm:$0xff] }
  0x33   : > { %v833_v60 = vld [vmem:[%s4263_s5 + $0xa2] sm:$0xff]  ;;  %v834_v61 = vld [vmem:[%s4263_s5 + $0xaa] sm:$0xff] }
  0x34   : > { %v158_v14 = vld [vmem:[%s4263_s5 + $0x80] sm:$0xff]  ;;  %v159_v15 = vld [vmem:[%s4263_s5 + $0x88] sm:$0xff] }
  0x3d   : > { %3906 = vmatmul.msk.bf16.gmra.mxu1 %vm253_vm1, %v240_v40  ;;  %v1101_v40 = vpack.c.bf16 %v1068_v38, %v1067_v37  ;;  %v831_v37 = vld [vmem:[%s4263_s5 + $0x92] sm:$0xff]  ;;  %v832_v38 = vld [vmem:[%s4263_s5 + $0x9a] sm:$0xff] }
  0x3e   : > { %3911 = vmatmul.msk.bf16.gmra.mxu2 %vm253_vm1, %v245_v41  ;;  %v823_v41 = vld [vmem:[%s4263_s5 + $0x52] sm:$0xff] }
  0x3f   : > { %3901 = vmatmul.msk.bf16.gmra.mxu0 %vm253_vm1, %v235_v42  ;;  %3916 = vmatmul.msk.bf16.gmra.mxu3 %vm253_vm1, %v250_v45  ;;  %v824_v42 = vld [vmem:[%s4263_s5 + $0x5a] sm:$0xff] }
  0x40   : > { %v855_v43 = vpack.c.bf16 %v824_v42, %v823_v41  ;;  %v149_v45 = vld [vmem:[%s4263_s5 + $0x38] sm:$0xff]  ;;  %v4475_v41 = vpack.c.bf16 %v832_v38, %v831_v37 }
  0x41   : > { %v181_v48 = vpack.c.bf16 %v149_v45, %v148_v44 }
  0x4d   : > { %3907 = vmatmul.msk.bf16.gmra.mxu1 %vm253_vm1, %v241_v52  ;;  %v826_v52 = vld [vmem:[%s4263_s5 + $0x6a] sm:$0xff] }
  0x4e   : > { %3912 = vmatmul.msk.bf16.gmra.mxu2 %vm253_vm1, %v246_v53 }
  0x4f   : > { %3902 = vmatmul.msk.bf16.gmra.mxu0 %vm253_vm1, %v236_v54  ;;  %3955 = vmatmul.msk.bf16.vlgmr.msrb.gmra.mxu3 %vm253_vm1, %v851_v57  ;;  %v4388_v54 = vpack.c.bf16 %v826_v52, %v825_v51  ;;  %v185_v52 = vpack.c.bf16 %v157_v47, %v156_v46 }
  0x5d   : > { %3908 = vmatmul.msk.bf16.gmra.mxu1 %vm253_vm1, %v242_v8 }
  0x5e   : > { %3913 = vmatmul.msk.bf16.gmra.mxu2 %vm253_vm1, %v247_v9 }
  0x5f   : > { %3903 = vmatmul.msk.bf16.gmra.mxu0 %vm253_vm1, %v237_v10  ;;  %3956 = vmatmul.msk.bf16.gmra.mxu3 %vm253_vm1, %v852_v13 }
  0x6d   : > { %3917 = vmatmul.msk.bf16.vlgmr.msrb.gmra.mxu1 %vm253_vm1, %v178_v20  ;;  %v829_v20 = vld [vmem:[%s4263_s5 + $0x82] sm:$0xff] }
  0x6e   : > { %3936 = vmatmul.msk.bf16.vlgmr.msrb.gmra.mxu2 %vm253_vm1, %v603_v21  ;;  %v830_v21 = vld [vmem:[%s4263_s5 + $0x8a] sm:$0xff] }
  0x6f   : > { %3974 = vmatmul.msk.bf16.vlgmr.msrb.gmra.mxu0 %vm253_vm1, %v1099_v22  ;;  %3957 = vmatmul.msk.bf16.gmra.mxu3 %vm253_vm1, %v853_v25  ;;  %v4446_v24 = vpack.c.bf16 %v830_v21, %v829_v20 }
  0x7d   : > { %3918 = vmatmul.msk.bf16.gmra.mxu1 %vm253_vm1, %v179_v30  ;;  %v155_v30 = vld [vmem:[%s4263_s5 + $0x68] sm:$0xff] }
  0x7e   : > { %3937 = vmatmul.msk.bf16.gmra.mxu2 %vm253_vm1, %v851_v57 }
  0x7f   : > { %3975 = vmatmul.msk.bf16.gmra.mxu0 %vm253_vm1, %v1100_v31  ;;  %3958 = vmatmul.msk.bf16.gmra.mxu3 %vm253_vm1, %v854_v34  ;;  %v1075_v31 = vld [vmem:[%s4263_s5 + $0x73] sm:$0xff] }
  0x80   : > { %v1105_v36 = vpack.c.bf16 %v1076_v32, %v1075_v31  ;;  %v836_v31 = vld [vmem:[%s4263_s5 + $0xba] sm:$0xff] }
  0x8d   : > { %3919 = vmatmul.msk.bf16.gmra.mxu1 %vm253_vm1, %v180_v39 }
  0x8e   : > { %3938 = vmatmul.msk.bf16.gmra.mxu2 %vm253_vm1, %v852_v13  ;;  %v153_v13 = vld [vmem:[%s4263_s5 + $0x58] sm:$0xff] }
  0x8f   : > { %3976 = vmatmul.msk.bf16.gmra.mxu0 %vm253_vm1, %v1101_v40  ;;  %3959 = vmatmul.msk.bf16.gmra.mxu3 %vm253_vm1, %v855_v43  ;;  %v183_v17 = vpack.c.bf16 %v153_v13, %v152_v12 }
  0x9a   : > { %v4381_v49 = vpop.f32.mrf.mxu1 }
  0x9c   : > { %v4385_v53 = vpop.f32.mrf.mxu0 }
  0x9d   : > { %3920 = vmatmul.msk.bf16.gmra.mxu1 %vm253_vm1, %v181_v48  ;;  %v1077_v48 = vld [vmem:[%s4263_s5 + $0x83] sm:$0xff] }
  0x9e   : > { %3939 = vmatmul.msk.bf16.gmra.mxu2 %vm253_vm1, %v853_v25 }
  0x9f   : > { %3977 = vmatmul.msk.bf16.gmra.mxu0 %vm253_vm1, %v1102_v50  ;;  %3960 = vmatmul.msk.bf16.gmra.mxu3 %vm253_vm1, %v4388_v54  ;;  %v1078_v50 = vld [vmem:[%s4263_s5 + $0x8b] sm:$0xff] }
  0xa0   : > { %v1106_v59 = vpack.c.bf16 %v1078_v50, %v1077_v48 }
  0xa1   : > { %v4392_v55 = vpop.f32.mrf.mxu2 }
  0xa2   : > { %v4396_v56 = vpop.f32.mrf.mxu1  ;;  %v4400_v58 = vpop.f32.mrf.mxu3 }
  0xa4   : > { %v4398_v57 = vpop.f32.mrf.mxu0 }
  0xa9   : > { %v4406_v63 = vpop.f32.mrf.mxu2 }
  0xaa   : > { %v4408_v1 = vpop.f32.mrf.mxu1  ;;  %v4414_v6 = vpop.f32.mrf.mxu3 }
  0xac   : > { %v4412_v5 = vpop.f32.mrf.mxu0 }
  0xad   : > { %3921 = vmatmul.msk.bf16.gmra.mxu1 %vm253_vm1, %v182_v0 }
  0xae   : > { %3940 = vmatmul.msk.bf16.gmra.mxu2 %vm253_vm1, %v854_v34  ;;  %v184_v34 = vpack.c.bf16 %v155_v30, %v154_v29  ;;  %v835_v30 = vld [vmem:[%s4263_s5 + $0xb2] sm:$0xff] }
  0xaf   : > { %3978 = vmatmul.msk.bf16.gmra.mxu0 %vm253_vm1, %v1103_v2  ;;  %3961 = vmatmul.msk.bf16.gmra.mxu3 %vm253_vm1, %v4417_v7  ;;  %v4501_v2 = vpack.c.bf16 %v834_v61, %v833_v60  ;;  %v161_v60 = vld [vmem:[%s4263_s5 + $0x98] sm:$0xff] }
  0xb1   : > { %v4421_v8 = vpop.f32.mrf.mxu2 }
  0xb2   : > { %v4425_v9 = vpop.f32.mrf.mxu1  ;;  %v4429_v11 = vpop.f32.mrf.mxu3 }
  0xb4   : > { %v4427_v10 = vpop.f32.mrf.mxu0 }
  0xb9   : > { %v4435_v16 = vpop.f32.mrf.mxu2 }
  0xba   : > { %v4437_v18 = vpop.f32.mrf.mxu1  ;;  %v4443_v23 = vpop.f32.mrf.mxu3 }
  0xbc   : > { %v4441_v22 = vpop.f32.mrf.mxu0 }
  0xbd   : > { %3922 = vmatmul.msk.bf16.gmra.mxu1 %vm253_vm1, %v183_v17  ;;  %v1079_v17 = vld [vmem:[%s4263_s5 + $0x93] sm:$0xff] }
  0xbe   : > { %3941 = vmatmul.msk.bf16.gmra.mxu2 %vm253_vm1, %v855_v43 }
  0xbf   : > { %3979 = vmatmul.msk.bf16.gmra.mxu0 %vm253_vm1, %v1104_v19  ;;  %3962 = vmatmul.msk.bf16.gmra.mxu3 %vm253_vm1, %v4446_v24  ;;  %v1080_v19 = vld [vmem:[%s4263_s5 + $0x9b] sm:$0xff] }
  0xc0   : > { %v1107_v29 = vpack.c.bf16 %v1080_v19, %v1079_v17 }
  0xc1   : > { %v4450_v25 = vpop.f32.mrf.mxu2 }
  0xc2   : > { %v4454_v26 = vpop.f32.mrf.mxu1  ;;  %v4458_v28 = vpop.f32.mrf.mxu3 }
  0xc4   : > { %v4456_v27 = vpop.f32.mrf.mxu0 }
  0xc9   : > { %v4464_v33 = vpop.f32.mrf.mxu2 }
  0xca   : > { %v4466_v35 = vpop.f32.mrf.mxu1  ;;  %v4472_v40 = vpop.f32.mrf.mxu3 }
  0xcc   : > { %v4470_v39 = vpop.f32.mrf.mxu0 }
  0xcd   : > { %3923 = vmatmul.msk.bf16.gmra.mxu1 %vm253_vm1, %v184_v34 }
  0xce   : > { %3942 = vmatmul.msk.bf16.gmra.mxu2 %vm253_vm1, %v4388_v54 }
  0xcf   : > { %3980 = vmatmul.msk.bf16.gmra.mxu0 %vm253_vm1, %v1105_v36  ;;  %3963 = vmatmul.msk.bf16.gmra.mxu3 %vm253_vm1, %v4475_v41  ;;  %v4523_v36 = vpack.c.bf16 %v836_v31, %v835_v30  ;;  %v838_v30 = vld [vmem:[%s4263_s5 + $0xca] sm:$0xff] }
  0xd1   : > { %v4480_v42 = vpop.f32.mrf.mxu2 }
  0xd2   : > { %v4484_v43 = vpop.f32.mrf.mxu1  ;;  %v937_v45 = vpop.f32.mrf.mxu3 }
  0xd4   : > { %v4486_v44 = vpop.f32.mrf.mxu0 }
  0xd9   : > { %v4492_v51 = vpop.f32.mrf.mxu2 }
  0xda   : > { %v4494_v54 = vpop.f32.mrf.mxu1  ;;  %v939_v0 = vpop.f32.mrf.mxu3 }
  0xdc   : > { %v4498_v62 = vpop.f32.mrf.mxu0 }
  0xdd   : > { %3924 = vmatmul.msk.bf16.gmra.mxu1 %vm253_vm1, %v185_v52 }
  0xde   : > { %3943 = vmatmul.msk.bf16.gmra.mxu2 %vm253_vm1, %v4417_v7  ;;  %v186_v7 = vpack.c.bf16 %v159_v15, %v158_v14  ;;  %v1082_v14 = vld [vmem:[%s4263_s5 + $0xab] sm:$0xff] }
  0xdf   : > { %3981 = vmatmul.msk.bf16.gmra.mxu0 %vm253_vm1, %v1106_v59  ;;  %3964 = vmatmul.msk.bf16.gmra.mxu3 %vm253_vm1, %v4501_v2  ;;  %v160_v59 = vld [vmem:[%s4263_s5 + $0x90] sm:$0xff] }
  0xe0   : > { %v187_v17 = vpack.c.bf16 %v161_v60, %v160_v59 }
  0xe1   : > { %v4506_v3 = vpop.f32.mrf.mxu2 }
  0xe2   : > { %v4510_v4 = vpop.f32.mrf.mxu1  ;;  %v942_v13 = vpop.f32.mrf.mxu3 }
  0xe4   : > { %v4512_v12 = vpop.f32.mrf.mxu0 }
  0xe9   : > { %v4518_v20 = vpop.f32.mrf.mxu2 }
  0xea   : > { %v477_v21 = vpop.f32.mrf.mxu1  ;;  %v944_v34 = vpop.f32.mrf.mxu3 }
  0xeb   : > { %v478_v37 = vadd.f32 %v477_v21, %v4385_v53 }
  0xec   : > { %v1185_v32 = vpop.f32.mrf.mxu0 }
  0xed   : > { %3925 = vmatmul.msk.bf16.gmra.mxu1 %vm253_vm1, %v186_v7 }
  0xee   : > { %3944 = vmatmul.msk.bf16.gmra.mxu2 %vm253_vm1, %v4446_v24  ;;  %v1081_v24 = vld [vmem:[%s4263_s5 + $0xa3] sm:$0xff] }
  0xef   : > { %3982 = vmatmul.msk.bf16.gmra.mxu0 %vm253_vm1, %v1107_v29  ;;  %3965 = vmatmul.msk.bf16.gmra.mxu3 %vm253_vm1, %v4523_v36  ;;  %v1108_v21 = vpack.c.bf16 %v1082_v14, %v1081_v24  ;;  %v837_v29 = vld [vmem:[%s4263_s5 + $0xc2] sm:$0xff] }
  0xf0   : > { %v162_v24 = vld [vmem:[%s4263_s5 + $0xa0] sm:$0xff]  ;;  %v163_v14 = vld [vmem:[%s4263_s5 + $0xa8] sm:$0xff] }
  0xf1   : > { %v689_v38 = vpop.f32.mrf.mxu2 }
  0xf2   : > { %v779_v46 = vadd.f32 %v689_v38, %v478_v37  ;;  %v479_v47 = vpop.f32.mrf.mxu1  ;;  %v947_v52 = vpop.f32.mrf.mxu3 }
  0xf3   : > { %v480_v15 = vadd.f32 %v479_v47, %v4398_v57 }
  0xf4   : > { %v1187_v48 = vpop.f32.mrf.mxu0  ;;  %v1027_v50 = vadd.f32 %v937_v45, %v779_v46 }
  0xf6   : > { %v4533_v61 = vadd.f32 %v1185_v32, %v1027_v50  ;;  %v4541_v32 = vpack.c.bf16 %v838_v30, %v837_v29  ;;  %v839_v29 = vld [vmem:[%s4263_s5 + $0xd2] sm:$0xff]  ;;  %v840_v30 = vld [vmem:[%s4263_s5 + $0xda] sm:$0xff] }
  0xf9   : > { %v691_v53 = vpop.f32.mrf.mxu2 }
  0xfa   : > { %v780_v19 = vadd.f32 %v691_v53, %v480_v15  ;;  %v482_v7 = vpop.f32.mrf.mxu1  ;;  %v949_v45 = vpop.f32.mrf.mxu3  ;;  %v1083_v15 = vld [vmem:[%s4263_s5 + $0xb3] sm:$0xff] }
  0xfb   : > { %v483_v38 = vadd.f32 %v482_v7, %v4412_v5 }
  0xfc   : > { %v1190_v31 = vpop.f32.mrf.mxu0  ;;  %v1028_v37 = vadd.f32 %v939_v0, %v780_v19 }
  0xfd   : > { %3926 = vmatmul.msk.bf16.gmra.mxu1 %vm253_vm1, %v187_v17  ;;  %v188_v17 = vpack.c.bf16 %v163_v14, %v162_v24 }
  0xfe   : > { %3945 = vmatmul.msk.bf16.gmra.mxu2 %vm253_vm1, %v4475_v41  ;;  %v4546_v57 = vadd.f32 %v1187_v48, %v1028_v37  ;;  %v1084_v48 = vld [vmem:[%s4263_s5 + $0xbb] sm:$0xff] }
  0xff   : > { %3983 = vmatmul.msk.bf16.gmra.mxu0 %vm253_vm1, %v1108_v21  ;;  %3966 = vmatmul.msk.bf16.gmra.mxu3 %vm253_vm1, %v4541_v32  ;;  %v1109_v21 = vpack.c.bf16 %v1084_v48, %v1083_v15  ;;  %v164_v15 = vld [vmem:[%s4263_s5 + $0xb0] sm:$0xff]  ;;  %v165_v48 = vld [vmem:[%s4263_s5 + $0xb8] sm:$0xff] }
 0x101   : > { %v694_v46 = vpop.f32.mrf.mxu2 }
 0x102   : > { %v781_v0 = vadd.f32 %v694_v46, %v483_v38  ;;  %v484_v47 = vpop.f32.mrf.mxu1  ;;  %v952_v60 = vpop.f32.mrf.mxu3 }
 0x103   : > { %v485_v53 = vadd.f32 %v484_v47, %v4427_v10 }
 0x104   : > { %v1192_v50 = vpop.f32.mrf.mxu0  ;;  %v1029_v59 = vadd.f32 %v942_v13, %v781_v0 }
 0x106   : > { %v4553_v41 = vadd.f32 %v1190_v31, %v1029_v59  ;;  %v4561_v31 = vpack.c.bf16 %v840_v30, %v839_v29  ;;  %v841_v29 = vld [vmem:[%s4263_s5 + $0xe2] sm:$0xff]  ;;  %v842_v30 = vld [vmem:[%s4263_s5 + $0xea] sm:$0xff] }
 0x109   : > { %v696_v5 = vpop.f32.mrf.mxu2 }
 0x10a   : > { %v782_v19 = vadd.f32 %v696_v5, %v485_v53  ;;  %v487_v7 = vpop.f32.mrf.mxu1  ;;  %v954_v13 = vpop.f32.mrf.mxu3  ;;  %v1085_v53 = vld [vmem:[%s4263_s5 + $0xc3] sm:$0xff] }
 0x10b   : > { %v488_v46 = vadd.f32 %v487_v7, %v4441_v22 }
 0x10c   : > { %v1195_v37 = vpop.f32.mrf.mxu0  ;;  %v1030_v38 = vadd.f32 %v944_v34, %v782_v19 }
 0x10d   : > { %3927 = vmatmul.msk.bf16.gmra.mxu1 %vm253_vm1, %v188_v17  ;;  %v189_v17 = vpack.c.bf16 %v165_v48, %v164_v15 }
 0x10e   : > { %3946 = vmatmul.msk.bf16.gmra.mxu2 %vm253_vm1, %v4501_v2  ;;  %v4566_v10 = vadd.f32 %v1192_v50, %v1030_v38  ;;  %v1086_v50 = vld [vmem:[%s4263_s5 + $0xcb] sm:$0xff] }
 0x10f   : > { %3984 = vmatmul.msk.bf16.gmra.mxu0 %vm253_vm1, %v1109_v21  ;;  %3967 = vmatmul.msk.bf16.gmra.mxu3 %vm253_vm1, %v4561_v31  ;;  %v1110_v21 = vpack.c.bf16 %v1086_v50, %v1085_v53  ;;  %v166_v53 = vld [vmem:[%s4263_s5 + $0xc0] sm:$0xff]  ;;  %v167_v50 = vld [vmem:[%s4263_s5 + $0xc8] sm:$0xff] }
 0x111   : > { %v699_v0 = vpop.f32.mrf.mxu2 }
 0x112   : > { %v783_v34 = vadd.f32 %v699_v0, %v488_v46  ;;  %v489_v47 = vpop.f32.mrf.mxu1  ;;  %v957_v14 = vpop.f32.mrf.mxu3 }
 0x113   : > { %v490_v5 = vadd.f32 %v489_v47, %v4456_v27 }
 0x114   : > { %v1197_v59 = vpop.f32.mrf.mxu0  ;;  %v1031_v24 = vadd.f32 %v947_v52, %v783_v34 }
 0x116   : > { %v4573_v2 = vadd.f32 %v1195_v37, %v1031_v24  ;;  %v4581_v37 = vpack.c.bf16 %v842_v30, %v841_v29  ;;  %v843_v29 = vld [vmem:[%s4263_s5 + $0xf2] sm:$0xff]  ;;  %v844_v30 = vld [vmem:[%s4263_s5 + $0xfa] sm:$0xff] }
 0x119   : > { %v701_v22 = vpop.f32.mrf.mxu2 }
 0x11a   : > { %v784_v19 = vadd.f32 %v701_v22, %v490_v5  ;;  %v492_v7 = vpop.f32.mrf.mxu1  ;;  %v959_v52 = vpop.f32.mrf.mxu3  ;;  %v1087_v5 = vld [vmem:[%s4263_s5 + $0xd3] sm:$0xff] }
 0x11b   : > { %v493_v0 = vadd.f32 %v492_v7, %v4470_v39 }
 0x11c   : > { %v1200_v38 = vpop.f32.mrf.mxu0  ;;  %v1032_v46 = vadd.f32 %v949_v45, %v784_v19 }
 0x11d   : > { %3928 = vmatmul.msk.bf16.gmra.mxu1 %vm253_vm1, %v189_v17  ;;  %v190_v17 = vpack.c.bf16 %v167_v50, %v166_v53 }
 0x11e   : > { %3947 = vmatmul.msk.bf16.gmra.mxu2 %vm253_vm1, %v4523_v36  ;;  %v4586_v27 = vadd.f32 %v1197_v59, %v1032_v46  ;;  %v1088_v59 = vld [vmem:[%s4263_s5 + $0xdb] sm:$0xff] }
 0x11f   : > { %3985 = vmatmul.msk.bf16.gmra.mxu0 %vm253_vm1, %v1110_v21  ;;  %3968 = vmatmul.msk.bf16.gmra.mxu3 %vm253_vm1, %v4581_v37  ;;  %v1111_v21 = vpack.c.bf16 %v1088_v59, %v1087_v5  ;;  %v168_v5 = vld [vmem:[%s4263_s5 + $0xd0] sm:$0xff]  ;;  %v169_v59 = vld [vmem:[%s4263_s5 + $0xd8] sm:$0xff] }
 0x121   : > { %v704_v34 = vpop.f32.mrf.mxu2 }
 0x122   : > { %v785_v45 = vadd.f32 %v704_v34, %v493_v0  ;;  %v494_v47 = vpop.f32.mrf.mxu1  ;;  %v962_v48 = vpop.f32.mrf.mxu3 }
 0x123   : > { %v495_v22 = vadd.f32 %v494_v47, %v4486_v44 }
 0x124   : > { %v1202_v24 = vpop.f32.mrf.mxu0  ;;  %v1033_v15 = vadd.f32 %v952_v60, %v785_v45 }
 0x126   : > { %v4593_v36 = vadd.f32 %v1200_v38, %v1033_v15  ;;  %v4601_v38 = vpack.c.bf16 %v844_v30, %v843_v29  ;;  %v845_v29 = vld [vmem:[%s4263_s5 + $0x102] sm:$0xff]  ;;  %v846_v30 = vld [vmem:[%s4263_s5 + $0x10a] sm:$0xff] }
 0x129   : > { %v706_v39 = vpop.f32.mrf.mxu2 }
 0x12a   : > { %v786_v19 = vadd.f32 %v706_v39, %v495_v22  ;;  %v497_v7 = vpop.f32.mrf.mxu1  ;;  %v964_v60 = vpop.f32.mrf.mxu3  ;;  %v1089_v22 = vld [vmem:[%s4263_s5 + $0xe3] sm:$0xff] }
 0x12b   : > { %v498_v34 = vadd.f32 %v497_v7, %v4498_v62 }
 0x12c   : > { %v1205_v46 = vpop.f32.mrf.mxu0  ;;  %v1034_v0 = vadd.f32 %v954_v13, %v786_v19 }
 0x12d   : > { %3929 = vmatmul.msk.bf16.gmra.mxu1 %vm253_vm1, %v190_v17  ;;  %v191_v17 = vpack.c.bf16 %v169_v59, %v168_v5 }
 0x12e   : > { %3948 = vmatmul.msk.bf16.gmra.mxu2 %vm253_vm1, %v4541_v32  ;;  %v4606_v44 = vadd.f32 %v1202_v24, %v1034_v0  ;;  %v1090_v24 = vld [vmem:[%s4263_s5 + $0xeb] sm:$0xff] }
 0x12f   : > { %3986 = vmatmul.msk.bf16.gmra.mxu0 %vm253_vm1, %v1111_v21  ;;  %3969 = vmatmul.msk.bf16.gmra.mxu3 %vm253_vm1, %v4601_v38  ;;  %v1112_v21 = vpack.c.bf16 %v1090_v24, %v1089_v22  ;;  %v170_v22 = vld [vmem:[%s4263_s5 + $0xe0] sm:$0xff]  ;;  %v171_v24 = vld [vmem:[%s4263_s5 + $0xe8] sm:$0xff] }
 0x131   : > { %v709_v45 = vpop.f32.mrf.mxu2 }
 0x132   : > { %v787_v13 = vadd.f32 %v709_v45, %v498_v34  ;;  %v499_v47 = vpop.f32.mrf.mxu1  ;;  %v967_v50 = vpop.f32.mrf.mxu3 }
 0x133   : > { %v500_v39 = vadd.f32 %v499_v47, %v4512_v12 }
 0x134   : > { %v1207_v15 = vpop.f32.mrf.mxu0  ;;  %v1035_v53 = vadd.f32 %v957_v14, %v787_v13 }
 0x136   : > { %v4613_v32 = vadd.f32 %v1205_v46, %v1035_v53  ;;  %v4621_v46 = vpack.c.bf16 %v846_v30, %v845_v29  ;;  %v4639_v29 = vld [vmem:[%s4263_s5 + $0x112] sm:$0xff]  ;;  %v848_v30 = vld [vmem:[%s4263_s5 + $0x11a] sm:$0xff] }
 0x139   : > { %v711_v62 = vpop.f32.mrf.mxu2 }
 0x13a   : > { %v788_v19 = vadd.f32 %v711_v62, %v500_v39  ;;  %v502_v7 = vpop.f32.mrf.mxu1  ;;  %v969_v14 = vpop.f32.mrf.mxu3  ;;  %v1091_v39 = vld [vmem:[%s4263_s5 + $0xf3] sm:$0xff] }
 0x13b   : > { %v503_v45 = vadd.f32 %v502_v7, %v4381_v49 }
 0x13c   : > { %v1210_v0 = vpop.f32.mrf.mxu0  ;;  %v1036_v34 = vadd.f32 %v959_v52, %v788_v19 }
 0x13d   : > { %3930 = vmatmul.msk.bf16.gmra.mxu1 %vm253_vm1, %v191_v17  ;;  %v192_v17 = vpack.c.bf16 %v171_v24, %v170_v22 }
 0x13e   : > { %3949 = vmatmul.msk.bf16.gmra.mxu2 %vm253_vm1, %v4561_v31  ;;  %v4626_v12 = vadd.f32 %v1207_v15, %v1036_v34  ;;  %v1092_v15 = vld [vmem:[%s4263_s5 + $0xfb] sm:$0xff] }
 0x13f   : > { %3987 = vmatmul.msk.bf16.gmra.mxu0 %vm253_vm1, %v1112_v21  ;;  %3970 = vmatmul.msk.bf16.gmra.mxu3 %vm253_vm1, %v4621_v46  ;;  %v1113_v21 = vpack.c.bf16 %v1092_v15, %v1091_v39  ;;  %v172_v39 = vld [vmem:[%s4263_s5 + $0xf0] sm:$0xff]  ;;  %v173_v15 = vld [vmem:[%s4263_s5 + $0xf8] sm:$0xff] }
 0x141   : > { %v714_v13 = vpop.f32.mrf.mxu2 }
 0x142   : > { %v789_v52 = vadd.f32 %v714_v13, %v503_v45  ;;  %v504_v47 = vpop.f32.mrf.mxu1  ;;  %v972_v59 = vpop.f32.mrf.mxu3 }
 0x143   : > { %v505_v62 = vadd.f32 %v504_v47, %v4396_v56 }
 0x144   : > { %v1212_v53 = vpop.f32.mrf.mxu0  ;;  %v1037_v5 = vadd.f32 %v962_v48, %v789_v52 }
 0x146   : > { %v4633_v31 = vadd.f32 %v1210_v0, %v1037_v5  ;;  %v867_v0 = vpack.c.bf16 %v848_v30, %v4639_v29  ;;  %v849_v30 = vld [vmem:[%s4263_s5 + $0x122] sm:$0xff] }
 0x149   : > { %v716_v49 = vpop.f32.mrf.mxu2 }
 0x14a   : > { %v790_v19 = vadd.f32 %v716_v49, %v505_v62  ;;  %v507_v7 = vpop.f32.mrf.mxu1  ;;  %v974_v45 = vpop.f32.mrf.mxu3  ;;  %v1094_v49 = vld [vmem:[%s4263_s5 + $0x10b] sm:$0xff] }
 0x14b   : > { %v508_v13 = vadd.f32 %v507_v7, %v4408_v1  ;;  %v193_v1 = vpack.c.bf16 %v173_v15, %v172_v39 }
 0x14c   : > { %v1215_v34 = vpop.f32.mrf.mxu0  ;;  %v1038_v48 = vadd.f32 %v964_v60, %v790_v19 }
 0x14d   : > { %3931 = vmatmul.msk.bf16.gmra.mxu1 %vm253_vm1, %v192_v17 }
 0x14e   : > { %3950 = vmatmul.msk.bf16.gmra.mxu2 %vm253_vm1, %v4581_v37  ;;  %v4647_v56 = vadd.f32 %v1212_v53, %v1038_v48  ;;  %v1093_v37 = vld [vmem:[%s4263_s5 + $0x103] sm:$0xff] }
 0x14f   : > { %3988 = vmatmul.msk.bf16.gmra.mxu0 %vm253_vm1, %v1113_v21  ;;  %3971 = vmatmul.msk.bf16.gmra.mxu3 %vm253_vm1, %v867_v0  ;;  %v1114_v21 = vpack.c.bf16 %v1094_v49, %v1093_v37  ;;  %v850_v48 = vld [vmem:[%s4263_s5 + $0x12a] sm:$0x3f]  ;;  %v174_v37 = vld [vmem:[%s4263_s5 + $0x100] sm:$0xff] }
 0x150   : > { %v175_v49 = vld [vmem:[%s4263_s5 + $0x108] sm:$0xff] }
 0x151   : > { %v719_v52 = vpop.f32.mrf.mxu2 }
 0x152   : > { %v791_v60 = vadd.f32 %v719_v52, %v508_v13  ;;  %v509_v47 = vpop.f32.mrf.mxu1  ;;  %v977_v24 = vpop.f32.mrf.mxu3 }
 0x153   : > { %v510_v53 = vadd.f32 %v509_v47, %v4425_v9 }
 0x154   : > { %v1217_v5 = vpop.f32.mrf.mxu0  ;;  %v1039_v22 = vadd.f32 %v967_v50, %v791_v60 }
 0x156   : > { %v4653_v62 = vadd.f32 %v1215_v34, %v1039_v22  ;;  %v868_v34 = vpack.c.bf16 %v850_v48, %v849_v30  ;;  %v1807_v30 = vld [vmem:[%s4263_s5 + $0x25] sm:$0xff]  ;;  %v1808_v48 = vld [vmem:[%s4263_s5 + $0x2d] sm:$0xff] }
 0x159   : > { %v721_v17 = vpop.f32.mrf.mxu2 }
 0x15a   : > { %v792_v19 = vadd.f32 %v721_v17, %v510_v53  ;;  %v512_v7 = vpop.f32.mrf.mxu1  ;;  %v979_v50 = vpop.f32.mrf.mxu3  ;;  %v1096_v17 = vld [vmem:[%s4263_s5 + $0x11b] sm:$0xff] }
 0x15b   : > { %v513_v52 = vadd.f32 %v512_v7, %v4437_v18  ;;  %v194_v18 = vpack.c.bf16 %v175_v49, %v174_v37  ;;  %v176_v49 = vld [vmem:[%s4263_s5 + $0x110] sm:$0xff] }
 0x15c   : > { %v1220_v0 = vpop.f32.mrf.mxu0  ;;  %v1040_v13 = vadd.f32 %v969_v14, %v792_v19 }
 0x15d   : > { %3932 = vmatmul.msk.bf16.gmra.mxu1 %vm253_vm1, %v193_v1 }
 0x15e   : > { %3951 = vmatmul.msk.bf16.gmra.mxu2 %vm253_vm1, %v4601_v38  ;;  %v4664_v9 = vadd.f32 %v1217_v5, %v1040_v13  ;;  %v1095_v38 = vld [vmem:[%s4263_s5 + $0x113] sm:$0xff] }
 0x15f   : > { %3989 = vmatmul.msk.bf16.gmra.mxu0 %vm253_vm1, %v1114_v21  ;;  %3972 = vmatmul.msk.bf16.gmra.mxu3 %vm253_vm1, %v868_v34  ;;  %v1115_v21 = vpack.c.bf16 %v1096_v17, %v1095_v38  ;;  %v177_v38 = vld [vmem:[%s4263_s5 + $0x118] sm:$0x3f] }
 0x160   : > { %v602_v17 = vld [vmem:[%s4263_s5 + $0x11a] sm:$0x3f] }
 0x161   : > { %v724_v60 = vpop.f32.mrf.mxu2 }
 0x162   : > { %v793_v14 = vadd.f32 %v724_v60, %v513_v52  ;;  %v514_v47 = vpop.f32.mrf.mxu1  ;;  %v982_v15 = vpop.f32.mrf.mxu3 }
 0x163   : > { %v515_v5 = vadd.f32 %v514_v47, %v4454_v26 }
 0x164   : > { %v1222_v22 = vpop.f32.mrf.mxu0  ;;  %v1041_v39 = vadd.f32 %v972_v59, %v793_v14 }
 0x166   : > { %v4670_v53 = vadd.f32 %v1220_v0, %v1041_v39  ;;  %v1843_v0 = vpack.c.bf16 %v1808_v48, %v1807_v30  ;;  %v1809_v48 = vld [vmem:[%s4263_s5 + $0x35] sm:$0xff] }
 0x169   : > { %v726_v1 = vpop.f32.mrf.mxu2 }
 0x16a   : > { %v794_v19 = vadd.f32 %v726_v1, %v515_v5  ;;  %v517_v7 = vpop.f32.mrf.mxu1  ;;  %v984_v59 = vpop.f32.mrf.mxu3  ;;  %v1097_v5 = vld [vmem:[%s4263_s5 + $0x123] sm:$0xff] }
 0x16b   : > { %v518_v52 = vadd.f32 %v517_v7, %v4466_v35 }
 0x16c   : > { %v1225_v13 = vpop.f32.mrf.mxu0  ;;  %v1042_v34 = vadd.f32 %v974_v45, %v794_v19 }
 0x16d   : > { %3933 = vmatmul.msk.bf16.gmra.mxu1 %vm253_vm1, %v194_v18  ;;  %v195_v18 = vpack.c.bf16 %v177_v38, %v176_v49  ;;  %v1311_v38 = vld [vmem:[%s4263_s5 + $0x14] sm:$0xff] }
 0x16e   : > { %3952 = vmatmul.msk.bf16.gmra.mxu2 %vm253_vm1, %v4621_v46  ;;  %v4681_v26 = vadd.f32 %v1222_v22, %v1042_v34  ;;  %v1098_v22 = vld [vmem:[%s4263_s5 + $0x12b] sm:$0x3f] }
 0x16f   : > { %3990 = vmatmul.msk.bf16.gmra.mxu0 %vm253_vm1, %v1115_v21  ;;  %4031 = vmatmul.msk.bf16.vlgmr.msra.gmra.mxu3 %vm253_vm1, %v1843_v0  ;;  %v620_v21 = vpack.c.bf16 %v602_v17, %v4639_v29  ;;  %v1116_v30 = vpack.c.bf16 %v1098_v22, %v1097_v5  ;;  %v1312_v17 = vld [vmem:[%s4263_s5 + $0x1c] sm:$0xff]  ;;  %v1559_v5 = vld [vmem:[%s4263_s5 + $0x24] sm:$0xff] }
 0x171   : > { %v729_v60 = vpop.f32.mrf.mxu2 }
 0x172   : > { %v795_v45 = vadd.f32 %v729_v60, %v518_v52  ;;  %v519_v14 = vpop.f32.mrf.mxu1  ;;  %v987_v37 = vpop.f32.mrf.mxu3 }
 0x173   : > { %v520_v1 = vadd.f32 %v519_v14, %v4484_v43 }
 0x174   : > { %v1227_v47 = vpop.f32.mrf.mxu0  ;;  %v1043_v39 = vadd.f32 %v977_v24, %v795_v45  ;;  %v1810_v24 = vld [vmem:[%s4263_s5 + $0x3d] sm:$0xff] }
 0x175   : > { %v1844_v52 = vpack.c.bf16 %v1810_v24, %v1809_v48  ;;  %v1812_v24 = vld [vmem:[%s4263_s5 + $0x4d] sm:$0xff] }
 0x176   : > { %v4687_v46 = vadd.f32 %v1225_v13, %v1043_v39 }
 0x179   : > { %v731_v35 = vpop.f32.mrf.mxu2 }
 0x17a   : > { %v796_v19 = vadd.f32 %v731_v35, %v520_v1  ;;  %v522_v7 = vpop.f32.mrf.mxu1  ;;  %v989_v13 = vpop.f32.mrf.mxu3  ;;  %v1560_v1 = vld [vmem:[%s4263_s5 + $0x2c] sm:$0xff] }
 0x17b   : > { %v523_v29 = vadd.f32 %v522_v7, %v4494_v54  ;;  %v2056_v35 = vld [vmem:[%s4263_s5 + $0x2e] sm:$0xff] }
 0x17c   : > { %v1230_v34 = vpop.f32.mrf.mxu0  ;;  %v1044_v0 = vadd.f32 %v979_v50, %v796_v19  ;;  %v1347_v19 = vpack.c.bf16 %v1312_v17, %v1311_v38 }
 0x17d   : > { %3934 = vmatmul.msk.bf16.gmra.mxu1 %vm253_vm1, %v195_v18 }
 0x17e   : > { %3953 = vmatmul.msk.bf16.gmra.mxu2 %vm253_vm1, %v620_v21  ;;  %v4699_v43 = vadd.f32 %v1227_v47, %v1044_v0  ;;  %v2055_v47 = vld [vmem:[%s4263_s5 + $0x26] sm:$0xff] }
 0x17f   : > { %3991 = vmatmul.msk.bf16.gmra.mxu0 %vm253_vm1, %v1116_v30  ;;  %4032 = vmatmul.msk.bf16.gmra.mxu3 %vm253_vm1, %v1844_v52  ;;  %v1595_v30 = vpack.c.bf16 %v1560_v1, %v1559_v5  ;;  %v2091_v48 = vpack.c.bf16 %v2056_v35, %v2055_v47  ;;  %v1561_v5 = vld [vmem:[%s4263_s5 + $0x34] sm:$0xff]  ;;  %v1562_v47 = vld [vmem:[%s4263_s5 + $0x3c] sm:$0xff] }
 0x180   : > { %v2057_v35 = vld [vmem:[%s4263_s5 + $0x36] sm:$0xff] }
 0x181   : > { %v734_v60 = vpop.f32.mrf.mxu2 }
 0x182   : > { %v797_v50 = vadd.f32 %v734_v60, %v523_v29  ;;  %v524_v45 = vpop.f32.mrf.mxu1  ;;  %v992_v49 = vpop.f32.mrf.mxu3 }
 0x183   : > { %v525_v54 = vadd.f32 %v524_v45, %v4510_v4 }
 0x184   : > { %v1232_v14 = vpop.f32.mrf.mxu0  ;;  %v1045_v39 = vadd.f32 %v982_v15, %v797_v50  ;;  %v1811_v15 = vld [vmem:[%s4263_s5 + $0x45] sm:$0xff] }
 0x186   : > { %v4706_v22 = vadd.f32 %v1230_v34, %v1045_v39  ;;  %v1845_v34 = vpack.c.bf16 %v1812_v24, %v1811_v15  ;;  %v1814_v15 = vld [vmem:[%s4263_s5 + $0x5d] sm:$0xff] }
 0x189   : > { %v736_v18 = vpop.f32.mrf.mxu2 }
 0x18a   : > { %v798_v7 = vadd.f32 %v736_v18, %v525_v54  ;;  %v527_v21 = vpop.f32.mrf.mxu1  ;;  %v994_v29 = vpop.f32.mrf.mxu3  ;;  %v2058_v54 = vld [vmem:[%s4263_s5 + $0x3e] sm:$0xff] }
 0x18b   : > { %v528_v60 = vadd.f32 %v527_v21, %v4392_v55  ;;  %v2092_v21 = vpack.c.bf16 %v2058_v54, %v2057_v35  ;;  %v2059_v35 = vld [vmem:[%s4263_s5 + $0x46] sm:$0xff]  ;;  %v2060_v54 = vld [vmem:[%s4263_s5 + $0x4e] sm:$0xff] }
 0x18c   : > { %v1235_v0 = vpop.f32.mrf.mxu0  ;;  %v1046_v52 = vadd.f32 %v984_v59, %v798_v7  ;;  %v1596_v7 = vpack.c.bf16 %v1562_v47, %v1561_v5  ;;  %v1564_v47 = vld [vmem:[%s4263_s5 + $0x4c] sm:$0xff] }
 0x18d   : > { %3993 = vmatmul.msk.bf16.vlgmr.msra.gmra.mxu1 %vm253_vm1, %v1347_v19 }
 0x18e   : > { %4012 = vmatmul.msk.bf16.vlgmr.msra.gmra.mxu2 %vm253_vm1, %v1595_v30  ;;  %v4717_v4 = vadd.f32 %v1232_v14, %v1046_v52 }
 0x18f   : > { %4050 = vmatmul.msk.bf16.vlgmr.msra.gmra.mxu0 %vm253_vm1, %v2091_v48  ;;  %4033 = vmatmul.msk.bf16.gmra.mxu3 %vm253_vm1, %v1845_v34  ;;  %v1813_v48 = vld [vmem:[%s4263_s5 + $0x55] sm:$0xff] }
 0x191   : > { %v739_v50 = vpop.f32.mrf.mxu2 }
 0x192   : > { %v799_v45 = vadd.f32 %v739_v50, %v528_v60  ;;  %v529_v59 = vpop.f32.mrf.mxu1  ;;  %v997_v17 = vpop.f32.mrf.mxu3 }
 0x193   : > { %v530_v14 = vadd.f32 %v529_v59, %v4406_v63 }
 0x194   : > { %v1237_v39 = vpop.f32.mrf.mxu0  ;;  %v1047_v38 = vadd.f32 %v987_v37, %v799_v45 }
 0x196   : > { %v4722_v1 = vadd.f32 %v1235_v0, %v1047_v38  ;;  %v1846_v0 = vpack.c.bf16 %v1814_v15, %v1813_v48  ;;  %v1563_v38 = vld [vmem:[%s4263_s5 + $0x44] sm:$0xff]  ;;  %v1816_v48 = vld [vmem:[%s4263_s5 + $0x6d] sm:$0xff] }
 0x199   : > { %v741_v18 = vpop.f32.mrf.mxu2 }
 0x19a   : > { %v800_v55 = vadd.f32 %v741_v18, %v530_v14  ;;  %v532_v19 = vpop.f32.mrf.mxu1  ;;  %v999_v37 = vpop.f32.mrf.mxu3 }
 0x19b   : > { %v533_v34 = vadd.f32 %v532_v19, %v4421_v8  ;;  %v2093_v19 = vpack.c.bf16 %v2060_v54, %v2059_v35  ;;  %v2061_v35 = vld [vmem:[%s4263_s5 + $0x56] sm:$0xff]  ;;  %v2062_v54 = vld [vmem:[%s4263_s5 + $0x5e] sm:$0xff] }
 0x19c   : > { %v1240_v24 = vpop.f32.mrf.mxu0  ;;  %v1048_v52 = vadd.f32 %v989_v13, %v800_v55  ;;  %v1597_v55 = vpack.c.bf16 %v1564_v47, %v1563_v38  ;;  %v1566_v47 = vld [vmem:[%s4263_s5 + $0x5c] sm:$0xff] }
 0x19d   : > { %3994 = vmatmul.msk.bf16.gmra.mxu1 %vm253_vm1, %v1595_v30 }
 0x19e   : > { %4013 = vmatmul.msk.bf16.gmra.mxu2 %vm253_vm1, %v1596_v7  ;;  %v4733_v63 = vadd.f32 %v1237_v39, %v1048_v52 }
 0x19f   : > { %4051 = vmatmul.msk.bf16.gmra.mxu0 %vm253_vm1, %v2092_v21  ;;  %4034 = vmatmul.msk.bf16.gmra.mxu3 %vm253_vm1, %v1846_v0  ;;  %v1815_v21 = vld [vmem:[%s4263_s5 + $0x65] sm:$0xff] }
 0x1a0   : > { %5867 = vst [vmem:[#allocation5_spill] sm:$0xff] %v4733_v63 }
 0x1a1   : > { %v744_v60 = vpop.f32.mrf.mxu2 }
 0x1a2   : > { %v801_v50 = vadd.f32 %v744_v60, %v533_v34  ;;  %v534_v13 = vpop.f32.mrf.mxu1  ;;  %v1002_v59 = vpop.f32.mrf.mxu3 }
 0x1a3   : > { %v535_v39 = vadd.f32 %v534_v13, %v4435_v16 }
 0x1a4   : > { %v1242_v45 = vpop.f32.mrf.mxu0  ;;  %v1049_v30 = vadd.f32 %v992_v49, %v801_v50 }
 0x1a6   : > { %v4738_v5 = vadd.f32 %v1240_v24, %v1049_v30  ;;  %v1847_v24 = vpack.c.bf16 %v1816_v48, %v1815_v21  ;;  %v1565_v30 = vld [vmem:[%s4263_s5 + $0x54] sm:$0xff]  ;;  %v1818_v21 = vld [vmem:[%s4263_s5 + $0x7d] sm:$0xff] }
 0x1a8   : > { %5868 = vst [vmem:[#allocation6_spill] sm:$0xff] %v4738_v5 }
 0x1a9   : > { %v746_v14 = vpop.f32.mrf.mxu2 }
 0x1aa   : > { %v802_v8 = vadd.f32 %v746_v14, %v535_v39  ;;  %v537_v18 = vpop.f32.mrf.mxu1  ;;  %v1004_v49 = vpop.f32.mrf.mxu3 }
 0x1ab   : > { %v538_v0 = vadd.f32 %v537_v18, %v4450_v25  ;;  %v2094_v18 = vpack.c.bf16 %v2062_v54, %v2061_v35  ;;  %v2063_v35 = vld [vmem:[%s4263_s5 + $0x66] sm:$0xff] }
 0x1ac   : > { %v1245_v15 = vpop.f32.mrf.mxu0  ;;  %v1050_v52 = vadd.f32 %v994_v29, %v802_v8  ;;  %v1598_v8 = vpack.c.bf16 %v1566_v47, %v1565_v30  ;;  %v1568_v47 = vld [vmem:[%s4263_s5 + $0x6c] sm:$0xff] }
 0x1ad   : > { %3995 = vmatmul.msk.bf16.gmra.mxu1 %vm253_vm1, %v1596_v7 }
 0x1ae   : > { %4014 = vmatmul.msk.bf16.gmra.mxu2 %vm253_vm1, %v1597_v55  ;;  %v4749_v16 = vadd.f32 %v1242_v45, %v1050_v52 }
 0x1af   : > { %4052 = vmatmul.msk.bf16.gmra.mxu0 %vm253_vm1, %v2093_v19  ;;  %4035 = vmatmul.msk.bf16.gmra.mxu3 %vm253_vm1, %v1847_v24  ;;  %v1817_v19 = vld [vmem:[%s4263_s5 + $0x75] sm:$0xff] }
 0x1b0   : > { %5869 = vst [vmem:[#allocation7_spill] sm:$0xff] %v4749_v16 }
 0x1b1   : > { %v749_v34 = vpop.f32.mrf.mxu2 }
 0x1b2   : > { %v803_v60 = vadd.f32 %v749_v34, %v538_v0  ;;  %v539_v29 = vpop.f32.mrf.mxu1  ;;  %v1007_v13 = vpop.f32.mrf.mxu3 }
 0x1b3   : > { %v540_v45 = vadd.f32 %v539_v29, %v4464_v33 }
 0x1b4   : > { %v1247_v50 = vpop.f32.mrf.mxu0  ;;  %v1051_v7 = vadd.f32 %v997_v17, %v803_v60 }
 0x1b6   : > { %v4754_v38 = vadd.f32 %v1245_v15, %v1051_v7  ;;  %v1848_v15 = vpack.c.bf16 %v1818_v21, %v1817_v19  ;;  %v1567_v7 = vld [vmem:[%s4263_s5 + $0x64] sm:$0xff]  ;;  %v1820_v19 = vld [vmem:[%s4263_s5 + $0x8d] sm:$0xff] }
 0x1b8   : > { %5870 = vst [vmem:[#allocation8_spill] sm:$0xff] %v4754_v38 }
 0x1b9   : > { %v751_v39 = vpop.f32.mrf.mxu2 }
 0x1ba   : > { %v804_v25 = vadd.f32 %v751_v39, %v540_v45  ;;  %v542_v14 = vpop.f32.mrf.mxu1  ;;  %v1009_v17 = vpop.f32.mrf.mxu3 }
 0x1bb   : > { %v543_v24 = vadd.f32 %v542_v14, %v4480_v42 }
 0x1bc   : > { %v1250_v48 = vpop.f32.mrf.mxu0  ;;  %v1052_v52 = vadd.f32 %v999_v37, %v804_v25  ;;  %v1599_v25 = vpack.c.bf16 %v1568_v47, %v1567_v7  ;;  %v1570_v47 = vld [vmem:[%s4263_s5 + $0x7c] sm:$0xff] }
 0x1bd   : > { %3996 = vmatmul.msk.bf16.gmra.mxu1 %vm253_vm1, %v1597_v55 }
 0x1be   : > { %4015 = vmatmul.msk.bf16.gmra.mxu2 %vm253_vm1, %v1598_v8  ;;  %v4765_v33 = vadd.f32 %v1247_v50, %v1052_v52  ;;  %v2064_v50 = vld [vmem:[%s4263_s5 + $0x6e] sm:$0xff] }
 0x1bf   : > { %4053 = vmatmul.msk.bf16.gmra.mxu0 %vm253_vm1, %v2094_v18  ;;  %4036 = vmatmul.msk.bf16.gmra.mxu3 %vm253_vm1, %v1848_v15  ;;  %v2095_v14 = vpack.c.bf16 %v2064_v50, %v2063_v35  ;;  %v1819_v18 = vld [vmem:[%s4263_s5 + $0x85] sm:$0xff]  ;;  %v2065_v35 = vld [vmem:[%s4263_s5 + $0x76] sm:$0xff] }
 0x1c0   : > { %5871 = vst [vmem:[#allocation9_spill] sm:$0xff] %v4765_v33  ;;  %v1824_v33 = vld [vmem:[%s4263_s5 + $0xad] sm:$0xff] }
 0x1c1   : > { %v754_v0 = vpop.f32.mrf.mxu2 }
 0x1c2   : > { %v805_v34 = vadd.f32 %v754_v0, %v543_v24  ;;  %v544_v37 = vpop.f32.mrf.mxu1  ;;  %v4769_v29 = vpop.f32.mrf.mxu3 }
 0x1c3   : > { %v545_v54 = vadd.f32 %v544_v37, %v4492_v51 }
 0x1c4   : > { %v1252_v60 = vpop.f32.mrf.mxu0  ;;  %v1053_v55 = vadd.f32 %v1002_v59, %v805_v34 }
 0x1c6   : > { %v4772_v30 = vadd.f32 %v1250_v48, %v1053_v55  ;;  %v1849_v48 = vpack.c.bf16 %v1820_v19, %v1819_v18  ;;  %v1569_v55 = vld [vmem:[%s4263_s5 + $0x74] sm:$0xff]  ;;  %v1822_v19 = vld [vmem:[%s4263_s5 + $0x9d] sm:$0xff] }
 0x1c7   : > { %v1821_v18 = vld [vmem:[%s4263_s5 + $0x95] sm:$0xff] }
 0x1c8   : > { %5872 = vst [vmem:[#allocation10_spill] sm:$0xff] %v4772_v30  ;;  %v1823_v30 = vld [vmem:[%s4263_s5 + $0xa5] sm:$0xff] }
 0x1c9   : > { %v756_v42 = vpop.f32.mrf.mxu2 }
 0x1ca   : > { %v806_v45 = vadd.f32 %v756_v42, %v545_v54  ;;  %v547_v39 = vpop.f32.mrf.mxu1  ;;  %v4780_v52 = vpop.f32.mrf.mxu3  ;;  %v2339_v54 = vlaneseq }
 0x1cb   : > { %v548_v15 = vadd.f32 %v547_v39, %v4506_v3  ;;  %v4798_v39 = vpack.c.bf16 %v1570_v47, %v1569_v55 }
 0x1cc   : > { %v1255_v21 = vpop.f32.mrf.mxu0  ;;  %v1054_v59 = vadd.f32 %v1004_v49, %v806_v45 }
 0x1cd   : > { %3997 = vmatmul.msk.bf16.gmra.mxu1 %vm253_vm1, %v1598_v8 }
 0x1ce   : > { %4016 = vmatmul.msk.bf16.gmra.mxu2 %vm253_vm1, %v1599_v25  ;;  %v4785_v51 = vadd.f32 %v1252_v60, %v1054_v59  ;;  %v2066_v60 = vld [vmem:[%s4263_s5 + $0x7e] sm:$0xff]  ;;  %v4802_v59 = vshrl.u32 %v2339_v54, 7 }
 0x1cf   : > { %4054 = vmatmul.msk.bf16.gmra.mxu0 %vm253_vm1, %v2095_v14  ;;  %4037 = vmatmul.msk.bf16.gmra.mxu3 %vm253_vm1, %v1849_v48  ;;  %v2096_v14 = vpack.c.bf16 %v2066_v60, %v2065_v35 }
 0x1d0   : > { %5873 = vst [vmem:[#allocation11_spill] sm:$0xff] %v4785_v51 }
 0x1d1   : > { %v759_v24 = vpop.f32.mrf.mxu2 }
 0x1d2   : > { %v807_v49 = vadd.f32 %v759_v24, %v548_v15  ;;  %v549_v0 = vpop.f32.mrf.mxu1  ;;  %v4789_v37 = vpop.f32.mrf.mxu3  ;;  %v1850_v15 = vpack.c.bf16 %v1822_v19, %v1821_v18  ;;  %v1572_v18 = vld [vmem:[%s4263_s5 + $0x8c] sm:$0xff] }
 0x1d3   : > { %v550_v50 = vadd.f32 %v549_v0, %v4518_v20  ;;  %v4808_v20 = vadd.s32 19, %v4802_v59 }
 0x1d4   : > { %v1257_v34 = vpop.f32.mrf.mxu0  ;;  %v1055_v8 = vadd.f32 %v1007_v13, %v807_v49 }
 0x1d5   : > { %v2415_v49 = vand.u32 65535, %v4808_v20 }
 0x1d6   : > { %v4792_v7 = vadd.f32 %v1255_v21, %v1055_v8 }
 0x1d7   : > { %v2419_v8 = vmul.u32 58254, %v2415_v49  ;;  %v2418_v60 = vmul.u32 14564, %v2415_v49  ;;  %v2068_v49 = vld [vmem:[%s4263_s5 + $0x8e] sm:$0xff] }
 0x1d8   : > { %5874 = vst [vmem:[#allocation12_spill] sm:$0xff] %v4792_v7 }
 0x1d9   : > { %v761_v3 = vpop.f32.mrf.mxu2 }
 0x1da   : > { %v808_v42 = vadd.f32 %v761_v3, %v550_v50  ;;  %v552_v45 = vpop.f32.mrf.mxu1  ;;  %v4804_v21 = vpop.f32.mrf.mxu3  ;;  %v2422_v50 = vshll.u32 %v2419_v8, 16 }
 0x1db   : > { %v553_v0 = vadd.f32 %v552_v45, %v4400_v58  ;;  %v2341_v58 = vadd.s32 8, %v4802_v59 }
 0x1dc   : > { %v1260_v13 = vpop.f32.mrf.mxu0  ;;  %v1056_v48 = vadd.f32 %v1009_v17, %v808_v42  ;;  %vm2426_vm2 = vc.u32 %v2418_v60, %v2422_v50  ;;  %v2428_v19 = vadd.s32 %v2422_v50, %v2418_v60  ;;  %v2423_v60 = vshrl.u32 %v2419_v8, 16 }
 0x1dd   : > { %3998 = vmatmul.msk.bf16.gmra.mxu1 %vm253_vm1, %v1599_v25  ;;  %v2416_v25 = vshrl.u32 %v4808_v20, 16 }
 0x1de   : > { %4017 = vmatmul.msk.bf16.gmra.mxu2 %vm253_vm1, %v4798_v39  ;;  %v4813_v24 = vadd.f32 %v1257_v34, %v1056_v48  ;;  %v4825_v48 = vadd.s32 19, %v2341_v58 }
 0x1df   : > { %4055 = vmatmul.msk.bf16.gmra.mxu0 %vm253_vm1, %v2096_v14  ;;  %4038 = vmatmul.msk.bf16.gmra.mxu3 %vm253_vm1, %v1850_v15  ;;  %v2420_v34 = vmul.u32 14564, %v2416_v25  ;;  %v2421_v42 = vmul.u32 58254, %v2416_v25  ;;  %v1571_v14 = vld [vmem:[%s4263_s5 + $0x84] sm:$0xff] }
 0x1e0   : > { %5875 = vst [vmem:[#allocation13_spill] sm:$0xff] %v4813_v24  ;;  %v2444_v25 = vand.u32 65535, %v4825_v48  ;;  %v4834_v51 = vpack.c.bf16 %v1572_v18, %v1571_v14  ;;  %v2445_v50 = vshrl.u32 %v4825_v48, 16 }
 0x1e1   : > { %v764_v17 = vpop.f32.mrf.mxu2  ;;  %v2424_v45 = vshll.u32 %v2420_v34, 16  ;;  %v2425_v14 = vshrl.u32 %v2420_v34, 16 }
 0x1e2   : > { %v809_v55 = vadd.f32 %v764_v17, %v553_v0  ;;  %v554_v47 = vpop.f32.mrf.mxu1  ;;  %v4820_v54 = vpop.f32.mrf.mxu3  ;;  %v2067_v0 = vld [vmem:[%s4263_s5 + $0x86] sm:$0xff]  ;;  %v5863_v17 = vmov 0   ;;  %v2448_v16 = vmul.u32 58254, %v2444_v25 }
 0x1e3   : > { %vm2430_vm3 = vc.u32 %v2428_v19, %v2424_v45 }
 0x1e4   : > { %v1262_v35 = vpop.f32.mrf.mxu0  ;;  %v1057_v3 = vadd.f32 %v4769_v29, %v809_v55  ;;  %v2427_v29 = vsel %vm2426_vm2, 1, %v5863_v17  ;;  %v555_v55 = vadd.f32 %v554_v47, %v4414_v6  ;;  %v2447_v47 = vmul.u32 14564, %v2444_v25 }
 0x1e5   : > { %v2429_v24 = vadd.s32 %v2427_v29, %v2421_v42  ;;  %v2449_v42 = vmul.u32 14564, %v2445_v50  ;;  %v2451_v18 = vshll.u32 %v2448_v16, 16  ;;  %v2450_v29 = vmul.u32 58254, %v2445_v50 }
 0x1e6   : > { %v4827_v15 = vadd.f32 %v1260_v13, %v1057_v3  ;;  %v2431_v13 = vsel %vm2430_vm3, 1, %v5863_v17  ;;  %v2452_v25 = vshrl.u32 %v2448_v16, 16 }
 0x1e7   : > { %v2433_v38 = vadd.s32 %v2431_v13, %v2429_v24  ;;  %vm2455_vm4 = vc.u32 %v2447_v47, %v2451_v18  ;;  %v2457_v24 = vadd.s32 %v2451_v18, %v2447_v47 }
 0x1e8   : > { %5876 = vst [vmem:[#allocation14_spill] sm:$0xff] %v4827_v15  ;;  %v2097_v15 = vpack.c.bf16 %v2068_v49, %v2067_v0  ;;  %v2453_v0 = vshll.u32 %v2449_v42, 16  ;;  %v2342_v49 = vadd.s32 16, %v4802_v59 }
 0x1e9   : > { %v766_v7 = vpop.f32.mrf.mxu2  ;;  %v2434_v8 = vadd.s32 %v2433_v38, %v2423_v60 }
 0x1ea   : > { %v810_v3 = vadd.f32 %v766_v7, %v555_v55  ;;  %v557_v58 = vpop.f32.mrf.mxu1  ;;  %v4841_v19 = vpop.f32.mrf.mxu3  ;;  %v1851_v7 = vpack.c.bf16 %v1824_v33, %v1823_v30  ;;  %v4850_v34 = vadd.s32 19, %v2342_v49  ;;  %vm2459_vm5 = vc.u32 %v2457_v24, %v2453_v0  ;;  %v1574_v0 = vld [vmem:[%s4263_s5 + $0x9c] sm:$0xff] }
 0x1eb   : > { %v2435_v33 = vadd.s32 %v2434_v8, %v2425_v14  ;;  %v2460_v50 = vsel %vm2459_vm5, 1, %v5863_v17  ;;  %v1573_v8 = vld [vmem:[%s4263_s5 + $0x94] sm:$0xff] }
 0x1ec   : > { %v1265_v6 = vpop.f32.mrf.mxu0  ;;  %v1058_v45 = vadd.f32 %v4780_v52, %v810_v3  ;;  %v2456_v52 = vsel %vm2455_vm4, 1, %v5863_v17  ;;  %v2474_v60 = vshrl.u32 %v4850_v34, 16  ;;  %v2454_v3 = vshrl.u32 %v2449_v42, 16  ;;  %v2069_v49 = vld [vmem:[%s4263_s5 + $0x96] sm:$0xff] }
 0x1ed   : > { %3999 = vmatmul.msk.bf16.gmra.mxu1 %vm253_vm1, %v4798_v39  ;;  %v558_v39 = vadd.f32 %v557_v58, %v4429_v11  ;;  %v2458_v30 = vadd.s32 %v2456_v52, %v2450_v29  ;;  %v2436_v18 = vshrl.u32 %v2435_v33, 4  ;;  %v2343_v29 = vadd.s32 24, %v4802_v59  ;;  %v2070_v52 = vld [vmem:[%s4263_s5 + $0x9e] sm:$0xff] }
 0x1ee   : > { %4018 = vmatmul.msk.bf16.gmra.mxu2 %vm253_vm1, %v4834_v51  ;;  %v4852_v38 = vadd.f32 %v1262_v35, %v1058_v45  ;;  %v4864_v14 = vmul.u32 14564, %v2474_v60 }
 0x1ef   : > { %4056 = vmatmul.msk.bf16.gmra.mxu0 %vm253_vm1, %v2097_v15  ;;  %4039 = vmatmul.msk.bf16.gmra.mxu3 %vm253_vm1, %v1851_v7  ;;  %v2473_v15 = vand.u32 65535, %v4850_v34  ;;  %v2462_v58 = vadd.s32 %v2460_v50, %v2458_v30  ;;  %v4871_v30 = vadd.s32 19, %v2343_v29  ;;  %v2437_v17 = vmul.u32 18, %v2436_v18 }
 0x1f0   : > { %5877 = vst [vmem:[#allocation15_spill] sm:$0xff] %v4852_v38 }
 0x1f1   : > { %v769_v55 = vpop.f32.mrf.mxu2  ;;  %v2477_v16 = vmul.u32 58254, %v2473_v15  ;;  %v2463_v7 = vadd.s32 %v2462_v58, %v2452_v25  ;;  %v2476_v24 = vmul.u32 14564, %v2473_v15  ;;  %v4877_v25 = vpack.c.bf16 %v1574_v0, %v1573_v8  ;;  %v1575_v0 = vld [vmem:[%s4263_s5 + $0xa4] sm:$0xff] }
 0x1f2   : > { %v811_v13 = vadd.f32 %v769_v55, %v558_v39  ;;  %v559_v35 = vpop.f32.mrf.mxu1  ;;  %v4862_v45 = vpop.f32.mrf.mxu3  ;;  %v2479_v55 = vmul.u32 58254, %v2474_v60  ;;  %v2098_v58 = vpack.c.bf16 %v2070_v52, %v2069_v49  ;;  %v1576_v49 = vld [vmem:[%s4263_s5 + $0xac] sm:$0xff] }
 0x1f3   : > { %v2464_v42 = vadd.s32 %v2463_v7, %v2454_v3  ;;  %v2480_v39 = vshll.u32 %v2477_v16, 16  ;;  %v1825_v3 = vld [vmem:[%s4263_s5 + $0xb5] sm:$0xff]  ;;  %v1826_v7 = vld [vmem:[%s4263_s5 + $0xbd] sm:$0xff]  ;;  %v2481_v52 = vshrl.u32 %v2477_v16, 16  ;;  %v2483_v16 = vshrl.u32 %v4864_v14, 16 }
 0x1f4   : > { %v4859_v11 = vpop.f32.mrf.mxu0  ;;  %v1059_v47 = vadd.f32 %v4789_v37, %v811_v13  ;;  %v560_v37 = vadd.f32 %v559_v35, %v4443_v23  ;;  %v2482_v13 = vshll.u32 %v4864_v14, 16  ;;  %v2502_v23 = vand.u32 65535, %v4871_v30 }
 0x1f5   : > { %vm2484_vm6 = vc.u32 %v2476_v24, %v2480_v39  ;;  %v2486_v29 = vadd.s32 %v2480_v39, %v2476_v24  ;;  %v2465_v35 = vshrl.u32 %v2464_v42, 4  ;;  %v2438_v24 = vsub.s32 %v4808_v20, %v2437_v17 }
 0x1f6   : > { %v4875_v50 = vadd.f32 %v1265_v6, %v1059_v47  ;;  %v5879_v6 = vmov 0   ;;  %v1852_v39 = vpack.c.bf16 %v1826_v7, %v1825_v3  ;;  %v2344_v20 = vadd.s32 32, %v4802_v59 }
 0x1f7   : > { %v2485_v47 = vsel %vm2484_vm6, 1, %v5879_v6  ;;  %vm2488_vm7 = vc.u32 %v2486_v29, %v2482_v13  ;;  %v4906_v17 = vpack.c.bf16 %v1576_v49, %v1575_v0  ;;  %v2466_v13 = vmul.u32 18, %v2465_v35 }
 0x1f8   : > { %5878 = vst [vmem:[#allocation16_spill] sm:$0xff] %v4875_v50  ;;  %v2489_v42 = vsel %vm2488_vm7, 1, %v5879_v6  ;;  %v2505_v3 = vmul.u32 14564, %v2502_v23  ;;  %vm3456_vm8 = vcmp.ne.s32.totalorder %v2438_v24, 0  ;;  %vm3492_vm9 = vcmp.lt.s32.totalorder %v2438_v24, 0 }
 0x1f9   : > { %v771_v33 = vpop.f32.mrf.mxu2  ;;  %v3564_v49 = vadd.s32 18, %v2438_v24  ;;  %vm4927_vm11 = vmand %vm3492_vm9, %vm3456_vm8 }
 0x1fa   : > { %v812_v38 = vadd.f32 %v771_v33, %v560_v37  ;;  %v562_v15 = vpop.f32.mrf.mxu1  ;;  %v4888_v18 = vpop.f32.mrf.mxu3  ;;  %v2487_v37 = vadd.s32 %v2485_v47, %v2479_v55  ;;  %v2503_v33 = vshrl.u32 %v4871_v30, 16 }
 0x1fb   : > { %v563_v29 = vadd.f32 %v562_v15, %v4458_v28 }
 0x1fc   : > { %v4882_v60 = vpop.f32.mrf.mxu0  ;;  %v1060_v8 = vadd.f32 %v4804_v21, %v812_v38  ;;  %v4899_v21 = vld [vmem:[%s4263_s5 + $0xa6] sm:$0xff]  ;;  %v4902_v38 = vld [vmem:[%s4263_s5 + $0xae] sm:$0xff]  ;;  %v2491_v55 = vadd.s32 %v2489_v42, %v2487_v37  ;;  %v2507_v7 = vmul.u32 14564, %v2503_v33  ;;  %v2508_v14 = vmul.u32 58254, %v2503_v33 }
 0x1fd   : > { %4000 = vmatmul.msk.bf16.gmra.mxu1 %vm253_vm1, %v4834_v51  ;;  %v2506_v51 = vmul.u32 58254, %v2502_v23 }
 0x1fe   : > { %4019 = vmatmul.msk.bf16.gmra.mxu2 %vm253_vm1, %v4877_v25  ;;  %v2492_v47 = vadd.s32 %v2491_v55, %v2481_v52  ;;  %v2511_v37 = vshll.u32 %v2507_v7, 16  ;;  %v4915_v0 = vadd.f32 %v4859_v11, %v1060_v8  ;;  %v4920_v52 = vsub.s32 %v4825_v48, %v2466_v13 }
 0x1ff   : > { %4057 = vmatmul.msk.bf16.gmra.mxu0 %vm253_vm1, %v2098_v58  ;;  %v2509_v50 = vshll.u32 %v2506_v51, 16  ;;  %v4909_v58 = vadd.s32 19, %v2344_v20  ;;  %4040 = vmatmul.msk.bf16.gmra.mxu3 %vm253_vm1, %v1852_v39  ;;  %v1578_v20 = vld [vmem:[%s4263_s5 + $0xbc] sm:$0xff]  ;;  %v2512_v13 = vshrl.u32 %v2507_v7, 16 }
 0x200   : > { %5880 = vst [vmem:[#allocation17_spill] sm:$0xff] %v4915_v0  ;;  %v2493_v28 = vadd.s32 %v2492_v47, %v2483_v16  ;;  %v1577_v16 = vld [vmem:[%s4263_s5 + $0xb4] sm:$0xff]  ;;  %v2345_v47 = vadd.s32 40, %v4802_v59  ;;  %vm3457_vm13 = vcmp.ne.s32.totalorder %v4920_v52, 0  ;;  %vm3493_vm14 = vcmp.lt.s32.totalorder %v4920_v52, 0 }
 0x201   : > { %v774_v5 = vpop.f32.mrf.mxu2  ;;  %vm2513_vm10 = vc.u32 %v2505_v3, %v2509_v50  ;;  %v2515_v39 = vadd.s32 %v2509_v50, %v2505_v3  ;;  %v2531_v8 = vand.u32 65535, %v4909_v58  ;;  %v2532_v50 = vshrl.u32 %v4909_v58, 16  ;;  %vm4981_vm2 = vmand %vm3493_vm14, %vm3457_vm13 }
 0x202   : > { %v813_v35 = vadd.f32 %v774_v5, %v563_v29  ;;  %v564_v23 = vpop.f32.mrf.mxu1  ;;  %v4923_v33 = vpop.f32.mrf.mxu3  ;;  %v2494_v11 = vshrl.u32 %v2493_v28, 4  ;;  %v2514_v5 = vsel %vm2513_vm10, 1, %v5879_v6  ;;  %v2510_v29 = vshrl.u32 %v2506_v51, 16 }
 0x203   : > { %v2516_v48 = vadd.s32 %v2514_v5, %v2508_v14  ;;  %vm2517_vm12 = vc.u32 %v2515_v39, %v2511_v37  ;;  %v2534_v28 = vmul.u32 14564, %v2531_v8  ;;  %v4936_v63 = vmul.u32 58254, %v2531_v8  ;;  %v1827_v5 = vld [vmem:[%s4263_s5 + $0xc5] sm:$0xff]  ;;  %v1828_v8 = vld [vmem:[%s4263_s5 + $0xcd] sm:$0xff] }
 0x204   : > { %v4917_v15 = vpop.f32.mrf.mxu0  ;;  %v1061_v42 = vadd.f32 %v4820_v54, %v813_v35  ;;  %v2495_v54 = vmul.u32 18, %v2494_v11  ;;  %v2518_v3 = vsel %vm2517_vm12, 1, %v5879_v6  ;;  %v4938_v0 = vmul.u32 14564, %v2532_v50 }
 0x205   : > { %v2520_v35 = vadd.s32 %v2518_v3, %v2516_v48  ;;  %v565_v51 = vadd.f32 %v564_v23, %v4472_v40  ;;  %v4943_v14 = vsel %vm4927_vm11, %v3564_v49, %v2438_v24  ;;  %v4945_v37 = vpack.c.bf16 %v1578_v20, %v1577_v16 }
 0x206   : > { %v4948_v7 = vadd.f32 %v4882_v60, %v1061_v42  ;;  %v4952_v11 = vsub.s32 %v4850_v34, %v2495_v54  ;;  %v2538_v40 = vshll.u32 %v4936_v63, 16  ;;  %v2537_v24 = vmul.u32 58254, %v2532_v50 }
 0x207   : > { %v2521_v48 = vadd.s32 %v2520_v35, %v2510_v29  ;;  %v4958_v49 = vadd.s32 19, %v2345_v47  ;;  %v2540_v20 = vshll.u32 %v4938_v0, 16  ;;  %v3565_v29 = vadd.s32 18, %v4920_v52 }
 0x208   : > { %5883 = vst [vmem:[#allocation18_spill] sm:$0xff] %v4948_v7  ;;  %vm2542_vm15 = vc.u32 %v2534_v28, %v2538_v40  ;;  %v1853_v3 = vpack.c.bf16 %v1828_v8, %v1827_v5  ;;  %vm3458_vm0 = vcmp.ne.s32.totalorder %v4952_v11, 0  ;;  %v2539_v50 = vshrl.u32 %v4936_v63, 16 }
 0x209   : > { %v776_v39 = vpop.f32.mrf.mxu2  ;;  %v2522_v16 = vadd.s32 %v2521_v48, %v2512_v13  ;;  %v2543_v35 = vsel %vm2542_vm15, 1, %v5879_v6  ;;  %v2544_v13 = vadd.s32 %v2538_v40, %v2534_v28  ;;  %vm3494_vm3 = vcmp.lt.s32.totalorder %v4952_v11, 0 }
 0x20a   : > { %v814_v23 = vadd.f32 %v776_v39, %v565_v51  ;;  %v1433_v55 = vpop.f32.mrf.mxu1  ;;  %v4964_v54 = vpop.f32.mrf.mxu3  ;;  %v2545_v63 = vadd.s32 %v2543_v35, %v2537_v24  ;;  %v2560_v47 = vand.u32 65535, %v4958_v49  ;;  %v2561_v28 = vshrl.u32 %v4958_v49, 16  ;;  %vm5018_vm7 = vmand %vm3494_vm3, %vm3458_vm0 }
 0x20b   : > { %v1523_v60 = vadd.f32 %v1433_v55, %v4533_v61  ;;  %v2523_v61 = vshrl.u32 %v2522_v16, 4  ;;  %vm3636_vm4 = vcmp.ge.s32.totalorder %v4943_v14, 1  ;;  %vm3672_vm5 = vcmp.le.s32.totalorder %v4943_v14, 16 }
 0x20c   : > { %v2177_v42 = vpop.f32.mrf.mxu0  ;;  %v1062_v34 = vadd.f32 %v4841_v19, %v814_v23  ;;  %v5884_v19 = vpack.c.bf16 %v4902_v38, %v4899_v21  ;;  %v4991_v21 = vld [vmem:[%s4263_s5 + $0xb6] sm:$0xff]  ;;  %v4994_v38 = vld [vmem:[%s4263_s5 + $0xbe] sm:$0xff]  ;;  %vm2546_vm6 = vc.u32 %v2544_v13, %v2540_v20  ;;  %v2346_v39 = vadd.s32 48, %v4802_v59  ;;  %vm5055_vm14 = vmand %vm3636_vm4, %vm3672_vm5 }
 0x20d   : > { %4001 = vmatmul.msk.bf16.gmra.mxu1 %vm253_vm1, %v4877_v25  ;;  %v2524_v51 = vmul.u32 18, %v2523_v61  ;;  %v2547_v8 = vsel %vm2546_vm6, 1, %v5879_v6  ;;  %v2563_v48 = vmul.u32 14564, %v2560_v47  ;;  %v2564_v40 = vmul.u32 58254, %v2560_v47  ;;  %v1579_v25 = vld [vmem:[%s4263_s5 + $0xc4] sm:$0xff] }
 0x20e   : > { %4020 = vmatmul.msk.bf16.gmra.mxu2 %vm253_vm1, %v4906_v17  ;;  %v4998_v5 = vadd.f32 %v4917_v15, %v1062_v34  ;;  %v5001_v23 = vmul.u32 14564, %v2561_v28  ;;  %v5006_v24 = vsel %vm4981_vm2, %v3565_v29, %v4920_v52  ;;  %v3566_v16 = vadd.s32 18, %v4952_v11 }
 0x20f   : > { %4058 = vmatmul.msk.bf16.gmra.mxu0 %vm253_vm1, %v5884_v19  ;;  %4041 = vmatmul.msk.bf16.gmra.mxu3 %vm253_vm1, %v1853_v3  ;;  %v2549_v15 = vadd.s32 %v2547_v8, %v2545_v63  ;;  %v5010_v20 = vadd.s32 19, %v2346_v39  ;;  %v2541_v52 = vshrl.u32 %v4938_v0, 16  ;;  %v2567_v29 = vshll.u32 %v2564_v40, 16  ;;  %v1580_v63 = vld [vmem:[%s4263_s5 + $0xcc] sm:$0xff] }
 0x210   : > { %5887 = vst [vmem:[#allocation19_spill] sm:$0xff] %v4998_v5  ;;  %v2566_v47 = vmul.u32 58254, %v2561_v28  ;;  %v2569_v39 = vshll.u32 %v5001_v23, 16  ;;  %vm3637_vm8 = vcmp.ge.s32.totalorder %v5006_v24, 1  ;;  %vm3673_vm9 = vcmp.le.s32.totalorder %v5006_v24, 16  ;;  %v1829_v5 = vld [vmem:[%s4263_s5 + $0xd5] sm:$0xff] }
 0x211   : > { %v1681_v55 = vpop.f32.mrf.mxu2  ;;  %v2550_v0 = vadd.s32 %v2549_v15, %v2539_v50  ;;  %vm2571_vm10 = vc.u32 %v2563_v48, %v2567_v29  ;;  %v2573_v28 = vadd.s32 %v2567_v29, %v2563_v48  ;;  %v2568_v61 = vshrl.u32 %v2564_v40, 16  ;;  %vm3709_vm3 = vmand %vm3637_vm8, %vm3673_vm9 }
 0x212   : > { %v1771_v34 = vadd.f32 %v1681_v55, %v1523_v60  ;;  %v1435_v35 = vpop.f32.mrf.mxu1  ;;  %v2525_v60 = vsub.s32 %v4871_v30, %v2524_v51  ;;  %v5031_v55 = vpop.f32.mrf.mxu3  ;;  %v2572_v30 = vsel %vm2571_vm10, 1, %v5879_v6  ;;  %v2590_v15 = vshrl.u32 %v5010_v20, 16 }
 0x213   : > { %v1524_v3 = vadd.f32 %v1435_v35, %v4546_v57  ;;  %v5036_v57 = vsel %vm5018_vm7, %v3566_v16, %v4952_v11  ;;  %v2551_v35 = vadd.s32 %v2550_v0, %v2541_v52  ;;  %v2574_v50 = vadd.s32 %v2572_v30, %v2566_v47  ;;  %v1830_v11 = vld [vmem:[%s4263_s5 + $0xdd] sm:$0xff] }
 0x214   : > { %v2179_v19 = vpop.f32.mrf.mxu0  ;;  %v2019_v8 = vadd.f32 %v4862_v45, %v1771_v34  ;;  %v2589_v45 = vand.u32 65535, %v5010_v20  ;;  %v5040_v34 = vpack.c.bf16 %v1580_v63, %v1579_v25  ;;  %vm3459_vm11 = vcmp.ne.s32.totalorder %v2525_v60, 0 }
 0x215   : > { %vm2575_vm12 = vc.u32 %v2573_v28, %v2569_v39  ;;  %vm3495_vm13 = vcmp.lt.s32.totalorder %v2525_v60, 0  ;;  %v2552_v13 = vshrl.u32 %v2551_v35, 4  ;;  %v2570_v16 = vshrl.u32 %v5001_v23, 16 }
 0x216   : > { %v2267_v51 = vadd.f32 %v2177_v42, %v2019_v8  ;;  %v2576_v48 = vsel %vm2575_vm12, 1, %v5879_v6  ;;  %v2592_v42 = vmul.u32 14564, %v2589_v45  ;;  %v5047_v25 = vmul.u32 58254, %v2589_v45  ;;  %vm5062_vm15 = vmand %vm3495_vm13, %vm3459_vm11 }
 0x217   : > { %v2578_v7 = vadd.s32 %v2576_v48, %v2574_v50  ;;  %v5049_v52 = vmul.u32 14564, %v2590_v15  ;;  %v3567_v39 = vadd.s32 18, %v2525_v60  ;;  %v2553_v8 = vmul.u32 18, %v2552_v13 }
 0x218   : > { %v2303_v40 = vmax.f32 %v2267_v51, 0.0  ;;  %v1854_v45 = vpack.c.bf16 %v1830_v11, %v1829_v5  ;;  %v2596_v14 = vshll.u32 %v5047_v25, 16  ;;  %vm3638_vm0 = vcmp.ge.s32.totalorder %v5036_v57, 1 }
 0x219   : > { %v1683_v29 = vpop.f32.mrf.mxu2  ;;  %v2579_v51 = vadd.s32 %v2578_v7, %v2568_v61  ;;  %v2598_v13 = vshll.u32 %v5049_v52, 16  ;;  %v2347_v7 = vadd.s32 56, %v4802_v59  ;;  %v2599_v11 = vshrl.u32 %v5049_v52, 16 }
 0x21a   : > { %v1772_v47 = vadd.f32 %v1683_v29, %v1524_v3  ;;  %v1438_v23 = vpop.f32.mrf.mxu1  ;;  %v2554_v3 = vsub.s32 %v4909_v58, %v2553_v8  ;;  %v5070_v50 = vpop.f32.mrf.mxu3  ;;  %vm2600_vm2 = vc.u32 %v2592_v42, %v2596_v14  ;;  %v2602_v5 = vadd.s32 %v2596_v14, %v2592_v42 }
 0x21b   : > { %v1525_v0 = vadd.f32 %v1438_v23, %v4553_v41  ;;  %v2595_v41 = vmul.u32 58254, %v2590_v15  ;;  %v2580_v48 = vadd.s32 %v2579_v51, %v2570_v16  ;;  %v5894_v58 = vpack.c.bf16 %v4994_v38, %v4991_v21  ;;  %v5103_v23 = vld [vmem:[%s4263_s5 + $0xce] sm:$0xff] }
 0x21c   : > { %v2182_v30 = vpop.f32.mrf.mxu0  ;;  %v2020_v35 = vadd.f32 %v4888_v18, %v1772_v47  ;;  %v3744_v18 = vsel %vm5055_vm14, %v2303_v40, 0.0  ;;  %v2597_v15 = vshrl.u32 %v5047_v25, 16  ;;  %v2601_v16 = vsel %vm2600_vm2, 1, %v5879_v6  ;;  %v5100_v47 = vld [vmem:[%s4263_s5 + $0xc6] sm:$0xff] }
 0x21d   : > { %4002 = vmatmul.msk.bf16.gmra.mxu1 %vm253_vm1, %v4906_v17  ;;  %v5086_v17 = vsel %vm5062_vm15, %v3567_v39, %v2525_v60  ;;  %vm2604_vm4 = vc.u32 %v2602_v5, %v2598_v13  ;;  %vm3460_vm5 = vcmp.ne.s32.totalorder %v2554_v3, 0  ;;  %v2603_v38 = vadd.s32 %v2601_v16, %v2595_v41  ;;  %v1582_v41 = vld [vmem:[%s4263_s5 + $0xdc] sm:$0xff] }
 0x21e   : > { %v2268_v61 = vadd.f32 %v2179_v19, %v2020_v35  ;;  %4021 = vmatmul.msk.bf16.gmra.mxu2 %vm253_vm1, %v4945_v37  ;;  %v2581_v19 = vshrl.u32 %v2580_v48, 4  ;;  %v2605_v60 = vsel %vm2604_vm4, 1, %v5879_v6  ;;  %vm3496_vm6 = vcmp.lt.s32.totalorder %v2554_v3, 0 }
 0x21f   : > { %4059 = vmatmul.msk.bf16.gmra.mxu0 %vm253_vm1, %v5894_v58  ;;  %v3568_v42 = vadd.s32 18, %v2554_v3  ;;  %4042 = vmatmul.msk.bf16.gmra.mxu3 %vm253_vm1, %v1854_v45  ;;  %v5097_v25 = vadd.s32 19, %v2347_v7  ;;  %v2607_v39 = vadd.s32 %v2605_v60, %v2603_v38  ;;  %v2348_v8 = vadd.s32 64, %v4802_v59  ;;  %v1581_v45 = vld [vmem:[%s4263_s5 + $0xd4] sm:$0xff]  ;;  %vm3532_vm8 = vmand %vm3496_vm6, %vm3460_vm5  ;;  %v5147_v60 = vld [vmem:[%s4263_s5 + $0xde] sm:$0xff] }
 0x220   : > { %v2304_v21 = vmax.f32 %v2268_v61, 0.0  ;;  %v2582_v24 = vmul.u32 18, %v2581_v19  ;;  %vm3674_vm7 = vcmp.le.s32.totalorder %v5036_v57, 16  ;;  %vm3639_vm9 = vcmp.ge.s32.totalorder %v5086_v17, 1  ;;  %v5144_v38 = vld [vmem:[%s4263_s5 + $0xd6] sm:$0xff] }
 0x221   : > { %v1686_v29 = vpop.f32.mrf.mxu2  ;;  %v2618_v13 = vand.u32 65535, %v5097_v25  ;;  %v2608_v5 = vadd.s32 %v2607_v39, %v2597_v15  ;;  %vm3675_vm10 = vcmp.le.s32.totalorder %v5086_v17, 16  ;;  %vm5132_vm11 = vmand %vm3638_vm0, %vm3674_vm7  ;;  %v5136_v19 = vsel %vm3532_vm8, %v3568_v42, %v2554_v3 }
 0x222   : > { %v3745_v52 = vsel %vm3709_vm3, %v2304_v21, 0.0  ;;  %v1773_v40 = vadd.f32 %v1686_v29, %v1525_v0  ;;  %v1440_v63 = vpop.f32.mrf.mxu1  ;;  %v5108_v35 = vsub.s32 %v4958_v49, %v2582_v24  ;;  %v5117_v48 = vpop.f32.mrf.mxu3  ;;  %v2101_v49 = vpack.c.bf16 %v5103_v23, %v5100_v47  ;;  %v1831_v24 = vld [vmem:[%s4263_s5 + $0xe5] sm:$0xff]  ;;  %vm3711_vm4 = vmand %vm3639_vm9, %vm3675_vm10 }
 0x223   : > { %v3780_v28 = vadd.f32 %v3745_v52, %v3744_v18  ;;  %v1526_v51 = vadd.f32 %v1440_v63, %v4566_v10  ;;  %v2619_v10 = vshrl.u32 %v5097_v25, 16  ;;  %v5126_v18 = vpack.c.bf16 %v1582_v41, %v1581_v45  ;;  %v1832_v52 = vld [vmem:[%s4263_s5 + $0xed] sm:$0xff] }
 0x224   : > { %v2184_v14 = vpop.f32.mrf.mxu0  ;;  %v2021_v0 = vadd.f32 %v4923_v33, %v1773_v40  ;;  %v5124_v33 = vadd.s32 19, %v2348_v8  ;;  %v2609_v61 = vadd.s32 %v2608_v5, %v2599_v11  ;;  %v5128_v58 = vmul.u32 58254, %v2618_v13 }
 0x225   : > { %vm3461_vm12 = vcmp.ne.s32.totalorder %v5108_v35, 0  ;;  %v2621_v16 = vmul.u32 14564, %v2618_v13  ;;  %v5139_v21 = vmul.u32 14564, %v2619_v10  ;;  %vm3497_vm13 = vcmp.lt.s32.totalorder %v5108_v35, 0 }
 0x226   : > { %v2269_v7 = vadd.f32 %v2182_v30, %v2021_v0  ;;  %v3569_v11 = vadd.s32 18, %v5108_v35  ;;  %v2610_v57 = vshrl.u32 %v2609_v61, 4  ;;  %v2624_v3 = vmul.u32 58254, %v2619_v10  ;;  %vm5163_vm15 = vmand %vm3497_vm13, %vm3461_vm12 }
 0x227   : > { %v2625_v42 = vshll.u32 %v5128_v58, 16  ;;  %v2627_v40 = vshll.u32 %v5139_v21, 16  ;;  %v2647_v63 = vand.u32 65535, %v5124_v33  ;;  %v2648_v45 = vshrl.u32 %v5124_v33, 16 }
 0x228   : > { %v2305_v30 = vmax.f32 %v2269_v7, 0.0  ;;  %v2611_v8 = vmul.u32 18, %v2610_v57  ;;  %vm3640_vm2 = vcmp.ge.s32.totalorder %v5136_v19, 1  ;;  %vm3676_vm3 = vcmp.le.s32.totalorder %v5136_v19, 16  ;;  %v1584_v7 = vld [vmem:[%s4263_s5 + $0xec] sm:$0xff] }
 0x229   : > { %v1688_v29 = vpop.f32.mrf.mxu2  ;;  %vm2629_vm14 = vc.u32 %v2621_v16, %v2625_v42  ;;  %v2631_v5 = vadd.s32 %v2625_v42, %v2621_v16  ;;  %v5175_v16 = vmul.u32 58254, %v2647_v63  ;;  %v2626_v57 = vshrl.u32 %v5128_v58, 16  ;;  %vm5230_vm12 = vmand %vm3640_vm2, %vm3676_vm3 }
 0x22a   : > { %v3746_v47 = vsel %vm5132_vm11, %v2305_v30, 0.0  ;;  %v1774_v23 = vadd.f32 %v1688_v29, %v1526_v51  ;;  %v1443_v39 = vpop.f32.mrf.mxu1  ;;  %v2102_v51 = vpack.c.bf16 %v5147_v60, %v5144_v38  ;;  %v5169_v61 = vpop.f32.mrf.mxu3  ;;  %v2653_v17 = vmul.u32 58254, %v2648_v45 }
 0x22b   : > { %v3781_v41 = vadd.f32 %v3780_v28, %v3746_v47  ;;  %v1527_v13 = vadd.f32 %v1443_v39, %v4573_v2  ;;  %v1855_v28 = vpack.c.bf16 %v1832_v52, %v1831_v24  ;;  %v2630_v2 = vsel %vm2629_vm14, 1, %v5879_v6 }
 0x22c   : > { %v2187_v0 = vpop.f32.mrf.mxu0  ;;  %v2022_v10 = vadd.f32 %v4964_v54, %v1774_v23  ;;  %v2612_v54 = vsub.s32 %v5010_v20, %v2611_v8  ;;  %v2632_v15 = vadd.s32 %v2630_v2, %v2624_v3  ;;  %vm2633_vm0 = vc.u32 %v2631_v5, %v2627_v40  ;;  %v5221_v2 = vld [vmem:[%s4263_s5 + $0xee] sm:$0xff] }
 0x22d   : > { %4003 = vmatmul.msk.bf16.gmra.mxu1 %vm253_vm1, %v4945_v37  ;;  %v5190_v37 = vsel %vm5163_vm15, %v3569_v11, %v5108_v35  ;;  %v2634_v20 = vsel %vm2633_vm0, 1, %v5879_v6  ;;  %v2628_v24 = vshrl.u32 %v5139_v21, 16  ;;  %v2654_v58 = vshll.u32 %v5175_v16, 16 }
 0x22e   : > { %v2270_v30 = vadd.f32 %v2184_v14, %v2022_v10  ;;  %4022 = vmatmul.msk.bf16.gmra.mxu2 %vm253_vm1, %v5040_v34  ;;  %v2650_v14 = vmul.u32 14564, %v2647_v63  ;;  %v2636_v52 = vadd.s32 %v2634_v20, %v2632_v15  ;;  %vm3462_vm5 = vcmp.ne.s32.totalorder %v2612_v54, 0 }
 0x22f   : > { %4060 = vmatmul.msk.bf16.gmra.mxu0 %vm253_vm1, %v2101_v49  ;;  %v5193_v49 = vmul.u32 14564, %v2648_v45  ;;  %vm3498_vm6 = vcmp.lt.s32.totalorder %v2612_v54, 0  ;;  %4043 = vmatmul.msk.bf16.gmra.mxu3 %vm253_vm1, %v1855_v28  ;;  %v3570_v63 = vadd.s32 18, %v2612_v54  ;;  %vm3641_vm8 = vcmp.ge.s32.totalorder %v5190_v37, 1 }
 0x230   : > { %v2306_v29 = vmax.f32 %v2270_v30, 0.0  ;;  %v2637_v47 = vadd.s32 %v2636_v52, %v2626_v57  ;;  %vm2658_vm7 = vc.u32 %v2650_v14, %v2654_v58  ;;  %v2660_v8 = vadd.s32 %v2654_v58, %v2650_v14  ;;  %vm5213_vm10 = vmand %vm3498_vm6, %vm3462_vm5 }
 0x231   : > { %v1691_v3 = vpop.f32.mrf.mxu2  ;;  %v2656_v35 = vshll.u32 %v5193_v49, 16  ;;  %v2659_v28 = vsel %vm2658_vm7, 1, %v5879_v6  ;;  %vm3677_vm9 = vcmp.le.s32.totalorder %v5190_v37, 16  ;;  %v2655_v15 = vshrl.u32 %v5175_v16, 16 }
 0x232   : > { %v3747_v11 = vsel %vm3711_vm4, %v2306_v29, 0.0  ;;  %v1775_v42 = vadd.f32 %v1691_v3, %v1527_v13  ;;  %v1445_v40 = vpop.f32.mrf.mxu1  ;;  %v2638_v5 = vadd.s32 %v2637_v47, %v2628_v24  ;;  %v5204_v10 = vpop.f32.mrf.mxu3  ;;  %v1583_v13 = vld [vmem:[%s4263_s5 + $0xe4] sm:$0xff]  ;;  %v2661_v30 = vadd.s32 %v2659_v28, %v2653_v17  ;;  %vm3713_vm3 = vmand %vm3641_vm8, %vm3677_vm9 }
 0x233   : > { %v3782_v21 = vadd.f32 %v3781_v41, %v3747_v11  ;;  %v1528_v23 = vadd.f32 %v1445_v40, %v4586_v27  ;;  %v2349_v41 = vadd.s32 72, %v4802_v59  ;;  %vm2662_vm11 = vc.u32 %v2660_v8, %v2656_v35  ;;  %v1833_v11 = vld [vmem:[%s4263_s5 + $0xf5] sm:$0xff] }
 0x234   : > { %v5200_v39 = vpop.f32.mrf.mxu0  ;;  %v2023_v45 = vadd.f32 %v5031_v55, %v1775_v42  ;;  %v5218_v55 = vld [vmem:[%s4263_s5 + $0xe6] sm:$0xff]  ;;  %v2639_v20 = vshrl.u32 %v2638_v5, 4  ;;  %v2663_v14 = vsel %vm2662_vm11, 1, %v5879_v6  ;;  %v2350_v29 = vadd.s32 80, %v4802_v59  ;;  %v1834_v42 = vld [vmem:[%s4263_s5 + $0xfd] sm:$0xff] }
 0x235   : > { %v5234_v52 = vpack.c.bf16 %v1584_v7, %v1583_v13  ;;  %v2657_v16 = vshrl.u32 %v5193_v49, 16  ;;  %v2665_v58 = vadd.s32 %v2663_v14, %v2661_v30  ;;  %v5237_v3 = vadd.s32 19, %v2349_v41 }
 0x236   : > { %v2271_v57 = vadd.f32 %v2187_v0, %v2023_v45  ;;  %v5241_v17 = vsel %vm5213_vm10, %v3570_v63, %v2612_v54  ;;  %v2640_v35 = vmul.u32 18, %v2639_v20  ;;  %v2103_v19 = vpack.c.bf16 %v5221_v2, %v5218_v55 }
 0x237   : > { %v2666_v47 = vadd.s32 %v2665_v58, %v2655_v15  ;;  %v2676_v8 = vand.u32 65535, %v5237_v3  ;;  %v2677_v49 = vshrl.u32 %v5237_v3, 16  ;;  %v2351_v45 = vadd.s32 88, %v4802_v59 }
 0x238   : > { %v2307_v0 = vmax.f32 %v2271_v57, 0.0  ;;  %v2641_v63 = vsub.s32 %v5097_v25, %v2640_v35  ;;  %v5253_v7 = vadd.s32 19, %v2350_v29  ;;  %v1856_v30 = vpack.c.bf16 %v1834_v42, %v1833_v11  ;;  %v1585_v29 = vld [vmem:[%s4263_s5 + $0xf4] sm:$0xff] }
 0x239   : > { %v1693_v40 = vpop.f32.mrf.mxu2  ;;  %v2667_v15 = vadd.s32 %v2666_v47, %v2657_v16  ;;  %vm3642_vm13 = vcmp.ge.s32.totalorder %v5241_v17, 1  ;;  %vm3678_vm14 = vcmp.le.s32.totalorder %v5241_v17, 16  ;;  %v2680_v20 = vmul.u32 58254, %v2676_v8 }
 0x23a   : > { %v3748_v5 = vsel %vm5230_vm12, %v2307_v0, 0.0  ;;  %v1776_v13 = vadd.f32 %v1693_v40, %v1528_v23  ;;  %v1448_v54 = vpop.f32.mrf.mxu1  ;;  %vm3463_vm15 = vcmp.ne.s32.totalorder %v2641_v63, 0  ;;  %vm3499_vm0 = vcmp.lt.s32.totalorder %v2641_v63, 0  ;;  %v5259_v25 = vpop.f32.mrf.mxu3  ;;  %vm3714_vm11 = vmand %vm3642_vm13, %vm3678_vm14 }
 0x23b   : > { %v3783_v28 = vadd.f32 %v3782_v21, %v3748_v5  ;;  %v1529_v41 = vadd.f32 %v1448_v54, %v4593_v36  ;;  %v3571_v23 = vadd.s32 18, %v2641_v63  ;;  %vm3535_vm2 = vmand %vm3499_vm0, %vm3463_vm15  ;;  %v2668_v36 = vshrl.u32 %v2667_v15, 4 }
 0x23c   : > { %v2192_v27 = vpop.f32.mrf.mxu0  ;;  %v2024_v57 = vadd.f32 %v5070_v50, %v1776_v13  ;;  %v2679_v21 = vmul.u32 14564, %v2676_v8  ;;  %v5263_v14 = vmul.u32 14564, %v2677_v49  ;;  %v1586_v50 = vld [vmem:[%s4263_s5 + $0xfc] sm:$0xff]  ;;  %v2706_v16 = vshrl.u32 %v5253_v7, 16 }
 0x23d   : > { %4004 = vmatmul.msk.bf16.gmra.mxu1 %vm253_vm1, %v5040_v34  ;;  %v2705_v34 = vand.u32 65535, %v5253_v7  ;;  %v5276_v58 = vadd.s32 19, %v2351_v45  ;;  %v2669_v0 = vmul.u32 18, %v2668_v36  ;;  %v2682_v35 = vmul.u32 58254, %v2677_v49 }
 0x23e   : > { %v2272_v24 = vadd.f32 %v5200_v39, %v2024_v57  ;;  %4023 = vmatmul.msk.bf16.gmra.mxu2 %vm253_vm1, %v5126_v18  ;;  %v5282_v39 = vsel %vm3535_vm2, %v3571_v23, %v2641_v63  ;;  %v2683_v11 = vshll.u32 %v2680_v20, 16  ;;  %v2685_v38 = vshll.u32 %v5263_v14, 16 }
 0x23f   : > { %4061 = vmatmul.msk.bf16.gmra.mxu0 %vm253_vm1, %v2102_v51  ;;  %v5285_v60 = vpack.c.bf16 %v1586_v50, %v1585_v29  ;;  %v2708_v51 = vmul.u32 14564, %v2705_v34  ;;  %v2670_v47 = vsub.s32 %v5124_v33, %v2669_v0  ;;  %4044 = vmatmul.msk.bf16.gmra.mxu3 %vm253_vm1, %v1856_v30  ;;  %v2684_v8 = vshrl.u32 %v2680_v20, 16 }
 0x240   : > { %v2308_v42 = vmax.f32 %v2272_v24, 0.0  ;;  %vm2687_vm4 = vc.u32 %v2679_v21, %v2683_v11  ;;  %v2689_v37 = vadd.s32 %v2683_v11, %v2679_v21  ;;  %v5290_v54 = vmul.u32 58254, %v2705_v34  ;;  %v5302_v21 = vld [vmem:[%s4263_s5 + $0xf6] sm:$0xff] }
 0x241   : > { %v1696_v40 = vpop.f32.mrf.mxu2  ;;  %v2688_v49 = vsel %vm2687_vm4, 1, %v5879_v6  ;;  %vm3464_vm5 = vcmp.ne.s32.totalorder %v2670_v47, 0  ;;  %vm3500_vm6 = vcmp.lt.s32.totalorder %v2670_v47, 0  ;;  %vm3643_vm7 = vcmp.ge.s32.totalorder %v5282_v39, 1 }
 0x242   : > { %v3749_v45 = vsel %vm3713_vm3, %v2308_v42, 0.0  ;;  %v1777_v5 = vadd.f32 %v1696_v40, %v1529_v41  ;;  %v1450_v13 = vpop.f32.mrf.mxu1  ;;  %vm5295_vm8 = vmand %vm3500_vm6, %vm3464_vm5  ;;  %v3572_v41 = vadd.s32 18, %v2670_v47  ;;  %v2690_v23 = vadd.s32 %v2688_v49, %v2682_v35  ;;  %v5299_v36 = vpop.f32.mrf.mxu3 }
 0x243   : > { %v3784_v63 = vadd.f32 %v3783_v28, %v3749_v45  ;;  %v1530_v15 = vadd.f32 %v1450_v13, %v4606_v44  ;;  %vm2691_vm9 = vc.u32 %v2689_v37, %v2685_v38  ;;  %v5305_v28 = vld [vmem:[%s4263_s5 + $0xfe] sm:$0xff]  ;;  %vm3679_vm10 = vcmp.le.s32.totalorder %v5282_v39, 16 }
 0x244   : > { %v2194_v57 = vpop.f32.mrf.mxu0  ;;  %v2025_v33 = vadd.f32 %v5117_v48, %v1777_v5  ;;  %v2692_v44 = vsel %vm2691_vm9, 1, %v5879_v6  ;;  %v5309_v48 = vmul.u32 14564, %v2706_v16  ;;  %v2712_v20 = vshll.u32 %v5290_v54, 16  ;;  %vm3715_vm0 = vmand %vm3643_vm7, %vm3679_vm10 }
 0x245   : > { %v2686_v50 = vshrl.u32 %v5263_v14, 16  ;;  %v2694_v24 = vadd.s32 %v2692_v44, %v2690_v23  ;;  %v2711_v34 = vmul.u32 58254, %v2706_v16  ;;  %v5319_v0 = vsel %vm5295_vm8, %v3572_v41, %v2670_v47  ;;  %v1587_v44 = vld [vmem:[%s4263_s5 + $0x104] sm:$0xff] }
 0x246   : > { %v2273_v29 = vadd.f32 %v2192_v27, %v2025_v33  ;;  %v2104_v35 = vpack.c.bf16 %v5305_v28, %v5302_v21  ;;  %v2713_v11 = vshrl.u32 %v5290_v54, 16  ;;  %v2714_v27 = vshll.u32 %v5309_v48, 16  ;;  %v1835_v33 = vld [vmem:[%s4263_s5 + $0x105] sm:$0xff] }
 0x247   : > { %v2695_v16 = vadd.s32 %v2694_v24, %v2684_v8  ;;  %vm2716_vm12 = vc.u32 %v2708_v51, %v2712_v20  ;;  %v2718_v42 = vadd.s32 %v2712_v20, %v2708_v51  ;;  %v2715_v17 = vshrl.u32 %v5309_v48, 16  ;;  %v1836_v8 = vld [vmem:[%s4263_s5 + $0x10d] sm:$0xff] }
 0x248   : > { %v2309_v14 = vmax.f32 %v2273_v29, 0.0  ;;  %v2717_v40 = vsel %vm2716_vm12, 1, %v5879_v6  ;;  %v2734_v47 = vand.u32 65535, %v5276_v58  ;;  %v2735_v37 = vshrl.u32 %v5276_v58, 16  ;;  %v1588_v48 = vld [vmem:[%s4263_s5 + $0x10c] sm:$0xff] }
 0x249   : > { %v1698_v38 = vpop.f32.mrf.mxu2  ;;  %v2696_v49 = vadd.s32 %v2695_v16, %v2686_v50  ;;  %v2719_v54 = vadd.s32 %v2717_v40, %v2711_v34  ;;  %vm2720_vm13 = vc.u32 %v2718_v42, %v2714_v27  ;;  %vm3644_vm14 = vcmp.ge.s32.totalorder %v5319_v0, 1 }
 0x24a   : > { %v3750_v45 = vsel %vm3714_vm11, %v2309_v14, 0.0  ;;  %v1778_v5 = vadd.f32 %v1698_v38, %v1530_v15  ;;  %v1453_v13 = vpop.f32.mrf.mxu1  ;;  %v2737_v23 = vmul.u32 14564, %v2734_v47  ;;  %vm3680_vm15 = vcmp.le.s32.totalorder %v5319_v0, 16  ;;  %v5338_v50 = vpop.f32.mrf.mxu3 }
 0x24b   : > { %v3785_v30 = vadd.f32 %v3784_v63, %v3750_v45  ;;  %v1531_v51 = vadd.f32 %v1453_v13, %v4613_v32  ;;  %v2697_v15 = vshrl.u32 %v2696_v49, 4  ;;  %v2721_v29 = vsel %vm2720_vm13, 1, %v5879_v6  ;;  %vm3716_vm8 = vmand %vm3644_vm14, %vm3680_vm15 }
 0x24c   : > { %v2197_v41 = vpop.f32.mrf.mxu0  ;;  %v2026_v20 = vadd.f32 %v5169_v61, %v1778_v5  ;;  %v2738_v24 = vmul.u32 58254, %v2734_v47  ;;  %v2723_v32 = vadd.s32 %v2721_v29, %v2719_v54  ;;  %v1857_v63 = vpack.c.bf16 %v1836_v8, %v1835_v33 }
 0x24d   : > { %4005 = vmatmul.msk.bf16.gmra.mxu1 %vm253_vm1, %v5126_v18  ;;  %v5342_v34 = vmul.u32 14564, %v2735_v37  ;;  %v2740_v27 = vmul.u32 58254, %v2735_v37  ;;  %v2698_v61 = vmul.u32 18, %v2697_v15  ;;  %v5350_v42 = vpack.c.bf16 %v1588_v48, %v1587_v44  ;;  %v5368_v44 = vld [vmem:[%s4263_s5 + $0x10e] sm:$0xff] }
 0x24e   : > { %v2274_v14 = vadd.f32 %v2194_v57, %v2026_v20  ;;  %4024 = vmatmul.msk.bf16.gmra.mxu2 %vm253_vm1, %v5234_v52  ;;  %v2741_v16 = vshll.u32 %v2738_v24, 16  ;;  %v2724_v18 = vadd.s32 %v2723_v32, %v2713_v11  ;;  %v2742_v38 = vshrl.u32 %v2738_v24, 16  ;;  %v1837_v24 = vld [vmem:[%s4263_s5 + $0x115] sm:$0xff]  ;;  %v1838_v32 = vld [vmem:[%s4263_s5 + $0x11d] sm:$0xff] }
 0x24f   : > { %4062 = vmatmul.msk.bf16.gmra.mxu0 %vm253_vm1, %v2103_v19  ;;  %v2743_v57 = vshll.u32 %v5342_v34, 16  ;;  %v2744_v40 = vshrl.u32 %v5342_v34, 16  ;;  %v2699_v55 = vsub.s32 %v5237_v3, %v2698_v61  ;;  %4045 = vmatmul.msk.bf16.gmra.mxu3 %vm253_vm1, %v1857_v63  ;;  %v2352_v11 = vadd.s32 96, %v4802_v59 }
 0x250   : > { %v2310_v47 = vmax.f32 %v2274_v14, 0.0  ;;  %vm2745_vm2 = vc.u32 %v2737_v23, %v2741_v16  ;;  %v2747_v2 = vadd.s32 %v2741_v16, %v2737_v23  ;;  %v2725_v37 = vadd.s32 %v2724_v18, %v2715_v17  ;;  %v5365_v23 = vld [vmem:[%s4263_s5 + $0x106] sm:$0xff] }
 0x251   : > { %v1701_v19 = vpop.f32.mrf.mxu2  ;;  %v2746_v39 = vsel %vm2745_vm2, 1, %v5879_v6  ;;  %v2353_v45 = vadd.s32 104, %v4802_v59  ;;  %vm3465_vm3 = vcmp.ne.s32.totalorder %v2699_v55, 0  ;;  %vm3501_vm4 = vcmp.lt.s32.totalorder %v2699_v55, 0 }
 0x252   : > { %v3751_v5 = vsel %vm3715_vm0, %v2310_v47, 0.0  ;;  %v1779_v13 = vadd.f32 %v1701_v19, %v1531_v51  ;;  %v1455_v49 = vpop.f32.mrf.mxu1  ;;  %vm3537_vm5 = vmand %vm3501_vm4, %vm3465_vm3  ;;  %v3573_v33 = vadd.s32 18, %v2699_v55  ;;  %v2726_v8 = vshrl.u32 %v2725_v37, 4  ;;  %v5371_v51 = vpop.f32.mrf.mxu3 }
 0x253   : > { %v3786_v3 = vadd.f32 %v3785_v30, %v3751_v5  ;;  %v1532_v54 = vadd.f32 %v1455_v49, %v4626_v12  ;;  %v2748_v20 = vadd.s32 %v2746_v39, %v2740_v27  ;;  %vm2749_vm6 = vc.u32 %v2747_v2, %v2743_v57 }
 0x254   : > { %v2199_v17 = vpop.f32.mrf.mxu0  ;;  %v2027_v48 = vadd.f32 %v5204_v10, %v1779_v13  ;;  %v5373_v15 = vadd.s32 19, %v2352_v11  ;;  %v3609_v30 = vsel %vm3537_vm5, %v3573_v33, %v2699_v55  ;;  %v2727_v29 = vmul.u32 18, %v2726_v8 }
 0x255   : > { %v2750_v12 = vsel %vm2749_vm6, 1, %v5879_v6  ;;  %v5378_v63 = vadd.s32 19, %v2353_v45  ;;  %vm3645_vm7 = vcmp.ge.s32.totalorder %v3609_v30, 1  ;;  %v2105_v10 = vpack.c.bf16 %v5368_v44, %v5365_v23 }
 0x256   : > { %v2275_v34 = vadd.f32 %v2197_v41, %v2027_v48  ;;  %v2752_v14 = vadd.s32 %v2750_v12, %v2748_v20  ;;  %vm3681_vm9 = vcmp.le.s32.totalorder %v3609_v30, 16  ;;  %v2728_v27 = vsub.s32 %v5253_v7, %v2727_v29 }
 0x257   : > { %v2763_v61 = vand.u32 65535, %v5373_v15  ;;  %v2764_v16 = vshrl.u32 %v5373_v15, 16  ;;  %v1858_v41 = vpack.c.bf16 %v1838_v32, %v1837_v24  ;;  %v2792_v47 = vand.u32 65535, %v5378_v63  ;;  %vm3717_vm15 = vmand %vm3645_vm7, %vm3681_vm9 }
 0x258   : > { %v2311_v18 = vmax.f32 %v2275_v34, 0.0  ;;  %v2753_v57 = vadd.s32 %v2752_v14, %v2742_v38  ;;  %vm3466_vm10 = vcmp.ne.s32.totalorder %v2728_v27, 0  ;;  %vm3502_vm11 = vcmp.lt.s32.totalorder %v2728_v27, 0 }
 0x259   : > { %v1703_v55 = vpop.f32.mrf.mxu2  ;;  %v3574_v2 = vadd.s32 18, %v2728_v27  ;;  %v2766_v19 = vmul.u32 14564, %v2763_v61  ;;  %vm3538_vm12 = vmand %vm3502_vm11, %vm3466_vm10  ;;  %v2767_v7 = vmul.u32 58254, %v2763_v61  ;;  %v5391_v38 = vmul.u32 14564, %v2764_v16 }
 0x25a   : > { %v3752_v37 = vsel %vm3716_vm8, %v2311_v18, 0.0  ;;  %v1780_v0 = vadd.f32 %v1703_v55, %v1532_v54  ;;  %v1458_v39 = vpop.f32.mrf.mxu1  ;;  %v2754_v11 = vadd.s32 %v2753_v57, %v2744_v40  ;;  %v2793_v48 = vshrl.u32 %v5378_v63, 16  ;;  %v5405_v12 = vpop.f32.mrf.mxu3 }
 0x25b   : > { %v3787_v45 = vadd.f32 %v3786_v3, %v3752_v37  ;;  %v1533_v5 = vadd.f32 %v1458_v39, %v4633_v31  ;;  %v3610_v49 = vsel %vm3538_vm12, %v3574_v2, %v2728_v27  ;;  %v2769_v54 = vmul.u32 58254, %v2764_v16 }
 0x25c   : > { %v2202_v13 = vpop.f32.mrf.mxu0  ;;  %v2028_v33 = vadd.f32 %v5259_v25, %v1780_v0  ;;  %vm3646_vm13 = vcmp.ge.s32.totalorder %v3610_v49, 1  ;;  %v2755_v8 = vshrl.u32 %v2754_v11, 4  ;;  %vm3682_vm14 = vcmp.le.s32.totalorder %v3610_v49, 16 }
 0x25d   : > { %4006 = vmatmul.msk.bf16.gmra.mxu1 %vm253_vm1, %v5234_v52  ;;  %v2770_v40 = vshll.u32 %v2767_v7, 16  ;;  %v2772_v3 = vshll.u32 %v5391_v38, 16  ;;  %v2771_v25 = vshrl.u32 %v2767_v7, 16  ;;  %v2773_v29 = vshrl.u32 %v5391_v38, 16  ;;  %vm3718_vm8 = vmand %vm3646_vm13, %vm3682_vm14 }
 0x25e   : > { %v2276_v20 = vadd.f32 %v2199_v17, %v2028_v33  ;;  %4025 = vmatmul.msk.bf16.gmra.mxu2 %vm253_vm1, %v5285_v60  ;;  %v2756_v31 = vmul.u32 18, %v2755_v8  ;;  %v2795_v17 = vmul.u32 14564, %v2792_v47  ;;  %v5409_v24 = vmul.u32 58254, %v2792_v47 }
 0x25f   : > { %4063 = vmatmul.msk.bf16.gmra.mxu0 %vm253_vm1, %v2104_v35  ;;  %vm2774_vm0 = vc.u32 %v2766_v19, %v2770_v40  ;;  %v2776_v52 = vadd.s32 %v2770_v40, %v2766_v19  ;;  %v5413_v28 = vmul.u32 14564, %v2793_v48  ;;  %4046 = vmatmul.msk.bf16.gmra.mxu3 %vm253_vm1, %v1858_v41  ;;  %v2798_v30 = vmul.u32 58254, %v2793_v48  ;;  %v1589_v19 = vld [vmem:[%s4263_s5 + $0x114] sm:$0xff]  ;;  %v1590_v41 = vld [vmem:[%s4263_s5 + $0x11c] sm:$0xff] }
 0x260   : > { %v2312_v32 = vmax.f32 %v2276_v20, 0.0  ;;  %v2757_v34 = vsub.s32 %v5276_v58, %v2756_v31  ;;  %v2775_v21 = vsel %vm2774_vm0, 1, %v5879_v6  ;;  %v2799_v27 = vshll.u32 %v5409_v24, 16  ;;  %v5431_v48 = vld [vmem:[%s4263_s5 + $0x11e] sm:$0xff] }
 0x261   : > { %v1706_v35 = vpop.f32.mrf.mxu2  ;;  %v2777_v14 = vadd.s32 %v2775_v21, %v2769_v54  ;;  %vm2778_vm2 = vc.u32 %v2776_v52, %v2772_v3  ;;  %v2800_v39 = vshrl.u32 %v5409_v24, 16  ;;  %v2801_v11 = vshll.u32 %v5413_v28, 16  ;;  %v1840_v54 = vld [vmem:[%s4263_s5 + $0x12d] sm:$0xff] }
 0x262   : > { %v3753_v61 = vsel %vm3717_vm15, %v2312_v32, 0.0  ;;  %v1781_v16 = vadd.f32 %v1706_v35, %v1533_v5  ;;  %v1460_v18 = vpop.f32.mrf.mxu1  ;;  %vm3467_vm3 = vcmp.ne.s32.totalorder %v2757_v34, 0  ;;  %vm3503_vm4 = vcmp.lt.s32.totalorder %v2757_v34, 0  ;;  %v5426_v5 = vld [vmem:[%s4263_s5 + $0x116] sm:$0xff]  ;;  %v5440_v52 = vpop.f32.mrf.mxu3 }
 0x263   : > { %v3788_v58 = vadd.f32 %v3787_v45, %v3753_v61  ;;  %v1534_v57 = vadd.f32 %v1460_v18, %v4647_v56  ;;  %vm3539_vm5 = vmand %vm3503_vm4, %vm3467_vm3  ;;  %v3575_v55 = vadd.s32 18, %v2757_v34  ;;  %v2779_v2 = vsel %vm2778_vm2, 1, %v5879_v6 }
 0x264   : > { %v2204_v47 = vpop.f32.mrf.mxu0  ;;  %v2029_v37 = vadd.f32 %v5299_v36, %v1781_v16  ;;  %v2781_v0 = vadd.s32 %v2779_v2, %v2777_v14  ;;  %v2802_v56 = vshrl.u32 %v5413_v28, 16  ;;  %vm2803_vm6 = vc.u32 %v2795_v17, %v2799_v27  ;;  %v1839_v36 = vld [vmem:[%s4263_s5 + $0x125] sm:$0xff] }
 0x265   : > { %v3611_v7 = vsel %vm3539_vm5, %v3575_v55, %v2757_v34  ;;  %v2805_v45 = vadd.s32 %v2799_v27, %v2795_v17  ;;  %v5428_v8 = vpack.c.bf16 %v1590_v41, %v1589_v19  ;;  %v2804_v40 = vsel %vm2803_vm6, 1, %v5879_v6 }
 0x266   : > { %v2277_v38 = vadd.f32 %v2202_v13, %v2029_v37  ;;  %vm3647_vm7 = vcmp.ge.s32.totalorder %v3611_v7, 1  ;;  %v2782_v33 = vadd.s32 %v2781_v0, %v2771_v25  ;;  %vm3683_vm9 = vcmp.le.s32.totalorder %v3611_v7, 16 }
 0x267   : > { %vm2807_vm10 = vc.u32 %v2805_v45, %v2801_v11  ;;  %v2354_v3 = vadd.s32 112, %v4802_v59  ;;  %v2806_v13 = vadd.s32 %v2804_v40, %v2798_v30  ;;  %v2106_v24 = vpack.c.bf16 %v5431_v48, %v5426_v5  ;;  %vm5469_vm11 = vmand %vm3647_vm7, %vm3683_vm9 }
 0x268   : > { %v2313_v20 = vmax.f32 %v2277_v38, 0.0  ;;  %v2783_v31 = vadd.s32 %v2782_v33, %v2773_v29  ;;  %v2808_v25 = vsel %vm2807_vm10, 1, %v5879_v6  ;;  %v1859_v49 = vpack.c.bf16 %v1840_v54, %v1839_v36 }
 0x269   : > { %v1708_v17 = vpop.f32.mrf.mxu2  ;;  %v5444_v32 = vadd.s32 19, %v2354_v3  ;;  %v2355_v34 = vadd.s32 120, %v4802_v59  ;;  %v2810_v27 = vadd.s32 %v2808_v25, %v2806_v13 }
 0x26a   : > { %v3754_v21 = vsel %vm3718_vm8, %v2313_v20, 0.0  ;;  %v1782_v28 = vadd.f32 %v1708_v17, %v1534_v57  ;;  %v1463_v35 = vpop.f32.mrf.mxu1  ;;  %v2784_v14 = vshrl.u32 %v2783_v31, 4  ;;  %v5480_v31 = vpop.f32.mrf.mxu3 }
 0x26b   : > { %v3789_v29 = vadd.f32 %v3788_v58, %v3754_v21  ;;  %v1535_v30 = vadd.f32 %v1463_v35, %v4653_v62  ;;  %v2821_v16 = vand.u32 65535, %v5444_v32  ;;  %v2822_v18 = vshrl.u32 %v5444_v32, 16 }
 0x26c   : > { %v2207_v61 = vpop.f32.mrf.mxu0  ;;  %v2030_v55 = vadd.f32 %v5338_v50, %v1782_v28  ;;  %v2785_v2 = vmul.u32 18, %v2784_v14  ;;  %v2811_v19 = vadd.s32 %v2810_v27, %v2800_v39  ;;  %v5451_v41 = vadd.s32 19, %v2355_v34 }
 0x26d   : > { %4007 = vmatmul.msk.bf16.gmra.mxu1 %vm253_vm1, %v5285_v60  ;;  %v2824_v57 = vmul.u32 14564, %v2821_v16  ;;  %v2825_v37 = vmul.u32 58254, %v2821_v16  ;;  %v5455_v0 = vmul.u32 14564, %v2822_v18  ;;  %v5458_v62 = vadd.s32 128, %v4802_v59 }
 0x26e   : > { %v2278_v58 = vadd.f32 %v2204_v47, %v2030_v55  ;;  %4026 = vmatmul.msk.bf16.gmra.mxu2 %vm253_vm1, %v5350_v42  ;;  %v2786_v50 = vsub.s32 %v5373_v15, %v2785_v2  ;;  %v2812_v39 = vadd.s32 %v2811_v19, %v2802_v56  ;;  %v2827_v60 = vmul.u32 58254, %v2822_v18 }
 0x26f   : > { %4064 = vmatmul.msk.bf16.gmra.mxu0 %vm253_vm1, %v2105_v10  ;;  %v2828_v45 = vshll.u32 %v2825_v37, 16  ;;  %v2829_v47 = vshrl.u32 %v2825_v37, 16  ;;  %v2830_v38 = vshll.u32 %v5455_v0, 16  ;;  %v2850_v33 = vand.u32 65535, %v5451_v41  ;;  %4047 = vmatmul.msk.bf16.gmra.mxu3 %vm253_vm1, %v1859_v49 }
 0x270   : > { %v2314_v36 = vmax.f32 %v2278_v58, 0.0  ;;  %vm3468_vm12 = vcmp.ne.s32.totalorder %v2786_v50, 0  ;;  %vm3504_vm13 = vcmp.lt.s32.totalorder %v2786_v50, 0  ;;  %v3576_v23 = vadd.s32 18, %v2786_v50 }
 0x271   : > { %v1711_v44 = vpop.f32.mrf.mxu2  ;;  %vm3540_vm14 = vmand %vm3504_vm13, %vm3468_vm12  ;;  %v2813_v15 = vshrl.u32 %v2812_v39, 4  ;;  %vm2832_vm15 = vc.u32 %v2824_v57, %v2828_v45  ;;  %v2834_v10 = vadd.s32 %v2828_v45, %v2824_v57  ;;  %v2851_v7 = vshrl.u32 %v5451_v41, 16 }
 0x272   : > { %v3755_v56 = vsel %vm5469_vm11, %v2314_v36, 0.0  ;;  %v1783_v54 = vadd.f32 %v1711_v44, %v1535_v30  ;;  %v3612_v40 = vsel %vm3540_vm14, %v3576_v23, %v2786_v50  ;;  %v1465_v3 = vpop.f32.mrf.mxu1  ;;  %v2833_v20 = vsel %vm2832_vm15, 1, %v5879_v6  ;;  %v5498_v50 = vld [vmem:[%s4263_s5 + $0x124] sm:$0xff]  ;;  %v1841_v36 = vld [vmem:[%s4263_s5 + $0x135] sm:$0xff] }
 0x273   : > { %v3790_v13 = vadd.f32 %v3789_v29, %v3755_v56  ;;  %vm3648_vm0 = vcmp.ge.s32.totalorder %v3612_v40, 1  ;;  %vm3684_vm2 = vcmp.le.s32.totalorder %v3612_v40, 16  ;;  %v1536_v25 = vadd.f32 %v1465_v3, %v4664_v9  ;;  %v5513_v40 = vld [vmem:[%s4263_s5 + $0x126] sm:$0xff]  ;;  %v5516_v3 = vld [vmem:[%s4263_s5 + $0x12e] sm:$0xff] }
 0x274   : > { %v2209_v17 = vpop.f32.mrf.mxu0  ;;  %v2031_v49 = vadd.f32 %v5371_v51, %v1783_v54  ;;  %v2814_v34 = vmul.u32 18, %v2813_v15  ;;  %v2835_v21 = vadd.s32 %v2833_v20, %v2827_v60  ;;  %vm2836_vm3 = vc.u32 %v2834_v10, %v2830_v38  ;;  %vm5491_vm4 = vmand %vm3648_vm0, %vm3684_vm2  ;;  %v5510_v54 = vpop.f32.mrf.mxu3 }
 0x275   : > { %v2837_v28 = vsel %vm2836_vm3, 1, %v5879_v6  ;;  %v2853_v35 = vmul.u32 14564, %v2850_v33  ;;  %v2854_v14 = vmul.u32 58254, %v2850_v33  ;;  %v5485_v27 = vmul.u32 14564, %v2851_v7  ;;  %v5504_v33 = vld [vmem:[%s4263_s5 + $0x12c] sm:$0xff] }
 0x276   : > { %v2279_v30 = vadd.f32 %v2207_v61, %v2031_v49  ;;  %v2815_v16 = vsub.s32 %v5378_v63, %v2814_v34  ;;  %v2831_v29 = vshrl.u32 %v5455_v0, 16  ;;  %v2839_v18 = vadd.s32 %v2837_v28, %v2835_v21 }
 0x277   : > { %v2856_v51 = vmul.u32 58254, %v2851_v7  ;;  %v2857_v55 = vshll.u32 %v2854_v14, 16  ;;  %v2858_v2 = vshrl.u32 %v2854_v14, 16  ;;  %v2859_v19 = vshll.u32 %v5485_v27, 16 }
 0x278   : > { %v2315_v57 = vmax.f32 %v2279_v30, 0.0  ;;  %vm3469_vm5 = vcmp.ne.s32.totalorder %v2815_v16, 0  ;;  %vm3505_vm6 = vcmp.lt.s32.totalorder %v2815_v16, 0  ;;  %v3577_v63 = vadd.s32 18, %v2815_v16 }
 0x279   : > { %v1713_v61 = vpop.f32.mrf.mxu2  ;;  %vm3541_vm7 = vmand %vm3505_vm6, %vm3469_vm5  ;;  %v2840_v37 = vadd.s32 %v2839_v18, %v2829_v47  ;;  %v2860_v0 = vshrl.u32 %v5485_v27, 16  ;;  %vm2861_vm8 = vc.u32 %v2853_v35, %v2857_v55  ;;  %v2863_v58 = vadd.s32 %v2857_v55, %v2853_v35  ;;  %v1842_v47 = vld [vmem:[%s4263_s5 + $0x13d] sm:$0x3f] }
 0x27a   : > { %v3756_v39 = vsel %vm5491_vm4, %v2315_v57, 0.0  ;;  %v1784_v60 = vadd.f32 %v1713_v61, %v1536_v25  ;;  %v3613_v11 = vsel %vm3541_vm7, %v3577_v63, %v2815_v16  ;;  %v1468_v45 = vpop.f32.mrf.mxu1  ;;  %v2862_v38 = vsel %vm2861_vm8, 1, %v5879_v6 }
 0x27b   : > { %v3791_v23 = vadd.f32 %v3790_v13, %v3756_v39  ;;  %vm3649_vm9 = vcmp.ge.s32.totalorder %v3613_v11, 1  ;;  %vm3685_vm10 = vcmp.le.s32.totalorder %v3613_v11, 16  ;;  %v1537_v44 = vadd.f32 %v1468_v45, %v4670_v53 }
 0x27c   : > { %v2212_v15 = vpop.f32.mrf.mxu0  ;;  %v2032_v10 = vadd.f32 %v5405_v12, %v1784_v60  ;;  %v2841_v7 = vadd.s32 %v2840_v37, %v2831_v29  ;;  %v2864_v56 = vadd.s32 %v2862_v38, %v2856_v51  ;;  %vm2865_vm11 = vc.u32 %v2863_v58, %v2859_v19  ;;  %vm3721_vm12 = vmand %vm3649_vm9, %vm3685_vm10 }
 0x27d   : > { %4008 = vmatmul.msk.bf16.gmra.mxu1 %vm253_vm1, %v5350_v42  ;;  %v2866_v20 = vsel %vm2865_vm11, 1, %v5879_v6  ;;  %v1611_v53 = vpack.c.bf16 %v5504_v33, %v5498_v50  ;;  %v5524_v13 = vadd.s32 19, %v5458_v62  ;;  %v1860_v12 = vpack.c.bf16 %v1842_v47, %v1841_v36  ;;  %v5553_v36 = vpop.f32.mrf.mxu3  ;;  %v5556_v47 = vld [vmem:[%s4263_s5 + $0x12c] sm:$0x3f] }
 0x27e   : > { %v2280_v25 = vadd.f32 %v2209_v17, %v2032_v10  ;;  %4027 = vmatmul.msk.bf16.gmra.mxu2 %vm253_vm1, %v5428_v8  ;;  %v2842_v49 = vshrl.u32 %v2841_v7, 4  ;;  %v2868_v42 = vadd.s32 %v2866_v20, %v2864_v56  ;;  %v2357_v34 = vadd.s32 136, %v4802_v59 }
 0x27f   : > { %4065 = vmatmul.msk.bf16.gmra.mxu0 %vm253_vm1, %v2106_v24  ;;  %v2107_v62 = vpack.c.bf16 %v5516_v3, %v5513_v40  ;;  %v2879_v17 = vand.u32 65535, %v5524_v13  ;;  %v2880_v21 = vshrl.u32 %v5524_v13, 16  ;;  %v5540_v28 = vadd.s32 144, %v4802_v59  ;;  %4048 = vmatmul.msk.bf16.gmra.mxu3 %vm253_vm1, %v1860_v12 }
 0x280   : > { %v2316_v5 = vmax.f32 %v2280_v25, 0.0  ;;  %v2843_v48 = vmul.u32 18, %v2842_v49  ;;  %v2869_v24 = vadd.s32 %v2868_v42, %v2858_v2  ;;  %v5542_v35 = vadd.s32 19, %v2357_v34 }
 0x281   : > { %v1716_v14 = vpop.f32.mrf.mxu2  ;;  %v2882_v27 = vmul.u32 14564, %v2879_v17  ;;  %v2883_v30 = vmul.u32 58254, %v2879_v17  ;;  %v5544_v16 = vmul.u32 14564, %v2880_v21  ;;  %v2885_v29 = vmul.u32 58254, %v2880_v21 }
 0x282   : > { %v3757_v18 = vsel %vm3721_vm12, %v2316_v5, 0.0  ;;  %v1785_v9 = vadd.f32 %v1716_v14, %v1537_v44  ;;  %v2844_v51 = vsub.s32 %v5444_v32, %v2843_v48  ;;  %v1470_v55 = vpop.f32.mrf.mxu1  ;;  %v2870_v19 = vadd.s32 %v2869_v24, %v2860_v0  ;;  %v5573_v24 = vld [vmem:[%s4263_s5 + $0x136] sm:$0xff]  ;;  %v5576_v14 = vld [vmem:[%s4263_s5 + $0x13e] sm:$0x3f] }
 0x283   : > { %v3792_v57 = vadd.f32 %v3791_v23, %v3757_v18  ;;  %v1538_v63 = vadd.f32 %v1470_v55, %v4681_v26  ;;  %v2886_v61 = vshll.u32 %v2883_v30, 16  ;;  %v2887_v37 = vshrl.u32 %v2883_v30, 16  ;;  %v5562_v23 = vld [vmem:[%s4263_s5 + $0x13c] sm:$0x3f] }
 0x284   : > { %v2214_v2 = vpop.f32.mrf.mxu0  ;;  %v2033_v58 = vadd.f32 %v5440_v52, %v1785_v9  ;;  %vm3470_vm13 = vcmp.ne.s32.totalorder %v2844_v51, 0  ;;  %vm3506_vm14 = vcmp.lt.s32.totalorder %v2844_v51, 0  ;;  %v3578_v39 = vadd.s32 18, %v2844_v51  ;;  %v5559_v52 = vld [vmem:[%s4263_s5 + $0x134] sm:$0xff]  ;;  %s4128_s5 = sshra.s32 %s3839_s3, 4  ;;  %s4129_s5 = int_to_ptr.hbm [resolvable:$true] %s4128_s5 }
 0x285   : > { %vm3542_vm15 = vmand %vm3506_vm14, %vm3470_vm13  ;;  %v2871_v60 = vshrl.u32 %v2870_v19, 4  ;;  %v2888_v32 = vshll.u32 %v5544_v16, 16  ;;  %v2889_v0 = vshrl.u32 %v5544_v16, 16  ;;  %vm2890_vm0 = vc.u32 %v2882_v27, %v2886_v61  ;;  %s4130_s6 = scalar_lea.hbm %s4129_s5, 1  ;;  %p4135_p0 = scmp.lt.s32.totalorder %s4129_s5, %s5862_s2 }
 0x286   : > { %v2281_v11 = vadd.f32 %v2212_v15, %v2033_v58  ;;  %v3614_v26 = vsel %vm3542_vm15, %v3578_v39, %v2844_v51  ;;  %v2891_v45 = vsel %vm2890_vm0, 1, %v5879_v6  ;;  %v2892_v38 = vadd.s32 %v2886_v61, %v2882_v27  ;;  %v5592_v39 = vpop.f32.mrf.mxu3  ;;  %p4131_p11 = scmp.ne.s32.totalorder %s4129_s5, %s4130_s6  ;;  %p4136_p1 = scmp.lt.s32.totalorder %s4134_s13, %s4130_s6 }
 0x287   : > { %vm3650_vm2 = vcmp.ge.s32.totalorder %v3614_v26, 1  ;;  %vm3686_vm3 = vcmp.le.s32.totalorder %v3614_v26, 16  ;;  %v2872_v44 = vmul.u32 18, %v2871_v60  ;;  %v2893_v10 = vadd.s32 %v2891_v45, %v2885_v29 }
 0x288   : > { %v2317_v7 = vmax.f32 %v2281_v11, 0.0  ;;  %vm3722_vm4 = vmand %vm3650_vm2, %vm3686_vm3  ;;  %vm2894_vm5 = vc.u32 %v2892_v38, %v2888_v32  ;;  %v2908_v15 = vand.u32 65535, %v5542_v35  ;;  %v2909_v56 = vshrl.u32 %v5542_v35, 16  ;;  %p4132_p12 = pnand %p4131_p11, %p4232_p5  ;;  %p4137_p2 = por %p4136_p1, %p4135_p0 }
 0x289   : > { %v1718_v20 = vpop.f32.mrf.mxu2  ;;  %v2873_v12 = vsub.s32 %v5451_v41, %v2872_v44  ;;  %v2895_v25 = vsel %vm2894_vm5, 1, %v5879_v6  ;;  %v1364_v49 = vpack.c.bf16 %v5556_v47, %v5498_v50  ;;  %v1612_v42 = vpack.c.bf16 %v5562_v23, %v5559_v52 }
 0x28a   : > { %v3758_v34 = vsel %vm3722_vm4, %v2317_v7, 0.0  ;;  %v1786_v17 = vadd.f32 %v1718_v20, %v1538_v63  ;;  %v1473_v21 = vpop.f32.mrf.mxu1  ;;  %v2897_v5 = vadd.s32 %v2895_v25, %v2893_v10  ;;  %v2911_v48 = vmul.u32 14564, %v2908_v15  ;;  %p4133_p13 = pneg %p4132_p12 }
 0x28b   : > { %v3793_v27 = vadd.f32 %v3792_v57, %v3758_v34  ;;  %vm3471_vm6 = vcmp.ne.s32.totalorder %v2873_v12, 0  ;;  %vm3507_vm7 = vcmp.lt.s32.totalorder %v2873_v12, 0  ;;  %v3579_v41 = vadd.s32 18, %v2873_v12 }
 0x28c   : > { %v2217_v30 = vpop.f32.mrf.mxu0  ;;  %v2034_v16 = vadd.f32 %v5480_v31, %v1786_v17  ;;  %vm3543_vm8 = vmand %vm3507_vm7, %vm3471_vm6  ;;  %v1539_v29 = vadd.f32 %v1473_v21, %v4687_v46  ;;  %v2898_v18 = vadd.s32 %v2897_v5, %v2887_v37  ;;  %v2912_v9 = vmul.u32 58254, %v2908_v15  ;;  %p4138_p3 = pnand %p4137_p2, %p4133_p13 }
 0x28d   : > { %v3615_v51 = vsel %vm3543_vm8, %v3579_v41, %v2873_v12  ;;  %4009 = vmatmul.msk.bf16.gmra.mxu1 %vm253_vm1, %v5428_v8  ;;  %v2913_v55 = vmul.u32 14564, %v2909_v56  ;;  %v2914_v19 = vmul.u32 58254, %v2909_v56  ;;  %v2108_v57 = vpack.c.bf16 %v5576_v14, %v5573_v24 }
 0x28e   : > { %v2282_v63 = vadd.f32 %v2214_v2, %v2034_v16  ;;  %vm3651_vm9 = vcmp.ge.s32.totalorder %v3615_v51, 1  ;;  %vm3687_vm10 = vcmp.le.s32.totalorder %v3615_v51, 16  ;;  %4028 = vmatmul.msk.bf16.gmra.mxu2 %vm253_vm1, %v1611_v53  ;;  %v2899_v46 = vadd.s32 %v2898_v18, %v2889_v0 }
 0x28f   : > { %4066 = vmatmul.msk.bf16.gmra.mxu0 %vm253_vm1, %v2107_v62  ;;  %vm3723_vm11 = vmand %vm3651_vm9, %vm3687_vm10  ;;  %v2915_v8 = vshll.u32 %v2912_v9, 16  ;;  %v2916_v31 = vshrl.u32 %v2912_v9, 16  ;;  %v2917_v61 = vshll.u32 %v2913_v55, 16  ;;  %v2918_v37 = vshrl.u32 %v2913_v55, 16 }
 0x290   : > { %v2318_v58 = vmax.f32 %v2282_v63, 0.0  ;;  %v2900_v2 = vshrl.u32 %v2899_v46, 4  ;;  %v5595_v60 = vadd.s32 19, %v5540_v28  ;;  %v2359_v33 = vadd.s32 152, %v4802_v59 }
 0x291   : > { %v1721_v53 = vpop.f32.mrf.mxu2  ;;  %vm2919_vm12 = vc.u32 %v2911_v48, %v2915_v8  ;;  %v2921_v40 = vadd.s32 %v2915_v8, %v2911_v48  ;;  %v2360_v3 = vadd.s32 160, %v4802_v59  ;;  %v5600_v62 = vadd.s32 168, %v4802_v59  ;;  %v5618_v8 = vpop.f32.mrf.mxu3 }
 0x292   : > { %v3759_v32 = vsel %vm3723_vm11, %v2318_v58, 0.0  ;;  %v1787_v0 = vadd.f32 %v1721_v53, %v1539_v29  ;;  %v2901_v11 = vmul.u32 18, %v2900_v2  ;;  %v1475_v26 = vpop.f32.mrf.mxu1  ;;  %v2920_v45 = vsel %vm2919_vm12, 1, %v5879_v6 }
 0x293   : > { %v3794_v38 = vadd.f32 %v3793_v27, %v3759_v32  ;;  %v1540_v28 = vadd.f32 %v1475_v26, %v4699_v43  ;;  %v2922_v10 = vadd.s32 %v2920_v45, %v2914_v19  ;;  %vm2923_vm13 = vc.u32 %v2921_v40, %v2917_v61 }
 0x294   : > { %v2219_v44 = vpop.f32.mrf.mxu0  ;;  %v2035_v7 = vadd.f32 %v5510_v54, %v1787_v0  ;;  %v2902_v15 = vsub.s32 %v5524_v13, %v2901_v11  ;;  %v2924_v56 = vsel %vm2923_vm13, 1, %v5879_v6  ;;  %v2937_v20 = vand.u32 65535, %v5595_v60 }
 0x295   : > { %v2926_v12 = vadd.s32 %v2924_v56, %v2922_v10  ;;  %v2938_v25 = vshrl.u32 %v5595_v60, 16  ;;  %v5609_v34 = vadd.s32 19, %v2359_v33  ;;  %v5611_v17 = vadd.s32 19, %v2360_v3 }
 0x296   : > { %v2283_v21 = vadd.f32 %v2217_v30, %v2035_v7  ;;  %vm3472_vm14 = vcmp.ne.s32.totalorder %v2902_v15, 0  ;;  %vm3508_vm15 = vcmp.lt.s32.totalorder %v2902_v15, 0  ;;  %v3580_v43 = vadd.s32 18, %v2902_v15 }
 0x297   : > { %vm3544_vm0 = vmand %vm3508_vm15, %vm3472_vm14  ;;  %v2927_v5 = vadd.s32 %v2926_v12, %v2916_v31  ;;  %v2940_v54 = vmul.u32 14564, %v2937_v20  ;;  %v2941_v48 = vmul.u32 58254, %v2937_v20  ;;  %v5613_v13 = vmul.u32 14564, %v2938_v25 }
 0x298   : > { %v2319_v27 = vmax.f32 %v2283_v21, 0.0  ;;  %v3616_v41 = vsel %vm3544_vm0, %v3580_v43, %v2902_v15  ;;  %v2943_v16 = vmul.u32 58254, %v2938_v25  ;;  %v2966_v29 = vand.u32 65535, %v5609_v34 }
 0x299   : > { %vm3652_vm2 = vcmp.ge.s32.totalorder %v3616_v41, 1  ;;  %vm3688_vm3 = vcmp.le.s32.totalorder %v3616_v41, 16  ;;  %v1723_v18 = vpop.f32.mrf.mxu2  ;;  %v2928_v9 = vadd.s32 %v2927_v5, %v2918_v37  ;;  %v2944_v51 = vshll.u32 %v2941_v48, 16  ;;  %v5642_v43 = vpop.f32.mrf.mxu3 }
 0x29a   : > { %vm3724_vm4 = vmand %vm3652_vm2, %vm3688_vm3  ;;  %v1788_v30 = vadd.f32 %v1723_v18, %v1540_v28  ;;  %v1478_v55 = vpop.f32.mrf.mxu1  ;;  %v2945_v19 = vshrl.u32 %v2941_v48, 16  ;;  %v2946_v63 = vshll.u32 %v5613_v13, 16  ;;  %v2947_v46 = vshrl.u32 %v5613_v13, 16 }
 0x29b   : > { %v3760_v31 = vsel %vm3724_vm4, %v2319_v27, 0.0  ;;  %v2929_v61 = vshrl.u32 %v2928_v9, 4  ;;  %v1541_v58 = vadd.f32 %v1478_v55, %v4706_v22  ;;  %vm2948_vm5 = vc.u32 %v2940_v54, %v2944_v51 }
 0x29c   : > { %v2222_v2 = vpop.f32.mrf.mxu0  ;;  %v3795_v33 = vadd.f32 %v3794_v38, %v3760_v31  ;;  %v2036_v37 = vadd.f32 %v5553_v36, %v1788_v30  ;;  %v2949_v53 = vsel %vm2948_vm5, 1, %v5879_v6  ;;  %v2950_v40 = vadd.s32 %v2944_v51, %v2940_v54 }
 0x29d   : > { %v2930_v3 = vmul.u32 18, %v2929_v61  ;;  %4010 = vmatmul.msk.bf16.gmra.mxu1 %vm253_vm1, %v1364_v49  ;;  %v2951_v32 = vadd.s32 %v2949_v53, %v2943_v16  ;;  %v2967_v0 = vshrl.u32 %v5609_v34, 16  ;;  %v2969_v11 = vmul.u32 14564, %v2966_v29 }
 0x29e   : > { %v2284_v26 = vadd.f32 %v2219_v44, %v2036_v37  ;;  %4029 = vmatmul.msk.bf16.gmra.mxu2 %vm253_vm1, %v1612_v42  ;;  %vm2952_vm6 = vc.u32 %v2950_v40, %v2946_v63  ;;  %v2970_v22 = vmul.u32 58254, %v2966_v29  ;;  %v2995_v50 = vand.u32 65535, %v5611_v17 }
 0x29f   : > { %4067 = vmatmul.msk.bf16.gmra.mxu0 %vm253_vm1, %v2108_v57  ;;  %v2931_v36 = vsub.s32 %v5542_v35, %v2930_v3  ;;  %v2953_v47 = vsel %vm2952_vm6, 1, %v5879_v6  ;;  %v2971_v49 = vmul.u32 14564, %v2967_v0  ;;  %v2972_v45 = vmul.u32 58254, %v2967_v0 }
 0x2a0   : > { %v2320_v38 = vmax.f32 %v2284_v26, 0.0  ;;  %v2955_v28 = vadd.s32 %v2953_v47, %v2951_v32  ;;  %v2973_v52 = vshll.u32 %v2970_v22, 16  ;;  %v2974_v23 = vshrl.u32 %v2970_v22, 16 }
 0x2a1   : > { %vm3473_vm7 = vcmp.ne.s32.totalorder %v2931_v36, 0  ;;  %vm3509_vm8 = vcmp.lt.s32.totalorder %v2931_v36, 0  ;;  %v3581_v42 = vadd.s32 18, %v2931_v36  ;;  %v1726_v24 = vpop.f32.mrf.mxu2  ;;  %v2975_v14 = vshll.u32 %v2971_v49, 16  ;;  %v5656_v47 = vpop.f32.mrf.mxu3 }
 0x2a2   : > { %vm3545_vm1 = vmand %vm3509_vm8, %vm3473_vm7  ;;  %v1789_v57 = vadd.f32 %v1726_v24, %v1541_v58  ;;  %v2956_v44 = vadd.s32 %v2955_v28, %v2945_v19  ;;  %v1480_v10 = vpop.f32.mrf.mxu1  ;;  %v2976_v7 = vshrl.u32 %v2971_v49, 16  ;;  %vm2977_vm9 = vc.u32 %v2969_v11, %v2973_v52 }
 0x2a3   : > { %v3617_v35 = vsel %vm3545_vm1, %v3581_v42, %v2931_v36  ;;  %v1542_v15 = vadd.f32 %v1480_v10, %v4717_v4  ;;  %v2978_v20 = vsel %vm2977_vm9, 1, %v5879_v6  ;;  %v2979_v12 = vadd.s32 %v2973_v52, %v2969_v11 }
 0x2a4   : > { %v2224_v56 = vpop.f32.mrf.mxu0  ;;  %vm3653_vm10 = vcmp.ge.s32.totalorder %v3617_v35, 1  ;;  %vm3689_vm11 = vcmp.le.s32.totalorder %v3617_v35, 16  ;;  %v2037_v25 = vadd.f32 %v5592_v39, %v1789_v57  ;;  %v2957_v21 = vadd.s32 %v2956_v44, %v2947_v46 }
 0x2a5   : > { %vm3725_vm12 = vmand %vm3653_vm10, %vm3689_vm11  ;;  %v2980_v5 = vadd.s32 %v2978_v20, %v2972_v45  ;;  %vm2981_vm13 = vc.u32 %v2979_v12, %v2975_v14  ;;  %v2996_v54 = vshrl.u32 %v5611_v17, 16  ;;  %v2998_v48 = vmul.u32 14564, %v2995_v50  ;;  %v5909_v20 = vld [vmem:[#allocation5_spill] sm:$0xff] }
 0x2a6   : > { %v3761_v13 = vsel %vm3725_vm12, %v2320_v38, 0.0  ;;  %v2285_v27 = vadd.f32 %v2222_v2, %v2037_v25  ;;  %v2958_v4 = vshrl.u32 %v2957_v21, 4  ;;  %v2982_v41 = vsel %vm2981_vm13, 1, %v5879_v6 }
 0x2a7   : > { %v3796_v16 = vadd.f32 %v3795_v33, %v3761_v13  ;;  %v2984_v29 = vadd.s32 %v2982_v41, %v2980_v5  ;;  %v2999_v18 = vmul.u32 58254, %v2995_v50  ;;  %v3000_v9 = vmul.u32 14564, %v2996_v54 }
 0x2a8   : > { %v2321_v51 = vmax.f32 %v2285_v27, 0.0  ;;  %v2959_v39 = vmul.u32 18, %v2958_v4  ;;  %v5647_v30 = vadd.s32 19, %v5600_v62  ;;  %v3001_v63 = vmul.u32 58254, %v2996_v54 }
 0x2a9   : > { %v1728_v55 = vpop.f32.mrf.mxu2  ;;  %v2985_v19 = vadd.s32 %v2984_v29, %v2974_v23  ;;  %v3002_v46 = vshll.u32 %v2999_v18, 16  ;;  %v3004_v31 = vshll.u32 %v3000_v9, 16  ;;  %v3003_v37 = vshrl.u32 %v2999_v18, 16 }
 0x2aa   : > { %v2960_v61 = vsub.s32 %v5595_v60, %v2959_v39  ;;  %v1790_v58 = vadd.f32 %v1728_v55, %v1542_v15  ;;  %v1483_v2 = vpop.f32.mrf.mxu1  ;;  %v3024_v33 = vand.u32 65535, %v5647_v30  ;;  %v3025_v26 = vshrl.u32 %v5647_v30, 16  ;;  %v1984_v55 = vpop.f32.mrf.mxu3 }
 0x2ab   : > { %v2986_v53 = vadd.s32 %v2985_v19, %v2976_v7  ;;  %v1543_v40 = vadd.f32 %v1483_v2, %v4722_v1  ;;  %vm3006_vm14 = vc.u32 %v2998_v48, %v3002_v46  ;;  %v3008_v32 = vadd.s32 %v3002_v46, %v2998_v48 }
 0x2ac   : > { %v2227_v3 = vpop.f32.mrf.mxu0  ;;  %vm3474_vm15 = vcmp.ne.s32.totalorder %v2960_v61, 0  ;;  %vm3510_vm0 = vcmp.lt.s32.totalorder %v2960_v61, 0  ;;  %v3582_v62 = vadd.s32 18, %v2960_v61  ;;  %v2038_v0 = vadd.f32 %v5618_v8, %v1790_v58 }
 0x2ad   : > { %vm3546_vm2 = vmand %vm3510_vm0, %vm3474_vm15  ;;  %v2987_v11 = vshrl.u32 %v2986_v53, 4  ;;  %v3007_v60 = vsel %vm3006_vm14, 1, %v5879_v6  ;;  %vm3010_vm3 = vc.u32 %v3008_v32, %v3004_v31  ;;  %v3005_v45 = vshrl.u32 %v3000_v9, 16 }
 0x2ae   : > { %v3618_v22 = vsel %vm3546_vm2, %v3582_v62, %v2960_v61  ;;  %v2286_v50 = vadd.f32 %v2224_v56, %v2038_v0  ;;  %v3009_v36 = vadd.s32 %v3007_v60, %v3001_v63  ;;  %v3011_v1 = vsel %vm3010_vm3, 1, %v5879_v6 }
 0x2af   : > { %vm3654_vm4 = vcmp.ge.s32.totalorder %v3618_v22, 1  ;;  %vm3690_vm5 = vcmp.le.s32.totalorder %v3618_v22, 16  ;;  %v2988_v49 = vmul.u32 18, %v2987_v11  ;;  %v3027_v38 = vmul.u32 14564, %v3024_v33 }
 0x2b0   : > { %vm3726_vm6 = vmand %vm3654_vm4, %vm3690_vm5  ;;  %v3013_v8 = vadd.s32 %v3011_v1, %v3009_v36  ;;  %v3028_v28 = vmul.u32 58254, %v3024_v33  ;;  %v5658_v52 = vmul.u32 14564, %v3025_v26  ;;  %v2322_v42 = vmax.f32 %v2286_v50, 0.0 }
 0x2b1   : > { %v3762_v23 = vsel %vm3726_vm6, %v2321_v51, 0.0  ;;  %v2989_v24 = vsub.s32 %v5609_v34, %v2988_v49  ;;  %v1731_v14 = vpop.f32.mrf.mxu2  ;;  %v2362_v57 = vadd.s32 176, %v4802_v59  ;;  %v3030_v54 = vmul.u32 58254, %v3025_v26 }
 0x2b2   : > { %v3797_v44 = vadd.f32 %v3796_v16, %v3762_v23  ;;  %v1791_v10 = vadd.f32 %v1731_v14, %v1543_v40  ;;  %v3014_v7 = vadd.s32 %v3013_v8, %v3003_v37  ;;  %v1485_v35 = vpop.f32.mrf.mxu1  ;;  %v3031_v15 = vshll.u32 %v3028_v28, 16  ;;  %v5910_v40 = vld [vmem:[#allocation6_spill] sm:$0xff] }
 0x2b3   : > { %vm3475_vm7 = vcmp.ne.s32.totalorder %v2989_v24, 0  ;;  %vm3511_vm8 = vcmp.lt.s32.totalorder %v2989_v24, 0  ;;  %v3583_v56 = vadd.s32 18, %v2989_v24  ;;  %v1544_v12 = vadd.f32 %v1485_v35, %v5909_v20 }
 0x2b4   : > { %v2229_v25 = vpop.f32.mrf.mxu0  ;;  %vm3547_vm1 = vmand %vm3511_vm8, %vm3475_vm7  ;;  %v2039_v21 = vadd.f32 %v5642_v43, %v1791_v10  ;;  %v3015_v5 = vadd.s32 %v3014_v7, %v3005_v45  ;;  %v3033_v34 = vshll.u32 %v5658_v52, 16  ;;  %v3032_v13 = vshrl.u32 %v3028_v28, 16 }
 0x2b5   : > { %v3619_v48 = vsel %vm3547_vm1, %v3583_v56, %v2989_v24  ;;  %vm3035_vm9 = vc.u32 %v3027_v38, %v3031_v15  ;;  %v3037_v27 = vadd.s32 %v3031_v15, %v3027_v38  ;;  %v5666_v29 = vadd.s32 19, %v2362_v57  ;;  %v1986_v15 = vpop.f32.mrf.mxu3 }
 0x2b6   : > { %vm3655_vm10 = vcmp.ge.s32.totalorder %v3619_v48, 1  ;;  %vm3691_vm11 = vcmp.le.s32.totalorder %v3619_v48, 16  ;;  %v2287_v4 = vadd.f32 %v2227_v3, %v2039_v21  ;;  %v3016_v41 = vshrl.u32 %v3015_v5, 4 }
 0x2b7   : > { %vm3727_vm12 = vmand %vm3655_vm10, %vm3691_vm11  ;;  %v3036_v16 = vsel %vm3035_vm9, 1, %v5879_v6  ;;  %vm3039_vm13 = vc.u32 %v3037_v27, %v3033_v34  ;;  %v2363_v43 = vadd.s32 184, %v4802_v59  ;;  %v3034_v51 = vshrl.u32 %v5658_v52, 16 }
 0x2b8   : > { %v3763_v18 = vsel %vm3727_vm12, %v2322_v42, 0.0  ;;  %v3017_v9 = vmul.u32 18, %v3016_v41  ;;  %v3038_v39 = vadd.s32 %v3036_v16, %v3030_v54  ;;  %v3040_v46 = vsel %vm3039_vm13, 1, %v5879_v6 }
 0x2b9   : > { %v3798_v19 = vadd.f32 %v3797_v44, %v3763_v18  ;;  %v1733_v63 = vpop.f32.mrf.mxu2  ;;  %v3053_v31 = vand.u32 65535, %v5666_v29  ;;  %v3054_v61 = vshrl.u32 %v5666_v29, 16  ;;  %v5674_v53 = vadd.s32 19, %v2363_v43 }
 0x2ba   : > { %v3018_v58 = vsub.s32 %v5611_v17, %v3017_v9  ;;  %v1792_v2 = vadd.f32 %v1733_v63, %v1544_v12  ;;  %v3042_v37 = vadd.s32 %v3040_v46, %v3038_v39  ;;  %v1488_v33 = vpop.f32.mrf.mxu1  ;;  %v2323_v26 = vmax.f32 %v2287_v4, 0.0 }
 0x2bb   : > { %v1545_v3 = vadd.f32 %v1488_v33, %v5910_v40  ;;  %v3056_v32 = vmul.u32 14564, %v3053_v31  ;;  %v3057_v62 = vmul.u32 58254, %v3053_v31  ;;  %v3058_v0 = vmul.u32 14564, %v3054_v61 }
 0x2bc   : > { %vm3476_vm14 = vcmp.ne.s32.totalorder %v3018_v58, 0  ;;  %vm3512_vm15 = vcmp.lt.s32.totalorder %v3018_v58, 0  ;;  %v3584_v11 = vadd.s32 18, %v3018_v58  ;;  %v2040_v60 = vadd.f32 %v5656_v47, %v1792_v2  ;;  %v2232_v50 = vpop.f32.mrf.mxu0 }
 0x2bd   : > { %vm3548_vm0 = vmand %vm3512_vm15, %vm3476_vm14  ;;  %v3043_v22 = vadd.s32 %v3042_v37, %v3032_v13  ;;  %v3059_v17 = vmul.u32 58254, %v3054_v61  ;;  %v3060_v36 = vshll.u32 %v3057_v62, 16  ;;  %v3061_v45 = vshrl.u32 %v3057_v62, 16 }
 0x2be   : > { %v3620_v1 = vsel %vm3548_vm0, %v3584_v11, %v3018_v58  ;;  %v5678_v49 = vadd.f32 %v2229_v25, %v2040_v60  ;;  %v3062_v8 = vshll.u32 %v3058_v0, 16  ;;  %v3063_v28 = vshrl.u32 %v3058_v0, 16  ;;  %v5911_v25 = vld [vmem:[#allocation7_spill] sm:$0xff] }
 0x2bf   : > { %vm3656_vm2 = vcmp.ge.s32.totalorder %v3620_v1, 1  ;;  %vm3692_vm3 = vcmp.le.s32.totalorder %v3620_v1, 16  ;;  %v3044_v38 = vadd.s32 %v3043_v22, %v3034_v51  ;;  %vm3064_vm4 = vc.u32 %v3056_v32, %v3060_v36 }
 0x2c0   : > { %vm3728_vm5 = vmand %vm3656_vm2, %vm3692_vm3  ;;  %v3065_v52 = vsel %vm3064_vm4, 1, %v5879_v6  ;;  %v3066_v47 = vadd.s32 %v3060_v36, %v3056_v32  ;;  %v3082_v23 = vand.u32 65535, %v5674_v53  ;;  %v3083_v44 = vshrl.u32 %v5674_v53, 16  ;;  %v5912_v32 = vld [vmem:[#allocation8_spill] sm:$0xff] }
 0x2c1   : > { %v3764_v42 = vsel %vm3728_vm5, %v2323_v26, 0.0  ;;  %v3045_v24 = vshrl.u32 %v3044_v38, 4  ;;  %v1736_v14 = vpop.f32.mrf.mxu2  ;;  %v3067_v57 = vadd.s32 %v3065_v52, %v3059_v17  ;;  %v2324_v54 = vmax.f32 %v5678_v49, 0.0  ;;  %v1989_v17 = vpop.f32.mrf.mxu3 }
 0x2c2   : > { %v3799_v10 = vadd.f32 %v3798_v19, %v3764_v42  ;;  %v1793_v7 = vadd.f32 %v1736_v14, %v1545_v3  ;;  %vm3068_vm6 = vc.u32 %v3066_v47, %v3062_v8  ;;  %v1490_v35 = vpop.f32.mrf.mxu1  ;;  %v3085_v56 = vmul.u32 14564, %v3082_v23 }
 0x2c3   : > { %v3046_v20 = vmul.u32 18, %v3045_v24  ;;  %v3069_v12 = vsel %vm3068_vm6, 1, %v5879_v6  ;;  %v1546_v21 = vadd.f32 %v1490_v35, %v5911_v25  ;;  %v3086_v5 = vmul.u32 58254, %v3082_v23 }
 0x2c4   : > { %v2041_v34 = vadd.f32 %v1984_v55, %v1793_v7  ;;  %v3071_v48 = vadd.s32 %v3069_v12, %v3067_v57  ;;  %v3087_v13 = vmul.u32 14564, %v3083_v44  ;;  %v3088_v4 = vmul.u32 58254, %v3083_v44  ;;  %v2234_v19 = vpop.f32.mrf.mxu0 }
 0x2c5   : > { %v3047_v27 = vsub.s32 %v5647_v30, %v3046_v20  ;;  %v3089_v41 = vshll.u32 %v3086_v5, 16  ;;  %v2364_v16 = vadd.s32 192, %v4802_v59  ;;  %v3090_v9 = vshrl.u32 %v3086_v5, 16 }
 0x2c6   : > { %v5688_v43 = vadd.f32 %v2232_v50, %v2041_v34  ;;  %v3072_v18 = vadd.s32 %v3071_v48, %v3061_v45  ;;  %v3091_v51 = vshll.u32 %v3087_v13, 16  ;;  %v3092_v63 = vshrl.u32 %v3087_v13, 16 }
 0x2c7   : > { %vm3477_vm7 = vcmp.ne.s32.totalorder %v3047_v27, 0  ;;  %vm3513_vm8 = vcmp.lt.s32.totalorder %v3047_v27, 0  ;;  %v3585_v39 = vadd.s32 18, %v3047_v27  ;;  %vm3093_vm1 = vc.u32 %v3085_v56, %v3089_v41 }
 0x2c8   : > { %vm3549_vm9 = vmand %vm3513_vm8, %vm3477_vm7  ;;  %v3073_v55 = vadd.s32 %v3072_v18, %v3063_v28  ;;  %v3094_v46 = vsel %vm3093_vm1, 1, %v5879_v6  ;;  %v3095_v30 = vadd.s32 %v3089_v41, %v3085_v56  ;;  %v5691_v2 = vadd.s32 19, %v2364_v16 }
 0x2c9   : > { %v3621_v31 = vsel %vm3549_vm9, %v3585_v39, %v3047_v27  ;;  %v1738_v61 = vpop.f32.mrf.mxu2  ;;  %v3096_v58 = vadd.s32 %v3094_v46, %v3088_v4  ;;  %v2365_v37 = vadd.s32 200, %v4802_v59  ;;  %v2325_v14 = vmax.f32 %v5688_v43, 0.0  ;;  %v1991_v18 = vpop.f32.mrf.mxu3  ;;  %v5913_v46 = vld [vmem:[#allocation9_spill] sm:$0xff] }
 0x2ca   : > { %vm3657_vm10 = vcmp.ge.s32.totalorder %v3621_v31, 1  ;;  %vm3693_vm11 = vcmp.le.s32.totalorder %v3621_v31, 16  ;;  %v3074_v33 = vshrl.u32 %v3073_v55, 4  ;;  %v1794_v40 = vadd.f32 %v1738_v61, %v1546_v21  ;;  %v1493_v3 = vpop.f32.mrf.mxu1 }
 0x2cb   : > { %vm3729_vm12 = vmand %vm3657_vm10, %vm3693_vm11  ;;  %vm3097_vm13 = vc.u32 %v3095_v30, %v3091_v51  ;;  %v1547_v62 = vadd.f32 %v1493_v3, %v5912_v32  ;;  %v3111_v0 = vand.u32 65535, %v5691_v2  ;;  %v3112_v11 = vshrl.u32 %v5691_v2, 16 }
 0x2cc   : > { %v3765_v60 = vsel %vm3729_vm12, %v2324_v54, 0.0  ;;  %v3075_v26 = vmul.u32 18, %v3074_v33  ;;  %v2042_v22 = vadd.f32 %v1986_v15, %v1794_v40  ;;  %v3098_v50 = vsel %vm3097_vm13, 1, %v5879_v6  ;;  %v2237_v44 = vpop.f32.mrf.mxu0 }
 0x2cd   : > { %v3800_v36 = vadd.f32 %v3799_v10, %v3765_v60  ;;  %v3100_v1 = vadd.s32 %v3098_v50, %v3096_v58  ;;  %v3114_v49 = vmul.u32 14564, %v3111_v0  ;;  %v3115_v45 = vmul.u32 58254, %v3111_v0 }
 0x2ce   : > { %v3076_v8 = vsub.s32 %v5666_v29, %v3075_v26  ;;  %v5699_v38 = vadd.f32 %v2234_v19, %v2042_v22  ;;  %v3116_v28 = vmul.u32 14564, %v3112_v11  ;;  %v3117_v47 = vmul.u32 58254, %v3112_v11 }
 0x2cf   : > { %v3101_v52 = vadd.s32 %v3100_v1, %v3090_v9  ;;  %v3118_v23 = vshll.u32 %v3115_v45, 16  ;;  %v5701_v24 = vadd.s32 19, %v2365_v37  ;;  %v3119_v5 = vshrl.u32 %v3115_v45, 16 }
 0x2d0   : > { %vm3478_vm14 = vcmp.ne.s32.totalorder %v3076_v8, 0  ;;  %vm3514_vm15 = vcmp.lt.s32.totalorder %v3076_v8, 0  ;;  %v3586_v42 = vadd.s32 18, %v3076_v8  ;;  %v3120_v7 = vshll.u32 %v3116_v28, 16 }
 0x2d1   : > { %vm3550_vm0 = vmand %vm3514_vm15, %vm3478_vm14  ;;  %v3102_v57 = vadd.s32 %v3101_v52, %v3092_v63  ;;  %v1741_v10 = vpop.f32.mrf.mxu2  ;;  %vm3122_vm2 = vc.u32 %v3114_v49, %v3118_v23  ;;  %v3124_v56 = vadd.s32 %v3118_v23, %v3114_v49  ;;  %v3140_v54 = vand.u32 65535, %v5701_v24 }
 0x2d2   : > { %v3622_v29 = vsel %vm3550_vm0, %v3586_v42, %v3076_v8  ;;  %v1795_v35 = vadd.f32 %v1741_v10, %v1547_v62  ;;  %v3123_v15 = vsel %vm3122_vm2, 1, %v5879_v6  ;;  %v1495_v20 = vpop.f32.mrf.mxu1  ;;  %v3141_v27 = vshrl.u32 %v5701_v24, 16 }
 0x2d3   : > { %vm3658_vm3 = vcmp.ge.s32.totalorder %v3622_v29, 1  ;;  %vm3694_vm4 = vcmp.le.s32.totalorder %v3622_v29, 16  ;;  %v3103_v12 = vshrl.u32 %v3102_v57, 4  ;;  %v3125_v25 = vadd.s32 %v3123_v15, %v3117_v47 }
 0x2d4   : > { %vm3730_vm5 = vmand %vm3658_vm3, %vm3694_vm4  ;;  %v2043_v21 = vadd.f32 %v1989_v17, %v1795_v35  ;;  %vm3126_vm6 = vc.u32 %v3124_v56, %v3120_v7  ;;  %v3121_v16 = vshrl.u32 %v3116_v28, 16  ;;  %v3143_v51 = vmul.u32 14564, %v3140_v54  ;;  %v2239_v0 = vpop.f32.mrf.mxu0 }
 0x2d5   : > { %v3766_v34 = vsel %vm3730_vm5, %v2325_v14, 0.0  ;;  %v3104_v48 = vmul.u32 18, %v3103_v12  ;;  %v3127_v13 = vsel %vm3126_vm6, 1, %v5879_v6  ;;  %v3144_v39 = vmul.u32 58254, %v3140_v54  ;;  %v5914_v14 = vld [vmem:[#allocation10_spill] sm:$0xff] }
 0x2d6   : > { %v3801_v4 = vadd.f32 %v3800_v36, %v3766_v34  ;;  %v5708_v41 = vadd.f32 %v2237_v44, %v2043_v21  ;;  %v3129_v43 = vadd.s32 %v3127_v13, %v3125_v25  ;;  %v3145_v19 = vmul.u32 14564, %v3141_v27  ;;  %v1994_v44 = vpop.f32.mrf.mxu3 }
 0x2d7   : > { %v3105_v9 = vsub.s32 %v5674_v53, %v3104_v48  ;;  %v2326_v55 = vmax.f32 %v5699_v38, 0.0  ;;  %v1548_v30 = vadd.f32 %v1495_v20, %v5913_v46  ;;  %v2366_v31 = vadd.s32 208, %v4802_v59 }
 0x2d8   : > { %v3130_v63 = vadd.s32 %v3129_v43, %v3119_v5  ;;  %v3147_v37 = vshll.u32 %v3144_v39, 16  ;;  %v3146_v3 = vmul.u32 58254, %v3141_v27  ;;  %v3149_v53 = vshll.u32 %v3145_v19, 16 }
 0x2d9   : > { %vm3479_vm7 = vcmp.ne.s32.totalorder %v3105_v9, 0  ;;  %vm3515_vm8 = vcmp.lt.s32.totalorder %v3105_v9, 0  ;;  %v3587_v61 = vadd.s32 18, %v3105_v9  ;;  %v1743_v58 = vpop.f32.mrf.mxu2  ;;  %v2367_v26 = vadd.s32 216, %v4802_v59 }
 0x2da   : > { %vm3551_vm1 = vmand %vm3515_vm8, %vm3479_vm7  ;;  %v3131_v33 = vadd.s32 %v3130_v63, %v3121_v16  ;;  %v1796_v40 = vadd.f32 %v1743_v58, %v1548_v30  ;;  %v1498_v32 = vpop.f32.mrf.mxu1  ;;  %vm3151_vm9 = vc.u32 %v3143_v51, %v3147_v37  ;;  %v3153_v11 = vadd.s32 %v3147_v37, %v3143_v51 }
 0x2db   : > { %v3623_v62 = vsel %vm3551_vm1, %v3587_v61, %v3105_v9  ;;  %v3148_v22 = vshrl.u32 %v3144_v39, 16  ;;  %v3152_v50 = vsel %vm3151_vm9, 1, %v5879_v6  ;;  %v5716_v17 = vadd.s32 19, %v2366_v31  ;;  %v5915_v39 = vld [vmem:[#allocation11_spill] sm:$0xff] }
 0x2dc   : > { %vm3659_vm10 = vcmp.ge.s32.totalorder %v3623_v62, 1  ;;  %vm3695_vm11 = vcmp.le.s32.totalorder %v3623_v62, 16  ;;  %v3132_v60 = vshrl.u32 %v3131_v33, 4  ;;  %vm3155_vm13 = vc.u32 %v3153_v11, %v3149_v53  ;;  %v2242_v27 = vpop.f32.mrf.mxu0 }
 0x2dd   : > { %vm3731_vm12 = vmand %vm3659_vm10, %vm3695_vm11  ;;  %v2044_v49 = vadd.f32 %v1991_v18, %v1796_v40  ;;  %v3154_v45 = vadd.s32 %v3152_v50, %v3146_v3  ;;  %v3156_v38 = vsel %vm3155_vm13, 1, %v5879_v6  ;;  %v3169_v28 = vand.u32 65535, %v5716_v17 }
 0x2de   : > { %v3767_v36 = vsel %vm3731_vm12, %v2326_v55, 0.0  ;;  %v3133_v1 = vmul.u32 18, %v3132_v60  ;;  %v3170_v52 = vshrl.u32 %v5716_v17, 16  ;;  %v3150_v23 = vshrl.u32 %v3145_v19, 16 }
 0x2df   : > { %v3802_v8 = vadd.f32 %v3801_v4, %v3767_v36  ;;  %v3158_v42 = vadd.s32 %v3156_v38, %v3154_v45  ;;  %v1549_v57 = vadd.f32 %v1498_v32, %v5914_v14  ;;  %v3172_v7 = vmul.u32 14564, %v3169_v28  ;;  %v1996_v32 = vpop.f32.mrf.mxu3 }
 0x2e0   : > { %v3134_v47 = vsub.s32 %v5691_v2, %v3133_v1  ;;  %v3173_v29 = vmul.u32 58254, %v3169_v28  ;;  %v3174_v35 = vmul.u32 14564, %v3170_v52  ;;  %v5723_v15 = vadd.s32 19, %v2367_v26 }
 0x2e1   : > { %v1746_v10 = vpop.f32.mrf.mxu2  ;;  %v3159_v20 = vadd.s32 %v3158_v42, %v3148_v22  ;;  %v2327_v25 = vmax.f32 %v5708_v41, 0.0  ;;  %v5726_v2 = vadd.f32 %v2239_v0, %v2044_v49  ;;  %v3175_v21 = vmul.u32 58254, %v3170_v52 }
 0x2e2   : > { %vm3480_vm14 = vcmp.ne.s32.totalorder %v3134_v47, 0  ;;  %vm3516_vm15 = vcmp.lt.s32.totalorder %v3134_v47, 0  ;;  %v3588_v56 = vadd.s32 18, %v3134_v47  ;;  %v1500_v12 = vpop.f32.mrf.mxu1  ;;  %v3176_v5 = vshll.u32 %v3173_v29, 16 }
 0x2e3   : > { %vm3552_vm0 = vmand %vm3516_vm15, %vm3480_vm14  ;;  %v3160_v34 = vadd.s32 %v3159_v20, %v3150_v23  ;;  %v1797_v48 = vadd.f32 %v1746_v10, %v1549_v57  ;;  %v3178_v13 = vshll.u32 %v3174_v35, 16  ;;  %v3177_v4 = vshrl.u32 %v3173_v29, 16 }
 0x2e4   : > { %v3624_v54 = vsel %vm3552_vm0, %v3588_v56, %v3134_v47  ;;  %vm3180_vm4 = vc.u32 %v3172_v7, %v3176_v5  ;;  %v3182_v18 = vadd.s32 %v3176_v5, %v3172_v7  ;;  %v3198_v41 = vand.u32 65535, %v5723_v15  ;;  %v2244_v52 = vpop.f32.mrf.mxu0 }
 0x2e5   : > { %vm3660_vm2 = vcmp.ge.s32.totalorder %v3624_v54, 1  ;;  %vm3696_vm3 = vcmp.le.s32.totalorder %v3624_v54, 16  ;;  %v3161_v16 = vshrl.u32 %v3160_v34, 4  ;;  %v3181_v43 = vsel %vm3180_vm4, 1, %v5879_v6 }
 0x2e6   : > { %vm3732_vm5 = vmand %vm3660_vm2, %vm3696_vm3  ;;  %v3183_v51 = vadd.s32 %v3181_v43, %v3175_v21  ;;  %v1550_v19 = vadd.f32 %v1500_v12, %v5915_v39  ;;  %v3199_v55 = vshrl.u32 %v5723_v15, 16  ;;  %v2045_v30 = vadd.f32 %v1994_v44, %v1797_v48 }
 0x2e7   : > { %v3768_v9 = vsel %vm3732_vm5, %v2327_v25, 0.0  ;;  %v3162_v46 = vmul.u32 18, %v3161_v16  ;;  %vm3184_vm6 = vc.u32 %v3182_v18, %v3178_v13  ;;  %v3201_v58 = vmul.u32 14564, %v3198_v41  ;;  %v5916_v25 = vld [vmem:[#allocation12_spill] sm:$0xff] }
 0x2e8   : > { %v3803_v63 = vadd.f32 %v3802_v8, %v3768_v9  ;;  %v3185_v31 = vsel %vm3184_vm6, 1, %v5879_v6  ;;  %v3202_v37 = vmul.u32 58254, %v3198_v41  ;;  %v3203_v33 = vmul.u32 14564, %v3199_v55 }
 0x2e9   : > { %v1748_v61 = vpop.f32.mrf.mxu2  ;;  %v3163_v40 = vsub.s32 %v5701_v24, %v3162_v46  ;;  %v3179_v3 = vshrl.u32 %v3174_v35, 16  ;;  %v3187_v53 = vadd.s32 %v3185_v31, %v3183_v51  ;;  %v2328_v11 = vmax.f32 %v5726_v2, 0.0 }
 0x2ea   : > { %v1798_v62 = vadd.f32 %v1748_v61, %v1550_v19  ;;  %v1503_v0 = vpop.f32.mrf.mxu1  ;;  %v3204_v60 = vmul.u32 58254, %v3199_v55  ;;  %v3205_v26 = vshll.u32 %v3202_v37, 16  ;;  %v3207_v22 = vshll.u32 %v3203_v33, 16 }
 0x2eb   : > { %vm3481_vm7 = vcmp.ne.s32.totalorder %v3163_v40, 0  ;;  %vm3517_vm8 = vcmp.lt.s32.totalorder %v3163_v40, 0  ;;  %v3589_v50 = vadd.s32 18, %v3163_v40  ;;  %v3188_v36 = vadd.s32 %v3187_v53, %v3177_v4 }
 0x2ec   : > { %vm3553_vm1 = vmand %vm3517_vm8, %vm3481_vm7  ;;  %v5735_v1 = vadd.f32 %v2242_v27, %v2045_v30  ;;  %v2046_v49 = vadd.f32 %v1996_v32, %v1798_v62  ;;  %vm3209_vm9 = vc.u32 %v3201_v58, %v3205_v26  ;;  %v3211_v24 = vadd.s32 %v3205_v26, %v3201_v58  ;;  %v1999_v27 = vpop.f32.mrf.mxu3 }
 0x2ed   : > { %v3625_v45 = vsel %vm3553_vm1, %v3589_v50, %v3163_v40  ;;  %v3189_v8 = vadd.s32 %v3188_v36, %v3179_v3  ;;  %v3210_v38 = vsel %vm3209_vm9, 1, %v5879_v6  ;;  %v2368_v28 = vadd.s32 224, %v4802_v59  ;;  %v2247_v3 = vpop.f32.mrf.mxu0 }
 0x2ee   : > { %vm3661_vm10 = vcmp.ge.s32.totalorder %v3625_v45, 1  ;;  %vm3697_vm11 = vcmp.le.s32.totalorder %v3625_v45, 16  ;;  %v3206_v47 = vshrl.u32 %v3202_v37, 16  ;;  %v3212_v23 = vadd.s32 %v3210_v38, %v3204_v60 }
 0x2ef   : > { %vm3733_vm12 = vmand %vm3661_vm10, %vm3697_vm11  ;;  %v3190_v42 = vshrl.u32 %v3189_v8, 4  ;;  %v5739_v14 = vadd.f32 %v2244_v52, %v2046_v49  ;;  %vm3213_vm13 = vc.u32 %v3211_v24, %v3207_v22  ;;  %v5741_v57 = vadd.s32 19, %v2368_v28 }
 0x2f0   : > { %v3769_v44 = vsel %vm3733_vm12, %v2328_v11, 0.0  ;;  %v3208_v10 = vshrl.u32 %v3203_v33, 16  ;;  %v3214_v7 = vsel %vm3213_vm13, 1, %v5879_v6  ;;  %v2369_v35 = vadd.s32 232, %v4802_v59 }
 0x2f1   : > { %v1751_v29 = vpop.f32.mrf.mxu2  ;;  %v3804_v56 = vadd.f32 %v3803_v63, %v3769_v44  ;;  %v3191_v20 = vmul.u32 18, %v3190_v42  ;;  %v3216_v12 = vadd.s32 %v3214_v7, %v3212_v23  ;;  %v1551_v2 = vadd.f32 %v1503_v0, %v5916_v25  ;;  %v5917_v63 = vld [vmem:[#allocation13_spill] sm:$0xff] }
 0x2f2   : > { %v2329_v21 = vmax.f32 %v5735_v1, 0.0  ;;  %v3227_v5 = vand.u32 65535, %v5741_v57  ;;  %v3228_v54 = vshrl.u32 %v5741_v57, 16  ;;  %v2330_v48 = vmax.f32 %v5739_v14, 0.0  ;;  %v1505_v16 = vpop.f32.mrf.mxu1 }
 0x2f3   : > { %v3192_v34 = vsub.s32 %v5716_v17, %v3191_v20  ;;  %v3217_v13 = vadd.s32 %v3216_v12, %v3206_v47  ;;  %v1799_v4 = vadd.f32 %v1751_v29, %v1551_v2  ;;  %v5751_v9 = vadd.s32 19, %v2369_v35  ;;  %v5918_v2 = vld [vmem:[#allocation14_spill] sm:$0xff] }
 0x2f4   : > { %v3230_v43 = vmul.u32 14564, %v3227_v5  ;;  %v3231_v18 = vmul.u32 58254, %v3227_v5  ;;  %v3232_v41 = vmul.u32 14564, %v3228_v54  ;;  %v3233_v19 = vmul.u32 58254, %v3228_v54  ;;  %v2001_v28 = vpop.f32.mrf.mxu3 }
 0x2f5   : > { %vm3482_vm14 = vcmp.ne.s32.totalorder %v3192_v34, 0  ;;  %vm3518_vm15 = vcmp.lt.s32.totalorder %v3192_v34, 0  ;;  %v3590_v51 = vadd.s32 18, %v3192_v34  ;;  %v3218_v39 = vadd.s32 %v3217_v13, %v3208_v10 }
 0x2f6   : > { %vm3554_vm0 = vmand %vm3518_vm15, %vm3482_vm14  ;;  %v3234_v55 = vshll.u32 %v3231_v18, 16  ;;  %v1552_v17 = vadd.f32 %v1505_v16, %v5917_v63  ;;  %v2370_v46 = vadd.s32 240, %v4802_v59  ;;  %v2047_v61 = vadd.f32 %v1999_v27, %v1799_v4  ;;  %v2249_v16 = vpop.f32.mrf.mxu0 }
 0x2f7   : > { %v3626_v30 = vsel %vm3554_vm0, %v3590_v51, %v3192_v34  ;;  %v3219_v31 = vshrl.u32 %v3218_v39, 4  ;;  %v3236_v58 = vshll.u32 %v3232_v41, 16  ;;  %v3256_v33 = vand.u32 65535, %v5751_v9 }
 0x2f8   : > { %vm3662_vm2 = vcmp.ge.s32.totalorder %v3626_v30, 1  ;;  %vm3698_vm3 = vcmp.le.s32.totalorder %v3626_v30, 16  ;;  %vm3238_vm4 = vc.u32 %v3230_v43, %v3234_v55  ;;  %v3235_v53 = vshrl.u32 %v3231_v18, 16 }
 0x2f9   : > { %v1753_v37 = vpop.f32.mrf.mxu2  ;;  %vm3734_vm5 = vmand %vm3662_vm2, %vm3698_vm3  ;;  %v3220_v40 = vmul.u32 18, %v3219_v31  ;;  %v3239_v32 = vsel %vm3238_vm4, 1, %v5879_v6  ;;  %v3240_v62 = vadd.s32 %v3234_v55, %v3230_v43  ;;  %v3237_v11 = vshrl.u32 %v3232_v41, 16 }
 0x2fa   : > { %v3770_v0 = vsel %vm3734_vm5, %v2329_v21, 0.0  ;;  %v3241_v60 = vadd.s32 %v3239_v32, %v3233_v19  ;;  %v3257_v26 = vshrl.u32 %v5751_v9, 16  ;;  %v1800_v36 = vadd.f32 %v1753_v37, %v1552_v17  ;;  %v1508_v42 = vpop.f32.mrf.mxu1 }
 0x2fb   : > { %v3805_v22 = vadd.f32 %v3804_v56, %v3770_v0  ;;  %v3221_v50 = vsub.s32 %v5723_v15, %v3220_v40  ;;  %vm3242_vm6 = vc.u32 %v3240_v62, %v3236_v58  ;;  %v3259_v49 = vmul.u32 14564, %v3256_v33 }
 0x2fc   : > { %v3243_v1 = vsel %vm3242_vm6, 1, %v5879_v6  ;;  %v3260_v24 = vmul.u32 58254, %v3256_v33  ;;  %v3261_v45 = vmul.u32 14564, %v3257_v26  ;;  %v5760_v52 = vadd.f32 %v2247_v3, %v2047_v61  ;;  %v2004_v61 = vpop.f32.mrf.mxu3 }
 0x2fd   : > { %vm3483_vm7 = vcmp.ne.s32.totalorder %v3221_v50, 0  ;;  %vm3519_vm8 = vcmp.lt.s32.totalorder %v3221_v50, 0  ;;  %v3591_v8 = vadd.s32 18, %v3221_v50  ;;  %v3245_v38 = vadd.s32 %v3243_v1, %v3241_v60 }
 0x2fe   : > { %vm3555_vm1 = vmand %vm3519_vm8, %vm3483_vm7  ;;  %v3262_v47 = vmul.u32 58254, %v3257_v26  ;;  %v3263_v23 = vshll.u32 %v3260_v24, 16  ;;  %v5762_v44 = vadd.s32 19, %v2370_v46  ;;  %v2048_v7 = vadd.f32 %v2001_v28, %v1800_v36 }
 0x2ff   : > { %v3627_v15 = vsel %vm3555_vm1, %v3591_v8, %v3221_v50  ;;  %v3246_v10 = vadd.s32 %v3245_v38, %v3235_v53  ;;  %v3265_v29 = vshll.u32 %v3261_v45, 16  ;;  %v3264_v35 = vshrl.u32 %v3260_v24, 16 }
 0x300   : > { %vm3663_vm9 = vcmp.ge.s32.totalorder %v3627_v15, 1  ;;  %vm3699_vm10 = vcmp.le.s32.totalorder %v3627_v15, 16  ;;  %vm3267_vm11 = vc.u32 %v3259_v49, %v3263_v23  ;;  %v3269_v25 = vadd.s32 %v3263_v23, %v3259_v49  ;;  %v2252_v49 = vpop.f32.mrf.mxu0 }
 0x301   : > { %v1756_v56 = vpop.f32.mrf.mxu2  ;;  %vm3735_vm12 = vmand %vm3663_vm9, %vm3699_vm10  ;;  %v3247_v20 = vadd.s32 %v3246_v10, %v3237_v11  ;;  %v3268_v12 = vsel %vm3267_vm11, 1, %v5879_v6  ;;  %v1553_v21 = vadd.f32 %v1508_v42, %v5918_v2  ;;  %v3285_v34 = vand.u32 65535, %v5762_v44 }
 0x302   : > { %v3771_v5 = vsel %vm3735_vm12, %v2330_v48, 0.0  ;;  %v3270_v54 = vadd.s32 %v3268_v12, %v3262_v47  ;;  %v3286_v13 = vshrl.u32 %v5762_v44, 16  ;;  %vm3271_vm13 = vc.u32 %v3269_v25, %v3265_v29  ;;  %v1510_v50 = vpop.f32.mrf.mxu1  ;;  %v5919_v29 = vld [vmem:[#allocation15_spill] sm:$0xff] }
 0x303   : > { %v3806_v27 = vadd.f32 %v3805_v22, %v3771_v5  ;;  %v3248_v4 = vshrl.u32 %v3247_v20, 4  ;;  %v1801_v43 = vadd.f32 %v1756_v56, %v1553_v21  ;;  %v3272_v18 = vsel %vm3271_vm13, 1, %v5879_v6 }
 0x304   : > { %v3288_v41 = vmul.u32 14564, %v3285_v34  ;;  %v3289_v51 = vmul.u32 58254, %v3285_v34  ;;  %v3290_v39 = vmul.u32 14564, %v3286_v13  ;;  %v3266_v55 = vshrl.u32 %v3261_v45, 16 }
 0x305   : > { %v3249_v19 = vmul.u32 18, %v3248_v4  ;;  %v3274_v63 = vadd.s32 %v3272_v18, %v3270_v54  ;;  %v2331_v14 = vmax.f32 %v5760_v52, 0.0  ;;  %v5773_v30 = vadd.f32 %v2249_v16, %v2048_v7 }
 0x306   : > { %v3292_v48 = vshll.u32 %v3289_v51, 16  ;;  %v3294_v17 = vshll.u32 %v3290_v39, 16  ;;  %v3291_v58 = vmul.u32 58254, %v3286_v13  ;;  %v2049_v37 = vadd.f32 %v2004_v61, %v1801_v43  ;;  %v2006_v43 = vpop.f32.mrf.mxu3 }
 0x307   : > { %v3250_v46 = vsub.s32 %v5741_v57, %v3249_v19  ;;  %v3275_v31 = vadd.s32 %v3274_v63, %v3264_v35  ;;  %v2371_v40 = vadd.s32 248, %v4802_v59  ;;  %v3293_v32 = vshrl.u32 %v3289_v51, 16 }
 0x308   : > { %vm3296_vm14 = vc.u32 %v3288_v41, %v3292_v48  ;;  %v3298_v33 = vadd.s32 %v3292_v48, %v3288_v41  ;;  %v2332_v22 = vmax.f32 %v5773_v30, 0.0  ;;  %v3295_v24 = vshrl.u32 %v3290_v39, 16 }
 0x309   : > { %vm3484_vm15 = vcmp.ne.s32.totalorder %v3250_v46, 0  ;;  %vm3520_vm0 = vcmp.lt.s32.totalorder %v3250_v46, 0  ;;  %v3592_v3 = vadd.s32 18, %v3250_v46  ;;  %v3276_v53 = vadd.s32 %v3275_v31, %v3266_v55  ;;  %v1758_v10 = vpop.f32.mrf.mxu2 }
 0x30a   : > { %vm3556_vm2 = vmand %vm3520_vm0, %vm3484_vm15  ;;  %v3297_v62 = vsel %vm3296_vm14, 1, %v5879_v6  ;;  %vm3300_vm3 = vc.u32 %v3298_v33, %v3294_v17  ;;  %v5777_v57 = vadd.s32 19, %v2371_v40  ;;  %v5783_v28 = vadd.f32 %v2252_v49, %v2049_v37  ;;  %v1513_v55 = vpop.f32.mrf.mxu1  ;;  %v2254_v40 = vpop.f32.mrf.mxu0 }
 0x30b   : > { %v3628_v0 = vsel %vm3556_vm2, %v3592_v3, %v3250_v46  ;;  %v3277_v11 = vshrl.u32 %v3276_v53, 4  ;;  %v3299_v60 = vadd.s32 %v3297_v62, %v3291_v58  ;;  %v3301_v26 = vsel %vm3300_vm3, 1, %v5879_v6 }
 0x30c   : > { %vm3664_vm4 = vcmp.ge.s32.totalorder %v3628_v0, 1  ;;  %vm3700_vm5 = vcmp.le.s32.totalorder %v3628_v0, 16  ;;  %v3314_v36 = vand.u32 65535, %v5777_v57  ;;  %v3315_v8 = vshrl.u32 %v5777_v57, 16 }
 0x30d   : > { %vm3736_vm6 = vmand %vm3664_vm4, %vm3700_vm5  ;;  %v3278_v1 = vmul.u32 18, %v3277_v11  ;;  %v3303_v45 = vadd.s32 %v3301_v26, %v3299_v60  ;;  %v1554_v35 = vadd.f32 %v1510_v50, %v5919_v29  ;;  %v2372_v12 = vadd.s32 256, %v4802_v59  ;;  %v5920_v11 = vld [vmem:[#allocation16_spill] sm:$0xff] }
 0x30e   : > { %v3772_v38 = vsel %vm3736_vm6, %v2331_v14, 0.0  ;;  %v3317_v52 = vmul.u32 14564, %v3314_v36  ;;  %v3318_v47 = vmul.u32 58254, %v3314_v36  ;;  %v3319_v7 = vmul.u32 14564, %v3315_v8 }
 0x30f   : > { %v3807_v23 = vadd.f32 %v3806_v27, %v3772_v38  ;;  %v3279_v42 = vsub.s32 %v5751_v9, %v3278_v1  ;;  %v3304_v15 = vadd.s32 %v3303_v45, %v3293_v32  ;;  %v3320_v56 = vmul.u32 58254, %v3315_v8 }
 0x310   : > { %v3321_v20 = vshll.u32 %v3318_v47, 16  ;;  %v1802_v21 = vadd.f32 %v1758_v10, %v1554_v35  ;;  %v3323_v5 = vshll.u32 %v3319_v7, 16  ;;  %v3322_v13 = vshrl.u32 %v3318_v47, 16 }
 0x311   : > { %vm3485_vm7 = vcmp.ne.s32.totalorder %v3279_v42, 0  ;;  %vm3521_vm8 = vcmp.lt.s32.totalorder %v3279_v42, 0  ;;  %v3593_v25 = vadd.s32 18, %v3279_v42  ;;  %v3305_v2 = vadd.s32 %v3304_v15, %v3295_v24  ;;  %v1761_v37 = vpop.f32.mrf.mxu2 }
 0x312   : > { %vm3557_vm1 = vmand %vm3521_vm8, %vm3485_vm7  ;;  %vm3325_vm9 = vc.u32 %v3317_v52, %v3321_v20  ;;  %v3327_v54 = vadd.s32 %v3321_v20, %v3317_v52  ;;  %v5790_v41 = vadd.s32 19, %v2372_v12  ;;  %v3324_v39 = vshrl.u32 %v3319_v7, 16  ;;  %v2009_v52 = vpop.f32.mrf.mxu3  ;;  %v1515_v29 = vpop.f32.mrf.mxu1 }
 0x313   : > { %v3629_v34 = vsel %vm3557_vm1, %v3593_v25, %v3279_v42  ;;  %v3306_v9 = vshrl.u32 %v3305_v2, 4  ;;  %v3326_v27 = vsel %vm3325_vm9, 1, %v5879_v6  ;;  %v2373_v63 = vadd.s32 264, %v4802_v59 }
 0x314   : > { %vm3665_vm10 = vcmp.ge.s32.totalorder %v3629_v34, 1  ;;  %vm3701_vm11 = vcmp.le.s32.totalorder %v3629_v34, 16  ;;  %v3328_v4 = vadd.s32 %v3326_v27, %v3320_v56  ;;  %vm3329_vm12 = vc.u32 %v3327_v54, %v3323_v5 }
 0x315   : > { %vm3737_vm13 = vmand %vm3665_vm10, %vm3701_vm11  ;;  %v3307_v16 = vmul.u32 18, %v3306_v9  ;;  %v3330_v18 = vsel %vm3329_vm12, 1, %v5879_v6  ;;  %v2050_v17 = vadd.f32 %v2006_v43, %v1802_v21  ;;  %v3343_v46 = vand.u32 65535, %v5790_v41 }
 0x316   : > { %v3773_v51 = vsel %vm3737_vm13, %v2332_v22, 0.0  ;;  %v3332_v19 = vadd.s32 %v3330_v18, %v3328_v4  ;;  %v2333_v30 = vmax.f32 %v5783_v28, 0.0  ;;  %v3344_v61 = vshrl.u32 %v5790_v41, 16 }
 0x317   : > { %v3808_v14 = vadd.f32 %v3807_v23, %v3773_v51  ;;  %v3308_v48 = vsub.s32 %v5762_v44, %v3307_v16  ;;  %v5797_v33 = vadd.s32 19, %v2373_v63  ;;  %v3346_v53 = vmul.u32 14564, %v3343_v46  ;;  %v5921_v16 = vld [vmem:[#allocation17_spill] sm:$0xff] }
 0x318   : > { %v3333_v31 = vadd.s32 %v3332_v19, %v3322_v13  ;;  %v3347_v32 = vmul.u32 58254, %v3343_v46  ;;  %v3348_v44 = vmul.u32 14564, %v3344_v61  ;;  %v2298_v0 = vadd.f32 %v2254_v40, %v2050_v17  ;;  %v2257_v13 = vpop.f32.mrf.mxu0 }
 0x319   : > { %vm3486_vm14 = vcmp.ne.s32.totalorder %v3308_v48, 0  ;;  %vm3522_vm15 = vcmp.lt.s32.totalorder %v3308_v48, 0  ;;  %v3594_v58 = vadd.s32 18, %v3308_v48  ;;  %v1555_v60 = vadd.f32 %v1513_v55, %v5920_v11  ;;  %v1763_v5 = vpop.f32.mrf.mxu2 }
 0x31a   : > { %vm3558_vm0 = vmand %vm3522_vm15, %vm3486_vm14  ;;  %v3334_v3 = vadd.s32 %v3333_v31, %v3324_v39  ;;  %v3349_v26 = vmul.u32 58254, %v3344_v61  ;;  %v3350_v50 = vshll.u32 %v3347_v32, 16  ;;  %v3352_v1 = vshll.u32 %v3348_v44, 16  ;;  %v2011_v61 = vpop.f32.mrf.mxu3 }
 0x31b   : > { %v3630_v62 = vsel %vm3558_vm0, %v3594_v58, %v3308_v48  ;;  %v1803_v36 = vadd.f32 %v1761_v37, %v1555_v60  ;;  %v3372_v49 = vand.u32 65535, %v5797_v33  ;;  %v2374_v24 = vadd.s32 272, %v4802_v59 }
 0x31c   : > { %vm3666_vm2 = vcmp.ge.s32.totalorder %v3630_v62, 1  ;;  %vm3702_vm3 = vcmp.le.s32.totalorder %v3630_v62, 16  ;;  %v3335_v22 = vshrl.u32 %v3334_v3, 4  ;;  %vm3354_vm5 = vc.u32 %v3346_v53, %v3350_v50 }
 0x31d   : > { %vm3738_vm4 = vmand %vm3666_vm2, %vm3702_vm3  ;;  %v3356_v38 = vadd.s32 %v3350_v50, %v3346_v53  ;;  %v3351_v47 = vshrl.u32 %v3347_v32, 16  ;;  %v3355_v23 = vsel %vm3354_vm5, 1, %v5879_v6  ;;  %v3373_v42 = vshrl.u32 %v5797_v33, 16 }
 0x31e   : > { %v3774_v45 = vsel %vm3738_vm4, %v2333_v30, 0.0  ;;  %v3336_v8 = vmul.u32 18, %v3335_v22  ;;  %v3353_v10 = vshrl.u32 %v3348_v44, 16  ;;  %v3357_v7 = vadd.s32 %v3355_v23, %v3349_v26  ;;  %v1518_v44 = vpop.f32.mrf.mxu1 }
 0x31f   : > { %v3809_v28 = vadd.f32 %v3808_v14, %v3774_v45  ;;  %vm3358_vm6 = vc.u32 %v3356_v38, %v3352_v1  ;;  %v3375_v56 = vmul.u32 14564, %v3372_v49  ;;  %v3376_v20 = vmul.u32 58254, %v3372_v49  ;;  %v5922_v1 = vld [vmem:[#allocation18_spill] sm:$0xff] }
 0x320   : > { %v3337_v15 = vsub.s32 %v5777_v57, %v3336_v8  ;;  %v3359_v35 = vsel %vm3358_vm6, 1, %v5879_v6  ;;  %v3377_v12 = vmul.u32 14564, %v3373_v42  ;;  %v2334_v21 = vmax.f32 %v2298_v0, 0.0 }
 0x321   : > { %v3361_v2 = vadd.s32 %v3359_v35, %v3357_v7  ;;  %v3378_v54 = vmul.u32 58254, %v3373_v42  ;;  %v3379_v34 = vshll.u32 %v3376_v20, 16  ;;  %v2051_v27 = vadd.f32 %v2009_v52, %v1803_v36 }
 0x322   : > { %vm3487_vm7 = vcmp.ne.s32.totalorder %v3337_v15, 0  ;;  %vm3523_vm8 = vcmp.lt.s32.totalorder %v3337_v15, 0  ;;  %v3595_v25 = vadd.s32 18, %v3337_v15  ;;  %v3381_v9 = vshll.u32 %v3377_v12, 16 }
 0x323   : > { %vm3559_vm1 = vmand %vm3523_vm8, %vm3487_vm7  ;;  %v3362_v4 = vadd.s32 %v3361_v2, %v3351_v47  ;;  %v1556_v43 = vadd.f32 %v1515_v29, %v5921_v16  ;;  %vm3383_vm11 = vc.u32 %v3375_v56, %v3379_v34  ;;  %v3385_v18 = vadd.s32 %v3379_v34, %v3375_v56 }
 0x324   : > { %v3631_v57 = vsel %vm3559_vm1, %v3595_v25, %v3337_v15  ;;  %v3384_v19 = vsel %vm3383_vm11, 1, %v5879_v6  ;;  %v5808_v55 = vadd.s32 19, %v2374_v24  ;;  %v3380_v14 = vshrl.u32 %v3376_v20, 16  ;;  %v1766_v24 = vpop.f32.mrf.mxu2 }
 0x325   : > { %vm3667_vm9 = vcmp.ge.s32.totalorder %v3631_v57, 1  ;;  %vm3703_vm10 = vcmp.le.s32.totalorder %v3631_v57, 16  ;;  %v3363_v51 = vadd.s32 %v3362_v4, %v3353_v10  ;;  %v1804_v39 = vadd.f32 %v1763_v5, %v1556_v43 }
 0x326   : > { %vm3739_vm12 = vmand %vm3667_vm9, %vm3703_vm10  ;;  %v3386_v48 = vadd.s32 %v3384_v19, %v3378_v54  ;;  %vm3387_vm13 = vc.u32 %v3385_v18, %v3381_v9  ;;  %v2299_v46 = vadd.f32 %v2257_v13, %v2051_v27  ;;  %v3382_v58 = vshrl.u32 %v3377_v12, 16 }
 0x327   : > { %v3775_v63 = vsel %vm3739_vm12, %v2334_v21, 0.0  ;;  %v3364_v30 = vshrl.u32 %v3363_v51, 4  ;;  %v3388_v31 = vsel %vm3387_vm13, 1, %v5879_v6  ;;  %v3401_v40 = vand.u32 65535, %v5808_v55  ;;  %v2014_v51 = vpop.f32.mrf.mxu3 }
 0x328   : > { %v3810_v17 = vadd.f32 %v3809_v28, %v3775_v63  ;;  %v3390_v37 = vadd.s32 %v3388_v31, %v3386_v48  ;;  %v3402_v3 = vshrl.u32 %v5808_v55, 16  ;;  %v2052_v32 = vadd.f32 %v2011_v61, %v1804_v39  ;;  %v2259_v28 = vpop.f32.mrf.mxu0  ;;  %v1520_v63 = vpop.f32.mrf.mxu1 }
 0x329   : > { %v3365_v53 = vmul.u32 18, %v3364_v30  ;;  %v3404_v0 = vmul.u32 14564, %v3401_v40  ;;  %v3405_v11 = vmul.u32 58254, %v3401_v40  ;;  %v2335_v26 = vmax.f32 %v2299_v46, 0.0 }
 0x32a   : > { %v3391_v62 = vadd.s32 %v3390_v37, %v3380_v14  ;;  %v3406_v60 = vmul.u32 14564, %v3402_v3  ;;  %v2375_v50 = vadd.s32 280, %v4802_v59  ;;  %v1557_v49 = vadd.f32 %v1518_v44, %v5922_v1 }
 0x32b   : > { %v3366_v22 = vsub.s32 %v5790_v41, %v3365_v53  ;;  %v3407_v45 = vmul.u32 58254, %v3402_v3  ;;  %v3408_v8 = vshll.u32 %v3405_v11, 16  ;;  %v2300_v47 = vadd.f32 %v2259_v28, %v2052_v32  ;;  %v5923_v3 = vld [vmem:[#allocation19_spill] sm:$0xff] }
 0x32c   : > { %v3392_v36 = vadd.s32 %v3391_v62, %v3382_v58  ;;  %v3410_v52 = vshll.u32 %v3406_v60, 16  ;;  %v1805_v41 = vadd.f32 %v1766_v24, %v1557_v49  ;;  %v5817_v10 = vadd.s32 19, %v2375_v50  ;;  %v1768_v58 = vpop.f32.mrf.mxu2 }
 0x32d   : > { %vm3488_vm14 = vcmp.ne.s32.totalorder %v3366_v22, 0  ;;  %vm3524_vm15 = vcmp.lt.s32.totalorder %v3366_v22, 0  ;;  %v3596_v38 = vadd.s32 18, %v3366_v22  ;;  %vm3412_vm2 = vc.u32 %v3404_v0, %v3408_v8 }
 0x32e   : > { %vm3560_vm0 = vmand %vm3524_vm15, %vm3488_vm14  ;;  %v3393_v23 = vshrl.u32 %v3392_v36, 4  ;;  %v3414_v42 = vadd.s32 %v3408_v8, %v3404_v0  ;;  %v3413_v59 = vsel %vm3412_vm2, 1, %v5879_v6  ;;  %v3409_v35 = vshrl.u32 %v3405_v11, 16 }
 0x32f   : > { %v3632_v15 = vsel %vm3560_vm0, %v3596_v38, %v3366_v22  ;;  %v3415_v29 = vadd.s32 %v3413_v59, %v3407_v45  ;;  %v3430_v56 = vand.u32 65535, %v5817_v10  ;;  %v3431_v20 = vshrl.u32 %v5817_v10, 16  ;;  %v2016_v36 = vpop.f32.mrf.mxu3 }
 0x330   : > { %vm3668_vm3 = vcmp.ge.s32.totalorder %v3632_v15, 1  ;;  %vm3704_vm4 = vcmp.le.s32.totalorder %v3632_v15, 16  ;;  %v3394_v7 = vmul.u32 18, %v3393_v23  ;;  %vm3416_vm6 = vc.u32 %v3414_v42, %v3410_v52  ;;  %v2262_v61 = vpop.f32.mrf.mxu0 }
 0x331   : > { %vm3740_vm5 = vmand %vm3668_vm3, %vm3704_vm4  ;;  %v3411_v2 = vshrl.u32 %v3406_v60, 16  ;;  %v3417_v21 = vsel %vm3416_vm6, 1, %v5879_v6  ;;  %v3433_v34 = vmul.u32 14564, %v3430_v56  ;;  %v3434_v9 = vmul.u32 58254, %v3430_v56 }
 0x332   : > { %v3776_v12 = vsel %vm3740_vm5, %v2335_v26, 0.0  ;;  %v3395_v25 = vsub.s32 %v5797_v33, %v3394_v7  ;;  %v3419_v54 = vadd.s32 %v3417_v21, %v3415_v29  ;;  %v3435_v13 = vmul.u32 14564, %v3431_v20 }
 0x333   : > { %v3811_v5 = vadd.f32 %v3810_v17, %v3776_v12  ;;  %v2336_v27 = vmax.f32 %v2300_v47, 0.0  ;;  %v3436_v16 = vmul.u32 58254, %v3431_v20  ;;  %v3437_v43 = vshll.u32 %v3434_v9, 16 }
 0x334   : > { %vm3489_vm7 = vcmp.ne.s32.totalorder %v3395_v25, 0  ;;  %vm3525_vm8 = vcmp.lt.s32.totalorder %v3395_v25, 0  ;;  %v3597_v57 = vadd.s32 18, %v3395_v25  ;;  %v3420_v4 = vadd.s32 %v3419_v54, %v3409_v35 }
 0x335   : > { %vm3561_vm1 = vmand %vm3525_vm8, %vm3489_vm7  ;;  %v3439_v39 = vshll.u32 %v3435_v13, 16  ;;  %vm3441_vm11 = vc.u32 %v3433_v34, %v3437_v43  ;;  %v2053_v19 = vadd.f32 %v2014_v51, %v1805_v41  ;;  %v3443_v48 = vadd.s32 %v3437_v43, %v3433_v34 }
 0x336   : > { %v3633_v18 = vsel %vm3561_vm1, %v3597_v57, %v3395_v25  ;;  %v3421_v33 = vadd.s32 %v3420_v4, %v3411_v2  ;;  %v3442_v14 = vsel %vm3441_vm11, 1, %v5879_v6  ;;  %v3438_v37 = vshrl.u32 %v3434_v9, 16 }
 0x337   : > { %vm3669_vm9 = vcmp.ge.s32.totalorder %v3633_v18, 1  ;;  %vm3705_vm10 = vcmp.le.s32.totalorder %v3633_v18, 16  ;;  %v3444_v30 = vadd.s32 %v3442_v14, %v3436_v16  ;;  %vm3445_vm13 = vc.u32 %v3443_v48, %v3439_v39 }
 0x338   : > { %vm3741_vm12 = vmand %vm3669_vm9, %vm3705_vm10  ;;  %v3422_v46 = vshrl.u32 %v3421_v33, 4  ;;  %v1558_v53 = vadd.f32 %v1520_v63, %v5923_v3  ;;  %v3446_v32 = vsel %vm3445_vm13, 1, %v5879_v6  ;;  %v2301_v44 = vadd.f32 %v2262_v61, %v2053_v19  ;;  %v2264_v8 = vpop.f32.mrf.mxu0 }
 0x339   : > { %v3777_v17 = vsel %vm3741_vm12, %v2336_v27, 0.0  ;;  %v3440_v62 = vshrl.u32 %v3435_v13, 16  ;;  %v3448_v0 = vadd.s32 %v3446_v32, %v3444_v30  ;;  %vm3814_vm9 = vcmask 1045504  }
 0x33a   : > { %v3812_v31 = vadd.f32 %v3811_v5, %v3777_v17  ;;  %v3423_v40 = vmul.u32 18, %v3422_v46  ;;  %v1806_v60 = vadd.f32 %v1768_v58, %v1558_v53  ;;  %v2337_v50 = vmax.f32 %v2301_v44, 0.0 }
 0x33b   : > { %v3449_v26 = vadd.s32 %v3448_v0, %v3438_v37 }
 0x33c   : > { %v3424_v11 = vsub.s32 %v5808_v55, %v3423_v40  ;;  %v2054_v24 = vadd.f32 %v2016_v36, %v1806_v60 }
 0x33d   : > { %v3450_v1 = vadd.s32 %v3449_v26, %v3440_v62 }
 0x33e   : > { %vm3490_vm14 = vcmp.ne.s32.totalorder %v3424_v11, 0  ;;  %vm3526_vm15 = vcmp.lt.s32.totalorder %v3424_v11, 0  ;;  %v3598_v22 = vadd.s32 18, %v3424_v11  ;;  %v2302_v55 = vadd.f32 %v2264_v8, %v2054_v24 }
 0x33f   : > { %vm3562_vm0 = vmand %vm3526_vm15, %vm3490_vm14  ;;  %v3451_v45 = vshrl.u32 %v3450_v1, 4 }
 0x340   : > { %v3634_v49 = vsel %vm3562_vm0, %v3598_v22, %v3424_v11  ;;  %v2338_v23 = vmax.f32 %v2302_v55, 0.0 }
 0x341   : > { %vm3670_vm2 = vcmp.ge.s32.totalorder %v3634_v49, 1  ;;  %vm3706_vm3 = vcmp.le.s32.totalorder %v3634_v49, 16  ;;  %v3452_v38 = vmul.u32 18, %v3451_v45 }
 0x342   : > { %vm3742_vm4 = vmand %vm3670_vm2, %vm3706_vm3 }
 0x343   : > { %v3778_v6 = vsel %vm3742_vm4, %v2337_v50, 0.0  ;;  %v3453_v52 = vsub.s32 %v5817_v10, %v3452_v38 }
 0x344   : > { %v3813_v28 = vadd.f32 %v3812_v31, %v3778_v6 }
 0x345   : > { %vm3491_vm5 = vcmp.ne.s32.totalorder %v3453_v52, 0  ;;  %vm3527_vm6 = vcmp.lt.s32.totalorder %v3453_v52, 0  ;;  %v3599_v47 = vadd.s32 18, %v3453_v52 }
 0x346   : > { %vm3563_vm7 = vmand %vm3527_vm6, %vm3491_vm5 }
 0x347   : > { %v3635_v42 = vsel %vm3563_vm7, %v3599_v47, %v3453_v52 }
 0x348   : > { %vm3671_vm8 = vcmp.ge.s32.totalorder %v3635_v42, 1  ;;  %vm3707_vm1 = vcmp.le.s32.totalorder %v3635_v42, 16 }
 0x349   : > { %vm3743_vm10 = vmand %vm3671_vm8, %vm3707_vm1 }
 0x34a   : > { %v3779_v15 = vsel %vm3743_vm10, %v2338_v23, 0.0 }
 0x34b   : > { %v3815_v41 = vsel %vm3814_vm9, %v3779_v15, 0.0 }
 0x34c   : > { %v3816_v59 = vadd.f32 %v3815_v41, %v3813_v28 }
 0x34e   : > { %v3817_v7 = vrot.slane %v3816_v59, 4 }
 0x350   : > { %v3818_v29 = vadd.f32 %v3817_v7, %v3816_v59 }
 0x352   : > { %v3819_v35 = vrot.slane %v3818_v29, 2 }
 0x354   : > { %v3820_v10 = vadd.f32 %v3819_v35, %v3818_v29 }
 0x356   : > { %v3821_v56 = vrot.slane %v3820_v10, 1 }
 0x358   : > { %v3822_v20 = vadd.f32 %v3821_v56, %v3820_v10 }
 0x35a   : > { %v3823_v12 = vmul.f32 0.00390625, %v3822_v20 }
 0x35c   : > { %3824 = vst [vmem:[%s135_s29] sm:$0x1] %v3823_v12 }
 0x35d   : > { %4141 = shalt.err (!%p4138_p3)
}
 0x35e   : > { %4074 = dma.vmem_to_hbm [thread:$0]  (%p4232_p5), %s3837_s30, 16, %s3839_s3, %s3826_s4  }
 0x35f PF: > { %p4080_p4 = scmp.ge.s32.totalorder %s4176_s12, 2  ;;  %s3850_s17 = sand.u32 1, %s4164_s9  }
 0x360   : > { %s3851_s21 = scalar_lea.sflag [#allocation3], %s3850_s17 }
 0x361   : > { %p4077_p7 = pnand %p4080_p4, %p4236_p6 }
 0x363   : > { %p4078_p8 = pneg %p4077_p7 }
 0x365   : > { %4159 = dma.done.wait (%p4078_p8), %s3851_s21, 16  }
 0x366   : > { %4161 = vsyncadd (%p4078_p8), %s3851_s21, 4294967280  ;;  %p12_p9 = scmp.ge.s32.totalorder %s4219_s15, 4   ;;  %s5924_s9 = smov %s4168_s10 }
 0x367   : > { %s5925_s10 = smov %s4172_s11  ;;  %s5926_s11 = smov %s4230_s18 }
 0x368   : > { %s5927_s12 = smov %s4219_s15  ;;  %14 = sbr.rel (!%p12_p9) target bundleno = 3 (0x3), region = 71 }
 0x36d   :  { %3856 = vsyncpa [#allocation3], 1 }
 0x36e   :  { %3858 = vsyncpa [#allocation3 + $0x1], 1 }

</bundles_post_ra>
